<compile_context>
chip_gen: v6e
topology: v6e:2x2x1
jax: 0.10.0
libtpu: 0.0.40
codegen_flags: <defaults>
</compile_context>

<pallas_src>
import jax
import jax.numpy as jnp
from jax.experimental import pallas as pl
from jax.experimental.pallas import tpu as pltpu

# ---- model dimensions (match the PyTorch Classifier) ----
D_IN = 40
D_MODEL = 80
N_HEADS = 2
HEAD_DIM = D_MODEL // N_HEADS      # 40
D_FF = 256
N_SPKS = 600
LN_EPS = 1e-5

# ---- lane-padded dimensions (128-lane vregs) ----
D_PAD = 128          # padded D_IN and D_MODEL
HEAD_PAD = 128       # each head gets its own 128-lane group
FF_PAD = 256         # already a multiple of 128
NS_PAD = 640         # padded N_SPKS

# weight slab column offsets (slab rows = D_PAD = 128)
_W_PRE_OFF = 0
_W_QKV_OFF = _W_PRE_OFF + D_PAD                  # 128   (6 * 128 wide)
_W_AO0_OFF = _W_QKV_OFF + 6 * HEAD_PAD           # 896
_W_AO1_OFF = _W_AO0_OFF + D_PAD                  # 1024
_W_F1_OFF = _W_AO1_OFF + D_PAD                   # 1152
_W_P1_OFF = _W_F1_OFF + FF_PAD                   # 1408
_W_P2_OFF = _W_P1_OFF + D_PAD                    # 1536
_W_SLAB_COLS = _W_P2_OFF + NS_PAD                # 2176

# bias / gamma / beta slab column offsets (1 row)
_B_PRE_OFF = 0
_B_QKV_OFF = _B_PRE_OFF + D_PAD                  # 128   (6 * 128 wide)
_B_AO_OFF = _B_QKV_OFF + 6 * HEAD_PAD            # 896
_G1_OFF = _B_AO_OFF + D_PAD                      # 1024
_BE1_OFF = _G1_OFF + D_PAD                       # 1152
_B_F1_OFF = _BE1_OFF + D_PAD                     # 1280
_B_F2_OFF = _B_F1_OFF + FF_PAD                   # 1536
_G2_OFF = _B_F2_OFF + D_PAD                      # 1664
_BE2_OFF = _G2_OFF + D_PAD                       # 1792
_B_P1_OFF = _BE2_OFF + D_PAD                     # 1920
_B_P2_OFF = _B_P1_OFF + D_PAD                    # 2048
_B_SLAB_COLS = _B_P2_OFF + NS_PAD                # 2688


def classifier_kernel(mels_ref, w_ref, wf2_ref, b_ref, out_ref):
    bb, seq_len, _ = mels_ref.shape
    m_rows = bb * seq_len

    # lane mask for LayerNorm over the *real* 80 features within the 128 lanes
    lane = jax.lax.broadcasted_iota(jnp.int32, (1, D_PAD), 1)
    ln_mask = (lane < D_MODEL).astype(jnp.float32)

    def wcol(off, width):
        return w_ref[:, off:off + width]

    def bcol(off, width):
        return b_ref[:, off:off + width]

    def layer_norm(x, gamma, beta):
        # PyTorch nn.LayerNorm: biased variance over the 80 real features.
        mu = jnp.sum(x, axis=-1, keepdims=True) * (1.0 / D_MODEL)
        xc = (x - mu) * ln_mask                       # padded lanes -> 0
        var = jnp.sum(xc * xc, axis=-1, keepdims=True) * (1.0 / D_MODEL)
        return xc * jax.lax.rsqrt(var + LN_EPS) * gamma + beta

    # ---- prenet: Linear(40 -> 80), operating on the padded 128-lane tiles ----
    x = mels_ref[...].reshape(m_rows, D_PAD)
    h = jnp.dot(x, wcol(_W_PRE_OFF, D_PAD),
                preferred_element_type=jnp.float32) + bcol(_B_PRE_OFF, D_PAD)

    # ---- self-attention (embed_dim=80, nhead=2) ----
    # QKV projection into 6 lane-aligned 128-wide groups: [q0, q1, k0, k1, v0, v1]
    qkv = jnp.dot(h, wcol(_W_QKV_OFF, 6 * HEAD_PAD),
                  preferred_element_type=jnp.float32) + bcol(_B_QKV_OFF, 6 * HEAD_PAD)
    scale = 1.0 / (HEAD_DIM ** 0.5)

    def attend(g):
        q = qkv[:, g * HEAD_PAD:(g + 1) * HEAD_PAD].reshape(bb, seq_len, HEAD_PAD) * scale
        k = qkv[:, (2 + g) * HEAD_PAD:(3 + g) * HEAD_PAD].reshape(bb, seq_len, HEAD_PAD)
        v = qkv[:, (4 + g) * HEAD_PAD:(5 + g) * HEAD_PAD].reshape(bb, seq_len, HEAD_PAD)
        s = jnp.einsum('bqd,bkd->bqk', q, k, preferred_element_type=jnp.float32)
        s = s - jnp.max(s, axis=-1, keepdims=True)
        p = jnp.exp(s)
        p = p * pl.reciprocal(jnp.sum(p, axis=-1, keepdims=True), approx=True)
        ctx = jnp.einsum('bqk,bkd->bqd', p, v, preferred_element_type=jnp.float32)
        return ctx.reshape(m_rows, HEAD_PAD)

    ctx0 = attend(0)
    ctx1 = attend(1)
    # head concat replaced by a row-split of the output projection
    attn = (jnp.dot(ctx0, wcol(_W_AO0_OFF, D_PAD), preferred_element_type=jnp.float32)
            + jnp.dot(ctx1, wcol(_W_AO1_OFF, D_PAD), preferred_element_type=jnp.float32)
            + bcol(_B_AO_OFF, D_PAD))

    # ---- residual + norm1 (post-norm; dropout == identity) ----
    h = layer_norm(h + attn, bcol(_G1_OFF, D_PAD), bcol(_BE1_OFF, D_PAD))

    # ---- feed-forward: Linear(80->256) -> ReLU -> Linear(256->80) ----
    f = jnp.maximum(
        jnp.dot(h, wcol(_W_F1_OFF, FF_PAD),
                preferred_element_type=jnp.float32) + bcol(_B_F1_OFF, FF_PAD), 0.0)
    f = jnp.dot(f, wf2_ref[...],
                preferred_element_type=jnp.float32) + bcol(_B_F2_OFF, D_PAD)
    h = layer_norm(h + f, bcol(_G2_OFF, D_PAD), bcol(_BE2_OFF, D_PAD))

    # ---- mean pooling over the sequence dimension ----
    stats = jnp.mean(h.reshape(bb, seq_len, D_PAD), axis=1)        # (bb, 128)

    # ---- pred_layer: Linear(80->80) -> ReLU -> Linear(80->600) ----
    p1 = jnp.maximum(
        jnp.dot(stats, wcol(_W_P1_OFF, D_PAD),
                preferred_element_type=jnp.float32) + bcol(_B_P1_OFF, D_PAD), 0.0)
    logits = jnp.dot(p1, wcol(_W_P2_OFF, NS_PAD),
                     preferred_element_type=jnp.float32) + bcol(_B_P2_OFF, NS_PAD)
    out_ref[...] = logits


def _round_up(x, m):
    return (x + m - 1) // m * m


def classifier_forward(mels, packed_params, *, block_b=16):
    """mels: (B, L, 40) float32 -> logits (B, N_SPKS) float32."""
    w_slab, w_f2, b_slab = packed_params
    B, L, _ = mels.shape

    # batch block: multiple of 8 sublanes, no excessive padding for tiny B
    bblk = _round_up(max(1, min(block_b, B)), 8)
    B_pad = _round_up(B, bblk)

    # one pad: batch up to a block multiple + mel features 40 -> 128 lanes
    mels_p = jnp.pad(mels, ((0, B_pad - B), (0, 0), (0, D_PAD - D_IN)))

    out = pl.pallas_call(
        classifier_kernel,
        out_shape=jax.ShapeDtypeStruct((B_pad, NS_PAD), jnp.float32),
        grid_spec=pltpu.PrefetchScalarGridSpec(
            num_scalar_prefetch=0,
            grid=(B_pad // bblk,),
            in_specs=[
                pl.BlockSpec((bblk, L, D_PAD), lambda b: (b, 0, 0)),
                pl.BlockSpec((D_PAD, _W_SLAB_COLS), lambda b: (0, 0)),
                pl.BlockSpec((FF_PAD, D_PAD), lambda b: (0, 0)),
                pl.BlockSpec((1, _B_SLAB_COLS), lambda b: (0, 0)),
            ],
            out_specs=pl.BlockSpec((bblk, NS_PAD), lambda b: (b, 0)),
        ),
        compiler_params=pltpu.CompilerParams(
            dimension_semantics=("parallel",)),
    )(mels_p, w_slab, w_f2, b_slab)

    return out[:B, :N_SPKS]


def init_params(key):
    """Deterministic synthetic parameters, shapes matching the PyTorch module.
    Weights are stored pre-transposed as (in_features, out_features)."""
    ks = jax.random.split(key, 14)
    s = 0.05

    def w(k, shape):
        return (s * jax.random.normal(k, shape)).astype(jnp.float32)

    return dict(
        w_pre=w(ks[0], (D_IN, D_MODEL)), b_pre=w(ks[1], (D_MODEL,)),
        w_qkv=w(ks[2], (D_MODEL, 3 * D_MODEL)), b_qkv=w(ks[3], (3 * D_MODEL,)),
        w_ao=w(ks[4], (D_MODEL, D_MODEL)), b_ao=w(ks[5], (D_MODEL,)),
        g1=jnp.ones((D_MODEL,), jnp.float32), be1=jnp.zeros((D_MODEL,), jnp.float32),
        w_f1=w(ks[6], (D_MODEL, D_FF)), b_f1=w(ks[7], (D_FF,)),
        w_f2=w(ks[8], (D_FF, D_MODEL)), b_f2=w(ks[9], (D_MODEL,)),
        g2=jnp.ones((D_MODEL,), jnp.float32), be2=jnp.zeros((D_MODEL,), jnp.float32),
        w_p1=w(ks[10], (D_MODEL, D_MODEL)), b_p1=w(ks[11], (D_MODEL,)),
        w_p2=w(ks[12], (D_MODEL, N_SPKS)), b_p2=w(ks[13], (N_SPKS,)),
    )


def pack_params(p):
    """Zero-pad to 128-lane tiles and pack into 3 slabs (2 weight, 1 bias)."""
    f32 = jnp.float32

    def pad2(w, rows, cols):
        out = jnp.zeros((rows, cols), f32)
        return out.at[:w.shape[0], :w.shape[1]].set(w.astype(f32))

    def pad1(v, cols):
        out = jnp.zeros((1, cols), f32)
        return out.at[0, :v.shape[0]].set(v.astype(f32))

    w_qkv, b_qkv = p["w_qkv"], p["b_qkv"]
    q, k, v = (w_qkv[:, :D_MODEL], w_qkv[:, D_MODEL:2 * D_MODEL],
               w_qkv[:, 2 * D_MODEL:])
    bq, bk, bv = (b_qkv[:D_MODEL], b_qkv[D_MODEL:2 * D_MODEL],
                  b_qkv[2 * D_MODEL:])

    # per-head, lane-aligned 128-wide groups: [q0, q1, k0, k1, v0, v1]
    qkv_groups, bqkv_groups = [], []
    for mat, bias in ((q, bq), (k, bk), (v, bv)):
        for hh in range(N_HEADS):
            lo, hi = hh * HEAD_DIM, (hh + 1) * HEAD_DIM
            qkv_groups.append(pad2(mat[:, lo:hi], D_PAD, HEAD_PAD))
            bqkv_groups.append(pad1(bias[lo:hi], HEAD_PAD))

    w_slab = jnp.concatenate(
        [pad2(p["w_pre"], D_PAD, D_PAD)]
        + qkv_groups
        + [pad2(p["w_ao"][:HEAD_DIM, :], D_PAD, D_PAD),   # out-proj rows for head 0
           pad2(p["w_ao"][HEAD_DIM:, :], D_PAD, D_PAD),   # out-proj rows for head 1
           pad2(p["w_f1"], D_PAD, FF_PAD),
           pad2(p["w_p1"], D_PAD, D_PAD),
           pad2(p["w_p2"], D_PAD, NS_PAD)],
        axis=1)
    assert w_slab.shape == (D_PAD, _W_SLAB_COLS)

    w_f2 = pad2(p["w_f2"], FF_PAD, D_PAD)

    b_slab = jnp.concatenate(
        [pad1(p["b_pre"], D_PAD)]
        + bqkv_groups
        + [pad1(p["b_ao"], D_PAD),
           pad1(p["g1"], D_PAD), pad1(p["be1"], D_PAD),
           pad1(p["b_f1"], FF_PAD),
           pad1(p["b_f2"], D_PAD),
           pad1(p["g2"], D_PAD), pad1(p["be2"], D_PAD),
           pad1(p["b_p1"], D_PAD),
           pad1(p["b_p2"], NS_PAD)],
        axis=1)
    assert b_slab.shape == (1, _B_SLAB_COLS)

    return w_slab, w_f2, b_slab


if __name__ == "__main__":
    key = jax.random.PRNGKey(0)
    k_in, k_par = jax.random.split(key)

    B, L = 2, 8
    mels = jax.random.normal(k_in, (B, L, D_IN), dtype=jnp.float32)
    packed = pack_params(init_params(k_par))

    fwd = jax.jit(classifier_forward)
    out = jax.block_until_ready(fwd(mels, packed))

    assert out.shape == (B, N_SPKS), out.shape
    assert out.dtype == jnp.float32
    assert bool(jnp.all(jnp.isfinite(out)))
    print("KERNEL_OK")
</pallas_src>

<mosaic_0001>
module attributes {stable_mosaic.version = 11 : i64} {
  func.func @classifier_kernel(%arg0: i32, %arg1: memref<8x8x128xf32, #tpu.memory_space<vmem>>, %arg2: memref<128x2176xf32, #tpu.memory_space<vmem>>, %arg3: memref<256x128xf32, #tpu.memory_space<vmem>>, %arg4: memref<1x2688xf32, #tpu.memory_space<vmem>>, %arg5: memref<8x640xf32, #tpu.memory_space<vmem>>) attributes {dimension_semantics = [#tpu.dimension_semantics<parallel>], iteration_bounds = array<i64: 1>, scalar_prefetch = 0 : i64, scratch_operands = 0 : i64, tpu.core_type = #tpu.core_type<tc>, window_params = [{transform_indices = @transform_0, window_bounds = array<i64: 8, 8, 128>}, {pipeline_mode = #tpu.pipeline_mode<synchronous>, transform_indices = @transform_1, window_bounds = array<i64: 128, 2176>}, {pipeline_mode = #tpu.pipeline_mode<synchronous>, transform_indices = @transform_2, window_bounds = array<i64: 256, 128>}, {pipeline_mode = #tpu.pipeline_mode<synchronous>, transform_indices = @transform_3, window_bounds = array<i64: 1, 2688>}, {transform_indices = @transform_4, window_bounds = array<i64: 8, 640>}]} {
    %0 = tpu.iota {dimensions = array<i32: 1>} : vector<1x128xi32>
    %c80_i32 = arith.constant 80 : i32
    %1 = vector.broadcast %c80_i32 : i32 to vector<1x128xi32>
    %2 = arith.cmpi slt, %0, %1 : vector<1x128xi32>
    %3 = arith.extui %2 : vector<1x128xi1> to vector<1x128xi32>
    %4 = arith.sitofp %3 : vector<1x128xi32> to vector<1x128xf32>
    %c0 = arith.constant 0 : index
    %c0_0 = arith.constant 0 : index
    %c0_1 = arith.constant 0 : index
    %5 = vector.load %arg1[%c0, %c0_0, %c0_1] : memref<8x8x128xf32, #tpu.memory_space<vmem>>, vector<8x8x128xf32>
    %6 = vector.shape_cast %5 : vector<8x8x128xf32> to vector<64x128xf32>
    %c0_2 = arith.constant 0 : index
    %c0_3 = arith.constant 0 : index
    %7 = vector.load %arg2[%c0_2, %c0_3] : memref<128x2176xf32, #tpu.memory_space<vmem>>, vector<128x128xf32>
    %cst = arith.constant dense<0.000000e+00> : vector<64x128xf32>
    %8 = tpu.matmul %6, %7, %cst {dimension_numbers = #tpu.dot_dimension_numbers<[1], [0], [0], [1], [0, 0, 1, 1], [], []>} : vector<64x128xf32>, vector<128x128xf32>, vector<64x128xf32> -> vector<64x128xf32>
    %c0_4 = arith.constant 0 : index
    %c0_5 = arith.constant 0 : index
    %9 = vector.load %arg4[%c0_4, %c0_5] : memref<1x2688xf32, #tpu.memory_space<vmem>>, vector<1x128xf32>
    %10 = vector.broadcast %9 : vector<1x128xf32> to vector<64x128xf32>
    %11 = arith.addf %8, %10 : vector<64x128xf32>
    %c0_6 = arith.constant 0 : index
    %c128 = arith.constant 128 : index
    %12 = vector.load %arg2[%c0_6, %c128] : memref<128x2176xf32, #tpu.memory_space<vmem>>, vector<128x768xf32>
    %cst_7 = arith.constant dense<0.000000e+00> : vector<64x768xf32>
    %13 = tpu.matmul %11, %12, %cst_7 {dimension_numbers = #tpu.dot_dimension_numbers<[1], [0], [0], [1], [0, 0, 1, 1], [], []>} : vector<64x128xf32>, vector<128x768xf32>, vector<64x768xf32> -> vector<64x768xf32>
    %c0_8 = arith.constant 0 : index
    %c128_9 = arith.constant 128 : index
    %14 = vector.load %arg4[%c0_8, %c128_9] : memref<1x2688xf32, #tpu.memory_space<vmem>>, vector<1x768xf32>
    %15 = vector.broadcast %14 : vector<1x768xf32> to vector<64x768xf32>
    %16 = arith.addf %13, %15 : vector<64x768xf32>
    %17 = vector.extract_strided_slice %16 {offsets = [0, 0], sizes = [64, 128], strides = [1, 1]} : vector<64x768xf32> to vector<64x128xf32>
    %18 = vector.shape_cast %17 : vector<64x128xf32> to vector<8x8x128xf32>
    %cst_10 = arith.constant 0.158113882 : f32
    %19 = vector.broadcast %cst_10 : f32 to vector<8x8x128xf32>
    %20 = arith.mulf %18, %19 : vector<8x8x128xf32>
    %21 = vector.extract_strided_slice %16 {offsets = [0, 256], sizes = [64, 128], strides = [1, 1]} : vector<64x768xf32> to vector<64x128xf32>
    %22 = vector.shape_cast %21 : vector<64x128xf32> to vector<8x8x128xf32>
    %23 = vector.extract_strided_slice %16 {offsets = [0, 512], sizes = [64, 128], strides = [1, 1]} : vector<64x768xf32> to vector<64x128xf32>
    %24 = vector.shape_cast %23 : vector<64x128xf32> to vector<8x8x128xf32>
    "tpu.trace_start"() <{level = 10 : i32, message = "bqd,bkd->bqk"}> : () -> ()
    %cst_11 = arith.constant dense<0.000000e+00> : vector<8x8x8xf32>
    %25 = tpu.matmul %20, %22, %cst_11 {dimension_numbers = #tpu.dot_dimension_numbers<[2], [2], [1], [1], [0, 0, 0, 1, 1, 1], [0], [0]>} : vector<8x8x128xf32>, vector<8x8x128xf32>, vector<8x8x8xf32> -> vector<8x8x8xf32>
    "tpu.trace_stop"() : () -> ()
    %cst_12 = arith.constant dense<0xFF800000> : vector<8x8xf32>
    %26 = vector.multi_reduction <maximumf>, %25, %cst_12 [2] : vector<8x8x8xf32> to vector<8x8xf32>
    %27 = vector.shape_cast %26 : vector<8x8xf32> to vector<8x8x1xf32>
    %28 = vector.broadcast %27 : vector<8x8x1xf32> to vector<8x8x8xf32>
    %29 = arith.subf %25, %28 : vector<8x8x8xf32>
    %30 = math.exp %29 : vector<8x8x8xf32>
    %cst_13 = arith.constant dense<0.000000e+00> : vector<8x8xf32>
    %31 = vector.multi_reduction <add>, %30, %cst_13 [2] : vector<8x8x8xf32> to vector<8x8xf32>
    %32 = vector.shape_cast %31 : vector<8x8xf32> to vector<8x8x1xf32>
    %33 = tpu.reciprocal %32 {approx = true} : vector<8x8x1xf32> -> vector<8x8x1xf32>
    %34 = vector.broadcast %33 : vector<8x8x1xf32> to vector<8x8x8xf32>
    %35 = arith.mulf %30, %34 : vector<8x8x8xf32>
    "tpu.trace_start"() <{level = 10 : i32, message = "bqk,bkd->bqd"}> : () -> ()
    %cst_14 = arith.constant dense<0.000000e+00> : vector<8x8x128xf32>
    %36 = tpu.matmul %35, %24, %cst_14 {dimension_numbers = #tpu.dot_dimension_numbers<[2], [1], [1], [2], [0, 0, 0, 1, 1, 2], [0], [0]>} : vector<8x8x8xf32>, vector<8x8x128xf32>, vector<8x8x128xf32> -> vector<8x8x128xf32>
    "tpu.trace_stop"() : () -> ()
    %37 = vector.shape_cast %36 : vector<8x8x128xf32> to vector<64x128xf32>
    %38 = vector.extract_strided_slice %16 {offsets = [0, 128], sizes = [64, 128], strides = [1, 1]} : vector<64x768xf32> to vector<64x128xf32>
    %39 = vector.shape_cast %38 : vector<64x128xf32> to vector<8x8x128xf32>
    %cst_15 = arith.constant 0.158113882 : f32
    %40 = vector.broadcast %cst_15 : f32 to vector<8x8x128xf32>
    %41 = arith.mulf %39, %40 : vector<8x8x128xf32>
    %42 = vector.extract_strided_slice %16 {offsets = [0, 384], sizes = [64, 128], strides = [1, 1]} : vector<64x768xf32> to vector<64x128xf32>
    %43 = vector.shape_cast %42 : vector<64x128xf32> to vector<8x8x128xf32>
    %44 = vector.extract_strided_slice %16 {offsets = [0, 640], sizes = [64, 128], strides = [1, 1]} : vector<64x768xf32> to vector<64x128xf32>
    %45 = vector.shape_cast %44 : vector<64x128xf32> to vector<8x8x128xf32>
    "tpu.trace_start"() <{level = 10 : i32, message = "bqd,bkd->bqk"}> : () -> ()
    %cst_16 = arith.constant dense<0.000000e+00> : vector<8x8x8xf32>
    %46 = tpu.matmul %41, %43, %cst_16 {dimension_numbers = #tpu.dot_dimension_numbers<[2], [2], [1], [1], [0, 0, 0, 1, 1, 1], [0], [0]>} : vector<8x8x128xf32>, vector<8x8x128xf32>, vector<8x8x8xf32> -> vector<8x8x8xf32>
    "tpu.trace_stop"() : () -> ()
    %cst_17 = arith.constant dense<0xFF800000> : vector<8x8xf32>
    %47 = vector.multi_reduction <maximumf>, %46, %cst_17 [2] : vector<8x8x8xf32> to vector<8x8xf32>
    %48 = vector.shape_cast %47 : vector<8x8xf32> to vector<8x8x1xf32>
    %49 = vector.broadcast %48 : vector<8x8x1xf32> to vector<8x8x8xf32>
    %50 = arith.subf %46, %49 : vector<8x8x8xf32>
    %51 = math.exp %50 : vector<8x8x8xf32>
    %cst_18 = arith.constant dense<0.000000e+00> : vector<8x8xf32>
    %52 = vector.multi_reduction <add>, %51, %cst_18 [2] : vector<8x8x8xf32> to vector<8x8xf32>
    %53 = vector.shape_cast %52 : vector<8x8xf32> to vector<8x8x1xf32>
    %54 = tpu.reciprocal %53 {approx = true} : vector<8x8x1xf32> -> vector<8x8x1xf32>
    %55 = vector.broadcast %54 : vector<8x8x1xf32> to vector<8x8x8xf32>
    %56 = arith.mulf %51, %55 : vector<8x8x8xf32>
    "tpu.trace_start"() <{level = 10 : i32, message = "bqk,bkd->bqd"}> : () -> ()
    %cst_19 = arith.constant dense<0.000000e+00> : vector<8x8x128xf32>
    %57 = tpu.matmul %56, %45, %cst_19 {dimension_numbers = #tpu.dot_dimension_numbers<[2], [1], [1], [2], [0, 0, 0, 1, 1, 2], [0], [0]>} : vector<8x8x8xf32>, vector<8x8x128xf32>, vector<8x8x128xf32> -> vector<8x8x128xf32>
    "tpu.trace_stop"() : () -> ()
    %58 = vector.shape_cast %57 : vector<8x8x128xf32> to vector<64x128xf32>
    %c0_20 = arith.constant 0 : index
    %c896 = arith.constant 896 : index
    %59 = vector.load %arg2[%c0_20, %c896] : memref<128x2176xf32, #tpu.memory_space<vmem>>, vector<128x128xf32>
    %cst_21 = arith.constant dense<0.000000e+00> : vector<64x128xf32>
    %60 = tpu.matmul %37, %59, %cst_21 {dimension_numbers = #tpu.dot_dimension_numbers<[1], [0], [0], [1], [0, 0, 1, 1], [], []>} : vector<64x128xf32>, vector<128x128xf32>, vector<64x128xf32> -> vector<64x128xf32>
    %c0_22 = arith.constant 0 : index
    %c1024 = arith.constant 1024 : index
    %61 = vector.load %arg2[%c0_22, %c1024] : memref<128x2176xf32, #tpu.memory_space<vmem>>, vector<128x128xf32>
    %cst_23 = arith.constant dense<0.000000e+00> : vector<64x128xf32>
    %62 = tpu.matmul %58, %61, %cst_23 {dimension_numbers = #tpu.dot_dimension_numbers<[1], [0], [0], [1], [0, 0, 1, 1], [], []>} : vector<64x128xf32>, vector<128x128xf32>, vector<64x128xf32> -> vector<64x128xf32>
    %63 = arith.addf %60, %62 : vector<64x128xf32>
    %c0_24 = arith.constant 0 : index
    %c896_25 = arith.constant 896 : index
    %64 = vector.load %arg4[%c0_24, %c896_25] : memref<1x2688xf32, #tpu.memory_space<vmem>>, vector<1x128xf32>
    %65 = vector.broadcast %64 : vector<1x128xf32> to vector<64x128xf32>
    %66 = arith.addf %63, %65 : vector<64x128xf32>
    %67 = arith.addf %11, %66 : vector<64x128xf32>
    %c0_26 = arith.constant 0 : index
    %c1024_27 = arith.constant 1024 : index
    %68 = vector.load %arg4[%c0_26, %c1024_27] : memref<1x2688xf32, #tpu.memory_space<vmem>>, vector<1x128xf32>
    %c0_28 = arith.constant 0 : index
    %c1152 = arith.constant 1152 : index
    %69 = vector.load %arg4[%c0_28, %c1152] : memref<1x2688xf32, #tpu.memory_space<vmem>>, vector<1x128xf32>
    %cst_29 = arith.constant dense<0.000000e+00> : vector<64xf32>
    %70 = vector.multi_reduction <add>, %67, %cst_29 [1] : vector<64x128xf32> to vector<64xf32>
    %71 = vector.shape_cast %70 : vector<64xf32> to vector<64x1xf32>
    %cst_30 = arith.constant 1.250000e-02 : f32
    %72 = vector.broadcast %cst_30 : f32 to vector<64x1xf32>
    %73 = arith.mulf %71, %72 : vector<64x1xf32>
    %74 = vector.broadcast %73 : vector<64x1xf32> to vector<64x128xf32>
    %75 = arith.subf %67, %74 : vector<64x128xf32>
    %76 = vector.broadcast %4 : vector<1x128xf32> to vector<64x128xf32>
    %77 = arith.mulf %75, %76 : vector<64x128xf32>
    %78 = arith.mulf %77, %77 : vector<64x128xf32>
    %cst_31 = arith.constant dense<0.000000e+00> : vector<64xf32>
    %79 = vector.multi_reduction <add>, %78, %cst_31 [1] : vector<64x128xf32> to vector<64xf32>
    %80 = vector.shape_cast %79 : vector<64xf32> to vector<64x1xf32>
    %cst_32 = arith.constant 1.250000e-02 : f32
    %81 = vector.broadcast %cst_32 : f32 to vector<64x1xf32>
    %82 = arith.mulf %80, %81 : vector<64x1xf32>
    %cst_33 = arith.constant 9.99999974E-6 : f32
    %83 = vector.broadcast %cst_33 : f32 to vector<64x1xf32>
    %84 = arith.addf %82, %83 : vector<64x1xf32>
    %85 = math.rsqrt %84 : vector<64x1xf32>
    %86 = vector.broadcast %85 : vector<64x1xf32> to vector<64x128xf32>
    %87 = arith.mulf %77, %86 : vector<64x128xf32>
    %88 = vector.broadcast %68 : vector<1x128xf32> to vector<64x128xf32>
    %89 = arith.mulf %87, %88 : vector<64x128xf32>
    %90 = vector.broadcast %69 : vector<1x128xf32> to vector<64x128xf32>
    %91 = arith.addf %89, %90 : vector<64x128xf32>
    %c0_34 = arith.constant 0 : index
    %c1152_35 = arith.constant 1152 : index
    %92 = vector.load %arg2[%c0_34, %c1152_35] : memref<128x2176xf32, #tpu.memory_space<vmem>>, vector<128x256xf32>
    %cst_36 = arith.constant dense<0.000000e+00> : vector<64x256xf32>
    %93 = tpu.matmul %91, %92, %cst_36 {dimension_numbers = #tpu.dot_dimension_numbers<[1], [0], [0], [1], [0, 0, 1, 1], [], []>} : vector<64x128xf32>, vector<128x256xf32>, vector<64x256xf32> -> vector<64x256xf32>
    %c0_37 = arith.constant 0 : index
    %c1280 = arith.constant 1280 : index
    %94 = vector.load %arg4[%c0_37, %c1280] : memref<1x2688xf32, #tpu.memory_space<vmem>>, vector<1x256xf32>
    %95 = vector.broadcast %94 : vector<1x256xf32> to vector<64x256xf32>
    %96 = arith.addf %93, %95 : vector<64x256xf32>
    %cst_38 = arith.constant 0.000000e+00 : f32
    %97 = vector.broadcast %cst_38 : f32 to vector<64x256xf32>
    %98 = arith.maximumf %96, %97 : vector<64x256xf32>
    %c0_39 = arith.constant 0 : index
    %c0_40 = arith.constant 0 : index
    %99 = vector.load %arg3[%c0_39, %c0_40] : memref<256x128xf32, #tpu.memory_space<vmem>>, vector<256x128xf32>
    %cst_41 = arith.constant dense<0.000000e+00> : vector<64x128xf32>
    %100 = tpu.matmul %98, %99, %cst_41 {dimension_numbers = #tpu.dot_dimension_numbers<[1], [0], [0], [1], [0, 0, 1, 1], [], []>} : vector<64x256xf32>, vector<256x128xf32>, vector<64x128xf32> -> vector<64x128xf32>
    %c0_42 = arith.constant 0 : index
    %c1536 = arith.constant 1536 : index
    %101 = vector.load %arg4[%c0_42, %c1536] : memref<1x2688xf32, #tpu.memory_space<vmem>>, vector<1x128xf32>
    %102 = vector.broadcast %101 : vector<1x128xf32> to vector<64x128xf32>
    %103 = arith.addf %100, %102 : vector<64x128xf32>
    %104 = arith.addf %91, %103 : vector<64x128xf32>
    %c0_43 = arith.constant 0 : index
    %c1664 = arith.constant 1664 : index
    %105 = vector.load %arg4[%c0_43, %c1664] : memref<1x2688xf32, #tpu.memory_space<vmem>>, vector<1x128xf32>
    %c0_44 = arith.constant 0 : index
    %c1792 = arith.constant 1792 : index
    %106 = vector.load %arg4[%c0_44, %c1792] : memref<1x2688xf32, #tpu.memory_space<vmem>>, vector<1x128xf32>
    %cst_45 = arith.constant dense<0.000000e+00> : vector<64xf32>
    %107 = vector.multi_reduction <add>, %104, %cst_45 [1] : vector<64x128xf32> to vector<64xf32>
    %108 = vector.shape_cast %107 : vector<64xf32> to vector<64x1xf32>
    %cst_46 = arith.constant 1.250000e-02 : f32
    %109 = vector.broadcast %cst_46 : f32 to vector<64x1xf32>
    %110 = arith.mulf %108, %109 : vector<64x1xf32>
    %111 = vector.broadcast %110 : vector<64x1xf32> to vector<64x128xf32>
    %112 = arith.subf %104, %111 : vector<64x128xf32>
    %113 = vector.broadcast %4 : vector<1x128xf32> to vector<64x128xf32>
    %114 = arith.mulf %112, %113 : vector<64x128xf32>
    %115 = arith.mulf %114, %114 : vector<64x128xf32>
    %cst_47 = arith.constant dense<0.000000e+00> : vector<64xf32>
    %116 = vector.multi_reduction <add>, %115, %cst_47 [1] : vector<64x128xf32> to vector<64xf32>
    %117 = vector.shape_cast %116 : vector<64xf32> to vector<64x1xf32>
    %cst_48 = arith.constant 1.250000e-02 : f32
    %118 = vector.broadcast %cst_48 : f32 to vector<64x1xf32>
    %119 = arith.mulf %117, %118 : vector<64x1xf32>
    %cst_49 = arith.constant 9.99999974E-6 : f32
    %120 = vector.broadcast %cst_49 : f32 to vector<64x1xf32>
    %121 = arith.addf %119, %120 : vector<64x1xf32>
    %122 = math.rsqrt %121 : vector<64x1xf32>
    %123 = vector.broadcast %122 : vector<64x1xf32> to vector<64x128xf32>
    %124 = arith.mulf %114, %123 : vector<64x128xf32>
    %125 = vector.broadcast %105 : vector<1x128xf32> to vector<64x128xf32>
    %126 = arith.mulf %124, %125 : vector<64x128xf32>
    %127 = vector.broadcast %106 : vector<1x128xf32> to vector<64x128xf32>
    %128 = arith.addf %126, %127 : vector<64x128xf32>
    %129 = vector.shape_cast %128 : vector<64x128xf32> to vector<8x8x128xf32>
    %cst_50 = arith.constant dense<0.000000e+00> : vector<8x128xf32>
    %130 = vector.multi_reduction <add>, %129, %cst_50 [1] : vector<8x8x128xf32> to vector<8x128xf32>
    %cst_51 = arith.constant 8.000000e+00 : f32
    %131 = vector.broadcast %cst_51 : f32 to vector<8x128xf32>
    %132 = arith.divf %130, %131 : vector<8x128xf32>
    %c0_52 = arith.constant 0 : index
    %c1408 = arith.constant 1408 : index
    %133 = vector.load %arg2[%c0_52, %c1408] : memref<128x2176xf32, #tpu.memory_space<vmem>>, vector<128x128xf32>
    %cst_53 = arith.constant dense<0.000000e+00> : vector<8x128xf32>
    %134 = tpu.matmul %132, %133, %cst_53 {dimension_numbers = #tpu.dot_dimension_numbers<[1], [0], [0], [1], [0, 0, 1, 1], [], []>} : vector<8x128xf32>, vector<128x128xf32>, vector<8x128xf32> -> vector<8x128xf32>
    %c0_54 = arith.constant 0 : index
    %c1920 = arith.constant 1920 : index
    %135 = vector.load %arg4[%c0_54, %c1920] : memref<1x2688xf32, #tpu.memory_space<vmem>>, vector<1x128xf32>
    %136 = vector.broadcast %135 : vector<1x128xf32> to vector<8x128xf32>
    %137 = arith.addf %134, %136 : vector<8x128xf32>
    %cst_55 = arith.constant 0.000000e+00 : f32
    %138 = vector.broadcast %cst_55 : f32 to vector<8x128xf32>
    %139 = arith.maximumf %137, %138 : vector<8x128xf32>
    %c0_56 = arith.constant 0 : index
    %c1536_57 = arith.constant 1536 : index
    %140 = vector.load %arg2[%c0_56, %c1536_57] : memref<128x2176xf32, #tpu.memory_space<vmem>>, vector<128x640xf32>
    %cst_58 = arith.constant dense<0.000000e+00> : vector<8x640xf32>
    %141 = tpu.matmul %139, %140, %cst_58 {dimension_numbers = #tpu.dot_dimension_numbers<[1], [0], [0], [1], [0, 0, 1, 1], [], []>} : vector<8x128xf32>, vector<128x640xf32>, vector<8x640xf32> -> vector<8x640xf32>
    %c0_59 = arith.constant 0 : index
    %c2048 = arith.constant 2048 : index
    %142 = vector.load %arg4[%c0_59, %c2048] : memref<1x2688xf32, #tpu.memory_space<vmem>>, vector<1x640xf32>
    %143 = vector.broadcast %142 : vector<1x640xf32> to vector<8x640xf32>
    %144 = arith.addf %141, %143 : vector<8x640xf32>
    %c0_60 = arith.constant 0 : index
    %c0_61 = arith.constant 0 : index
    %145 = vector.load %arg5[%c0_60, %c0_61] : memref<8x640xf32, #tpu.memory_space<vmem>>, vector<8x640xf32>
    tpu.vector_store %arg5[%c0_60, %c0_61], %144 {strides = array<i32>} : memref<8x640xf32, #tpu.memory_space<vmem>>, vector<8x640xf32>,
    return
  }
  func.func @transform_0(%arg0: i32) -> (i32, i32, i32) {
    %c0_i32 = arith.constant 0 : i32
    %c0_i32_0 = arith.constant 0 : i32
    %c0_i32_1 = arith.constant 0 : i32
    return %arg0, %c0_i32, %c0_i32_0 : i32, i32, i32
  }
  func.func @transform_1(%arg0: i32) -> (i32, i32) {
    %c0_i32 = arith.constant 0 : i32
    %c0_i32_0 = arith.constant 0 : i32
    %c0_i32_1 = arith.constant 0 : i32
    return %c0_i32, %c0_i32_0 : i32, i32
  }
  func.func @transform_2(%arg0: i32) -> (i32, i32) {
    %c0_i32 = arith.constant 0 : i32
    %c0_i32_0 = arith.constant 0 : i32
    %c0_i32_1 = arith.constant 0 : i32
    return %c0_i32, %c0_i32_0 : i32, i32
  }
  func.func @transform_3(%arg0: i32) -> (i32, i32) {
    %c0_i32 = arith.constant 0 : i32
    %c0_i32_0 = arith.constant 0 : i32
    %c0_i32_1 = arith.constant 0 : i32
    return %c0_i32, %c0_i32_0 : i32, i32
  }
  func.func @transform_4(%arg0: i32) -> (i32, i32) {
    %c0_i32 = arith.constant 0 : i32
    %c0_i32_0 = arith.constant 0 : i32
    return %arg0, %c0_i32 : i32, i32
  }
}

</mosaic_0001>

<bundles_post_ra>
// kernel: classifier_forward.1
= control target key start
LH: loop header
LB: loop body
LE: loop exit
PB: predicated region body
PF: predicated region fallthrough
CT: control target
= control target key end

     0   :  { %9 = vsyncpa [#allocation3], 0  ;;  %s5954_s0 = inlined_call_operand.vmem [shape: f32[8,8,128], index: 0, kind: input, shape index: {}]   ;;  %s5955_s1 = inlined_call_operand.hbm [shape: f32[128,2176], index: 1, kind: input, shape index: {}]   ;;  %s5956_s2 = inlined_call_operand.hbm [shape: f32[256,128], index: 2, kind: input, shape index: {}]   ;;  %s5957_s3 = inlined_call_operand.hbm [shape: f32[1,2688], index: 3, kind: input, shape index: {}]   ;;  %s5958_s4 = inlined_call_operand.vmem [shape: f32[8,640], index: 4, kind: output, shape index: {}]  }
   0x1   :  { %10 = vsyncpa [#allocation5], 0  ;;  %s5273_s15 = smov [#allocation4]  }
   0x2   :  { %s30_s16 = sshll.u32 %s5273_s15, 4  ;;  %s31_s16 = int_to_ptr.vmem [resolvable:$true] %s30_s16 }
   0x3   :  { %s5217_s17 = scalar_lea.vmem %s31_s16, 4096  ;;  %p5222_p1 = scmp.lt.s32.totalorder %s31_s16, %s31_s16 }
   0x4   :  { %p5218_p0 = scmp.ne.s32.totalorder %s31_s16, %s5217_s17  ;;  %p5223_p2 = scmp.lt.s32.totalorder %s5217_s17, %s5217_s17 }
   0x6   :  { %p5224_p3 = por %p5223_p2, %p5222_p1 }
   0x8   :  { %p5225_p4 = pnand %p5224_p3, %p5218_p0 }
   0xa   :  { %5228 = shalt.err (!%p5225_p4)
}
   0xb   :  { %s5274_s18 = smov 128   ;;  %s5275_s19 = smov 8  }
   0xc   :  { %36 = dma.hbm_to_vmem [thread:$0]  %s5956_s2, 4096, %s31_s16, [#allocation5], %s5274_s18, %s5274_s18, %s5275_s19  }
   0xd   :  { %s5276_s22 = smov [#allocation2]  }
   0xe   :  { %s18_s23 = sshll.u32 %s5276_s22, 4  ;;  %s19_s23 = int_to_ptr.vmem [resolvable:$true] %s18_s23 }
   0xf   :  { %s5237_s24 = scalar_lea.vmem %s19_s23, 34816  ;;  %p5242_p6 = scmp.lt.s32.totalorder %s19_s23, %s19_s23 }
  0x10   :  { %p5238_p5 = scmp.ne.s32.totalorder %s19_s23, %s5237_s24  ;;  %p5243_p7 = scmp.lt.s32.totalorder %s5237_s24, %s5237_s24 }
  0x12   :  { %p5244_p8 = por %p5243_p7, %p5242_p6 }
  0x14   :  { %p5245_p9 = pnand %p5244_p8, %p5238_p5 }
  0x16   :  { %5248 = shalt.err (!%p5245_p9)
}
  0x17   :  { %s5277_s25 = smov 2176   ;;  %s5278_s26 = smov 136  }
  0x18   :  { %24 = dma.hbm_to_vmem [thread:$0]  %s5955_s1, 34816, %s19_s23, [#allocation3], %s5277_s25, %s5277_s25, %s5278_s26  }
  0x19   :  { %s5279_s29 = smov [#allocation6]  }
  0x1a   :  { %s43_s30 = sshll.u32 %s5279_s29, 4  ;;  %s44_s30 = int_to_ptr.vmem [resolvable:$true] %s43_s30 }
  0x1b   :  { %s5257_s2 = scalar_lea.vmem %s44_s30, 336  ;;  %s5261_s5 = scalar_lea.vmem %s44_s30, 352 }
  0x1c   :  { %p5258_p10 = scmp.ne.s32.totalorder %s44_s30, %s5257_s2  ;;  %p5262_p11 = scmp.lt.s32.totalorder %s44_s30, %s44_s30 }
  0x1d   :  { %p5263_p12 = scmp.lt.s32.totalorder %s5261_s5, %s5257_s2 }
  0x1f   :  { %p5264_p13 = por %p5263_p12, %p5262_p11 }
  0x21   :  { %p5265_p0 = pnand %p5264_p13, %p5258_p10 }
  0x23   :  { %5268 = shalt.err (!%p5265_p0)
}
  0x24   :  { %46 = dma.hbm_to_vmem [thread:$0]  %s5957_s3, 336, %s44_s30, [#allocation5]  }
  0x25   :  { %5269 = dma.done.wait [#allocation3], 34816  }
  0x26   :  { %5270 = vsyncadd [#allocation3], 4294932480 }
  0x27   :  { %5271 = dma.done.wait [#allocation5], 4432  }
  0x28   :  { %5272 = vsyncadd [#allocation5], 4294962864  ;;  %v84_v0 = vld [vmem:[#allocation2 + $0x7f8] sm:$0xff]  ;;  %v83_v1 = vld [vmem:[#allocation2 + $0x770] sm:$0xff]  ;;  %vm5281_vm0 = vmmov 0   ;;  %vm1232_vm1 = vcmask 64512  }
  0x29   :  { %4742 = vmatprep.subr.mxu0 %v84_v0  ;;  %v82_v2 = vld [vmem:[#allocation2 + $0x6e8] sm:$0xff]  ;;  %v81_v3 = vld [vmem:[#allocation2 + $0x660] sm:$0xff]  ;;  %v80_v5 = vld [vmem:[#allocation2 + $0x5d8] sm:$0xff]  ;;  %vm4075_vm3 = vcmask 1041409   ;;  %vm4077_vm4 = vcmask 1042434   ;;  %vm4079_vm5 = vcmask 1043459  }
  0x2a   :  { %4743 = vmatpush3.msra.mxu0 %v84_v0  ;;  %v61_v4 = vld [vmem:[%s5954_s0] sm:$0xff]  ;;  %v79_v6 = vld [vmem:[#allocation2 + $0x550] sm:$0xff]  ;;  %v288_v7 = vld [vmem:[#allocation2 + $0x808] sm:$0xff]  ;;  %vm4081_vm6 = vcmask 1044484   ;;  %vm4083_vm7 = vcmask 1045509   ;;  %vm4085_vm8 = vcmask 1046534  }
  0x2b   :  { %4744 = vmatprep.subr.mxu0 %v83_v1  ;;  %4774 = vmatprep.mubr.f32.mxu0 %v61_v4  ;;  %v287_v8 = vld [vmem:[#allocation2 + $0x800] sm:$0xff]  ;;  %v78_v10 = vld [vmem:[#allocation2 + $0x4c8] sm:$0xff]  ;;  %v281_v11 = vld [vmem:[#allocation2 + $0x778] sm:$0xff]  ;;  %vm4087_vm9 = vcmask 1047559  }
  0x2c   :  { %4745 = vmatpush3.msra.mxu0 %v83_v1  ;;  %325 = vmatprep.subr.mxu1 %v288_v7  ;;  %v282_v9 = vld [vmem:[#allocation2 + $0x780] sm:$0xff]  ;;  %v276_v12 = vld [vmem:[#allocation2 + $0x6f8] sm:$0xff]  ;;  %v275_v13 = vld [vmem:[#allocation2 + $0x6f0] sm:$0xff] }
  0x2d   :  { %4746 = vmatprep.subr.mxu0 %v82_v2  ;;  %326 = vmatpush1.msra.mxu1 %v287_v8  ;;  %v77_v14 = vld [vmem:[#allocation2 + $0x440] sm:$0xff]  ;;  %v270_v15 = vld [vmem:[#allocation2 + $0x670] sm:$0xff]  ;;  %v269_v16 = vld [vmem:[#allocation2 + $0x668] sm:$0xff] }
  0x2e   :  { %4747 = vmatpush3.msra.mxu0 %v82_v2  ;;  %327 = vmatprep.subr.mxu1 %v282_v9  ;;  %v76_v17 = vld [vmem:[#allocation2 + $0x3b8] sm:$0xff]  ;;  %v264_v18 = vld [vmem:[#allocation2 + $0x5e8] sm:$0xff]  ;;  %v263_v19 = vld [vmem:[#allocation2 + $0x5e0] sm:$0xff] }
  0x2f   :  { %4748 = vmatprep.subr.mxu0 %v81_v3  ;;  %328 = vmatpush1.msra.mxu1 %v281_v11  ;;  %v75_v20 = vld [vmem:[#allocation2 + $0x330] sm:$0xff]  ;;  %v258_v21 = vld [vmem:[#allocation2 + $0x560] sm:$0xff]  ;;  %v257_v22 = vld [vmem:[#allocation2 + $0x558] sm:$0xff] }
  0x30   :  { %4749 = vmatpush3.msra.mxu0 %v81_v3  ;;  %329 = vmatprep.subr.mxu1 %v276_v12  ;;  %v74_v23 = vld [vmem:[#allocation2 + $0x2a8] sm:$0xff]  ;;  %v252_v24 = vld [vmem:[#allocation2 + $0x4d8] sm:$0xff]  ;;  %v251_v25 = vld [vmem:[#allocation2 + $0x4d0] sm:$0xff] }
  0x31   :  { %4750 = vmatprep.subr.mxu0 %v80_v5  ;;  %330 = vmatpush1.msra.mxu1 %v275_v13  ;;  %v73_v26 = vld [vmem:[#allocation2 + $0x220] sm:$0xff]  ;;  %v246_v27 = vld [vmem:[#allocation2 + $0x450] sm:$0xff]  ;;  %v245_v28 = vld [vmem:[#allocation2 + $0x448] sm:$0xff] }
  0x32   :  { %4751 = vmatpush3.msra.mxu0 %v80_v5  ;;  %331 = vmatprep.subr.mxu1 %v270_v15  ;;  %v72_v29 = vld [vmem:[#allocation2 + $0x198] sm:$0xff]  ;;  %v240_v30 = vld [vmem:[#allocation2 + $0x3c8] sm:$0xff]  ;;  %v239_v31 = vld [vmem:[#allocation2 + $0x3c0] sm:$0xff] }
  0x33   :  { %4752 = vmatprep.subr.mxu0 %v79_v6  ;;  %332 = vmatpush1.msra.mxu1 %v269_v16  ;;  %v71_v32 = vld [vmem:[#allocation2 + $0x110] sm:$0xff]  ;;  %v234_v33 = vld [vmem:[#allocation2 + $0x340] sm:$0xff]  ;;  %v233_v34 = vld [vmem:[#allocation2 + $0x338] sm:$0xff] }
  0x34   :  { %4753 = vmatpush3.msra.mxu0 %v79_v6  ;;  %333 = vmatprep.subr.mxu1 %v264_v18  ;;  %v70_v35 = vld [vmem:[#allocation2 + $0x88] sm:$0xff]  ;;  %v228_v36 = vld [vmem:[#allocation2 + $0x2b8] sm:$0xff]  ;;  %v227_v37 = vld [vmem:[#allocation2 + $0x2b0] sm:$0xff] }
  0x35   :  { %4754 = vmatprep.subr.mxu0 %v78_v10  ;;  %334 = vmatpush1.msra.mxu1 %v263_v19  ;;  %v69_v38 = vld [vmem:[#allocation2] sm:$0xff]  ;;  %v222_v39 = vld [vmem:[#allocation2 + $0x230] sm:$0xff]  ;;  %v221_v40 = vld [vmem:[#allocation2 + $0x228] sm:$0xff] }
  0x36   :  { %4755 = vmatpush3.msra.mxu0 %v78_v10  ;;  %335 = vmatprep.subr.mxu1 %v258_v21  ;;  %v62_v41 = vld [vmem:[%s5954_s0 + $0x8] sm:$0xff]  ;;  %v290_v42 = vld [vmem:[#allocation2 + $0x818] sm:$0xff]  ;;  %v63_v43 = vld [vmem:[%s5954_s0 + $0x10] sm:$0xff] }
  0x37   :  { %4756 = vmatprep.subr.mxu0 %v77_v14  ;;  %336 = vmatpush1.msra.mxu1 %v257_v22  ;;  %v289_v44 = vld [vmem:[#allocation2 + $0x810] sm:$0xff]  ;;  %v216_v46 = vld [vmem:[#allocation2 + $0x1a8] sm:$0xff]  ;;  %v215_v48 = vld [vmem:[#allocation2 + $0x1a0] sm:$0xff] }
  0x38   :  { %4757 = vmatpush3.msra.mxu0 %v77_v14  ;;  %337 = vmatprep.subr.mxu1 %v252_v24  ;;  %v284_v45 = vld [vmem:[#allocation2 + $0x790] sm:$0xff]  ;;  %v283_v47 = vld [vmem:[#allocation2 + $0x788] sm:$0xff]  ;;  %v64_v49 = vld [vmem:[%s5954_s0 + $0x18] sm:$0xff]  ;;  %v5962_v24 = vmov 0.0  }
  0x39   :  { %4758 = vmatprep.subr.mxu0 %v76_v17  ;;  %338 = vmatpush1.msra.mxu1 %v251_v25  ;;  %v278_v50 = vld [vmem:[#allocation2 + $0x708] sm:$0xff]  ;;  %v65_v51 = vld [vmem:[%s5954_s0 + $0x20] sm:$0xff]  ;;  %v271_v55 = vld [vmem:[#allocation2 + $0x678] sm:$0xff] }
  0x3a   :  { %4759 = vmatpush3.msra.mxu0 %v76_v17  ;;  %339 = vmatprep.subr.mxu1 %v246_v27  ;;  %v277_v52 = vld [vmem:[#allocation2 + $0x700] sm:$0xff]  ;;  %v66_v56 = vld [vmem:[%s5954_s0 + $0x28] sm:$0xff]  ;;  %v266_v57 = vld [vmem:[#allocation2 + $0x5f8] sm:$0xff] }
  0x3b   :  { %4760 = vmatprep.subr.mxu0 %v75_v20  ;;  %340 = vmatpush1.msra.mxu1 %v245_v28  ;;  %v272_v53 = vld [vmem:[#allocation2 + $0x680] sm:$0xff]  ;;  %v67_v58 = vld [vmem:[%s5954_s0 + $0x30] sm:$0xff]  ;;  %v259_v61 = vld [vmem:[#allocation2 + $0x568] sm:$0xff] }
  0x3c   :  { %4761 = vmatpush3.msra.mxu0 %v75_v20  ;;  %341 = vmatprep.subr.mxu1 %v240_v30  ;;  %v210_v54 = vld [vmem:[#allocation2 + $0x120] sm:$0xff]  ;;  %v265_v59 = vld [vmem:[#allocation2 + $0x5f0] sm:$0xff]  ;;  %v68_v62 = vld [vmem:[%s5954_s0 + $0x38] sm:$0xff] }
  0x3d   :  { %4762 = vmatprep.subr.mxu0 %v74_v23  ;;  %342 = vmatpush1.msra.mxu1 %v239_v31  ;;  %v260_v60 = vld [vmem:[#allocation2 + $0x570] sm:$0xff]  ;;  %v254_v63 = vld [vmem:[#allocation2 + $0x4e8] sm:$0xff]  ;;  %v253_v0 = vld [vmem:[#allocation2 + $0x4e0] sm:$0xff] }
  0x3e   :  { %4763 = vmatpush3.msra.mxu0 %v74_v23  ;;  %343 = vmatprep.subr.mxu1 %v234_v33  ;;  %v248_v1 = vld [vmem:[#allocation2 + $0x460] sm:$0xff]  ;;  %v247_v2 = vld [vmem:[#allocation2 + $0x458] sm:$0xff]  ;;  %v241_v4 = vld [vmem:[#allocation2 + $0x3d0] sm:$0xff] }
  0x3f   :  { %4764 = vmatprep.subr.mxu0 %v73_v26  ;;  %344 = vmatpush1.msra.mxu1 %v233_v34  ;;  %v242_v3 = vld [vmem:[#allocation2 + $0x3d8] sm:$0xff]  ;;  %v236_v5 = vld [vmem:[#allocation2 + $0x350] sm:$0xff]  ;;  %v235_v6 = vld [vmem:[#allocation2 + $0x348] sm:$0xff] }
  0x40   :  { %4765 = vmatpush3.msra.mxu0 %v73_v26  ;;  %345 = vmatprep.subr.mxu1 %v228_v36  ;;  %v230_v7 = vld [vmem:[#allocation2 + $0x2c8] sm:$0xff]  ;;  %v229_v8 = vld [vmem:[#allocation2 + $0x2c0] sm:$0xff]  ;;  %v223_v10 = vld [vmem:[#allocation2 + $0x238] sm:$0xff] }
  0x41   :  { %4766 = vmatprep.subr.mxu0 %v72_v29  ;;  %346 = vmatpush1.msra.mxu1 %v227_v37  ;;  %v224_v9 = vld [vmem:[#allocation2 + $0x240] sm:$0xff]  ;;  %v218_v11 = vld [vmem:[#allocation2 + $0x1b8] sm:$0xff]  ;;  %v217_v12 = vld [vmem:[#allocation2 + $0x1b0] sm:$0xff] }
  0x42   :  { %4767 = vmatpush3.msra.mxu0 %v72_v29  ;;  %347 = vmatprep.subr.mxu1 %v222_v39  ;;  %v212_v13 = vld [vmem:[#allocation2 + $0x130] sm:$0xff]  ;;  %v209_v14 = vld [vmem:[#allocation2 + $0x118] sm:$0xff]  ;;  %v211_v15 = vld [vmem:[#allocation2 + $0x128] sm:$0xff] }
  0x43   :  { %4768 = vmatprep.subr.mxu0 %v71_v32  ;;  %348 = vmatpush1.msra.mxu1 %v221_v40  ;;  %v204_v16 = vld [vmem:[#allocation2 + $0x98] sm:$0xff]  ;;  %v206_v17 = vld [vmem:[#allocation2 + $0xa8] sm:$0xff]  ;;  %v203_v18 = vld [vmem:[#allocation2 + $0x90] sm:$0xff] }
  0x44   :  { %4769 = vmatpush3.msra.mxu0 %v71_v32  ;;  %349 = vmatprep.subr.mxu1 %v216_v46  ;;  %v205_v19 = vld [vmem:[#allocation2 + $0xa0] sm:$0xff]  ;;  %v198_v20 = vld [vmem:[#allocation2 + $0x10] sm:$0xff]  ;;  %v197_v22 = vld [vmem:[#allocation2 + $0x8] sm:$0xff] }
  0x45   :  { %4770 = vmatprep.subr.mxu0 %v70_v35  ;;  %350 = vmatpush1.msra.mxu1 %v215_v48  ;;  %v200_v21 = vld [vmem:[#allocation2 + $0x20] sm:$0xff]  ;;  %v199_v23 = vld [vmem:[#allocation2 + $0x18] sm:$0xff]  ;;  %v292_v25 = vld [vmem:[#allocation2 + $0x828] sm:$0xff] }
  0x46   :  { %4771 = vmatpush3.msra.mxu0 %v70_v35  ;;  %351 = vmatprep.subr.mxu1 %v210_v54  ;;  %v5343_v27 = vld [vmem:[#allocation6] ss:$0 sm:$0xff]  ;;  %v285_v33 = vld [vmem:[#allocation2 + $0x798] sm:$0xff]  ;;  %v279_v37 = vld [vmem:[#allocation2 + $0x710] sm:$0xff] }
  0x47   :  { %4772 = vmatprep.subr.mxu0 %v69_v38  ;;  %352 = vmatpush1.msra.mxu1 %v209_v14  ;;  %v291_v30 = vld [vmem:[#allocation2 + $0x820] sm:$0xff]  ;;  %v280_v35 = vld [vmem:[#allocation2 + $0x718] sm:$0xff]  ;;  %v273_v39 = vld [vmem:[#allocation2 + $0x688] sm:$0xff] }
  0x48   :  { %4773 = vmatpush3.msra.mxu0 %v69_v38  ;;  %353 = vmatprep.subr.mxu1 %v204_v16  ;;  %v286_v31 = vld [vmem:[#allocation2 + $0x7a0] sm:$0xff]  ;;  %v274_v38 = vld [vmem:[#allocation2 + $0x690] sm:$0xff] }
  0x49   :  { %4775 = vmatmul.mubr.f32.vlgmr.msra.gmra.mxu0 %v62_v41  ;;  %438 = vmatprep.subr.mxu0 %v290_v42  ;;  %v268_v41 = vld [vmem:[#allocation2 + $0x608] sm:$0xff]  ;;  %v267_v42 = vld [vmem:[#allocation2 + $0x600] sm:$0xff] }
  0x4a   :  { %4777 = vmatprep.mubr.f32.mxu0 %v63_v43  ;;  %439 = vmatpush1.msra.mxu0 %v289_v44  ;;  %v262_v44 = vld [vmem:[#allocation2 + $0x580] sm:$0xff] }
  0x4b   :  { %440 = vmatprep.subr.mxu0 %v284_v45  ;;  %354 = vmatpush1.msra.mxu1 %v203_v18  ;;  %v261_v45 = vld [vmem:[#allocation2 + $0x578] sm:$0xff]  ;;  %v243_v54 = vld [vmem:[#allocation2 + $0x3e0] sm:$0xff] }
  0x4c   :  { %441 = vmatpush1.msra.mxu0 %v283_v47  ;;  %355 = vmatprep.subr.mxu1 %v198_v20  ;;  %v256_v47 = vld [vmem:[#allocation2 + $0x4f8] sm:$0xff]  ;;  %v5427_v14 = vld [vmem:[#allocation6 + $0x1] sm:$0x3f] }
  0x4d   :  { %4778 = vmatmul.mubr.f32.gmra.mxu0 %v64_v49  ;;  %442 = vmatprep.subr.mxu0 %v278_v50  ;;  %v255_v49 = vld [vmem:[#allocation2 + $0x4f0] sm:$0xff] }
  0x4e   :  { %4780 = vmatprep.mubr.f32.mxu0 %v65_v51  ;;  %443 = vmatpush1.msra.mxu0 %v277_v52  ;;  %v250_v50 = vld [vmem:[#allocation2 + $0x470] sm:$0xff]  ;;  %v249_v51 = vld [vmem:[#allocation2 + $0x468] sm:$0xff] }
  0x4f   :  { %444 = vmatprep.subr.mxu0 %v272_v53  ;;  %356 = vmatpush1.msra.mxu1 %v197_v22  ;;  %v244_v53 = vld [vmem:[#allocation2 + $0x3e8] sm:$0xff] }
  0x50   :  { %445 = vmatpush1.msra.mxu0 %v271_v55  ;;  %389 = vmatprep.mubr.f32.mxu1 %v5962_v24 }
  0x51   :  { %4781 = vmatmul.mubr.f32.gmra.mxu0 %v66_v56  ;;  %446 = vmatprep.subr.mxu0 %v266_v57  ;;  %v238_v56 = vld [vmem:[#allocation2 + $0x360] sm:$0xff]  ;;  %v237_v57 = vld [vmem:[#allocation2 + $0x358] sm:$0xff] }
  0x52   :  { %4783 = vmatprep.mubr.f32.mxu0 %v67_v58  ;;  %447 = vmatpush1.msra.mxu0 %v265_v59  ;;  %v232_v59 = vld [vmem:[#allocation2 + $0x2d8] sm:$0xff] }
  0x53   :  { %448 = vmatprep.subr.mxu0 %v260_v60  ;;  %551 = vmatprep.subr.mxu1 %v292_v25 }
  0x54   :  { %449 = vmatpush1.msra.mxu0 %v259_v61  ;;  %v231_v61 = vld [vmem:[#allocation2 + $0x2d0] sm:$0xff] }
  0x55   :  { %4784 = vmatmul.mubr.f32.gmra.mxu0 %v68_v62  ;;  %450 = vmatprep.subr.mxu0 %v254_v63  ;;  %v226_v62 = vld [vmem:[#allocation2 + $0x250] sm:$0xff]  ;;  %v225_v63 = vld [vmem:[#allocation2 + $0x248] sm:$0xff] }
  0x56   :  { %451 = vmatpush1.msra.mxu0 %v253_v0  ;;  %502 = vmatprep.mubr.f32.mxu0 %v5962_v24 }
  0x57   :  { %452 = vmatprep.subr.mxu0 %v248_v1  ;;  %v220_v1 = vld [vmem:[#allocation2 + $0x1c8] sm:$0xff] }
  0x58   :  { %453 = vmatpush1.msra.mxu0 %v247_v2  ;;  %v219_v2 = vld [vmem:[#allocation2 + $0x1c0] sm:$0xff] }
  0x59   :  { %454 = vmatprep.subr.mxu0 %v242_v3  ;;  %v214_v3 = vld [vmem:[#allocation2 + $0x140] sm:$0xff] }
  0x5a   :  { %455 = vmatpush1.msra.mxu0 %v241_v4  ;;  %v213_v4 = vld [vmem:[#allocation2 + $0x138] sm:$0xff] }
  0x5b   :  { %456 = vmatprep.subr.mxu0 %v236_v5 }
  0x5c   :  { %457 = vmatpush1.msra.mxu0 %v235_v6  ;;  %v208_v6 = vld [vmem:[#allocation2 + $0xb8] sm:$0xff] }
  0x5d   :  { %458 = vmatprep.subr.mxu0 %v230_v7  ;;  %v207_v7 = vld [vmem:[#allocation2 + $0xb0] sm:$0xff] }
  0x5e   :  { %459 = vmatpush1.msra.mxu0 %v229_v8  ;;  %v202_v8 = vld [vmem:[#allocation2 + $0x30] sm:$0xff] }
  0x5f   :  { %460 = vmatprep.subr.mxu0 %v224_v9  ;;  %v201_v9 = vld [vmem:[#allocation2 + $0x28] sm:$0xff] }
  0x60   :  { %461 = vmatpush1.msra.mxu0 %v223_v10  ;;  %v5961_v10 = vlaneseq }
  0x61   :  { %462 = vmatprep.subr.mxu0 %v218_v11 }
  0x62   :  { %463 = vmatpush1.msra.mxu0 %v217_v12  ;;  %v5421_v11 = vshrl.u32 %v5961_v10, 7 }
  0x63   :  { %464 = vmatprep.subr.mxu0 %v212_v13 }
  0x64   :  { %465 = vmatpush1.msra.mxu0 %v211_v15  ;;  %v5424_v12 = vsub.s32 0, %v5421_v11  ;;  %v5960_v13 = vsub.s32 2, %v5421_v11 }
  0x65   :  { %466 = vmatprep.subr.mxu0 %v206_v17 }
  0x66   :  { %467 = vmatpush1.msra.mxu0 %v205_v19  ;;  %5968 = vst [vmem:[#allocation10_spill] sm:$0xff] %v5424_v12  ;;  %v5431_v15 = vrot.slane %v5427_v14, %v5424_v12  ;;  %v5436_v16 = vrot.slane %v5427_v14, %v5960_v13 }
  0x67   :  { %468 = vmatprep.subr.mxu0 %v200_v21 }
  0x68   :  { %469 = vmatpush1.msra.mxu0 %v199_v23 }
  0x69   :  { %4786 = vmatprep.subr.mxu0 %v5962_v24 }
 0x109   :  { %v4776_v26 = vpop.f32.mrf.mxu0 }
 0x10a   :  { %v5352_v34 = vadd.f32 %v4776_v26, %v5343_v27 }
 0x10b   :  { %v158_v28 = vpop.f32.mrf.mxu0 }
 0x10c   :  { %v5346_v29 = vadd.f32 %v5343_v27, %v158_v28 }
 0x10d   :  { %v4779_v32 = vpop.f32.mrf.mxu0 }
 0x10e   :  { %390 = vmatmul.mubr.f32.vlgmr.msra.gmra.mxu1 %v5346_v29  ;;  %503 = vmatmul.mubr.f32.vlgmr.msra.gmra.mxu0 %v5346_v29  ;;  %v5365_v46 = vadd.f32 %v4779_v32, %v5343_v27 }
 0x10f   :  { %552 = vmatpush1.msra.mxu1 %v291_v30  ;;  %395 = vmatprep.mubr.f32.mxu1 %v5962_v24  ;;  %v168_v36 = vpop.f32.mrf.mxu0 }
 0x110   :  { %553 = vmatprep.subr.mxu1 %v286_v31  ;;  %508 = vmatprep.mubr.f32.mxu0 %v5962_v24  ;;  %v5359_v40 = vadd.f32 %v5343_v27, %v168_v36 }
 0x111   :  { %554 = vmatpush1.msra.mxu1 %v285_v33  ;;  %v4782_v43 = vpop.f32.mrf.mxu0 }
 0x112   :  { %396 = vmatmul.mubr.f32.gmra.mxu1 %v5352_v34  ;;  %509 = vmatmul.mubr.f32.gmra.mxu0 %v5352_v34  ;;  %v5379_v58 = vadd.f32 %v4782_v43, %v5343_v27 }
 0x113   :  { %555 = vmatprep.subr.mxu1 %v280_v35  ;;  %401 = vmatprep.mubr.f32.mxu1 %v5962_v24  ;;  %v178_v48 = vpop.f32.mrf.mxu0 }
 0x114   :  { %556 = vmatpush1.msra.mxu1 %v279_v37  ;;  %514 = vmatprep.mubr.f32.mxu0 %v5962_v24  ;;  %v5372_v52 = vadd.f32 %v5343_v27, %v178_v48 }
 0x115   :  { %557 = vmatprep.subr.mxu1 %v274_v38  ;;  %v4785_v55 = vpop.f32.mrf.mxu0 }
 0x116   :  { %558 = vmatpush1.msra.mxu1 %v273_v39  ;;  %515 = vmatmul.mubr.f32.gmra.mxu0 %v5359_v40  ;;  %v5393_v5 = vadd.f32 %v4785_v55, %v5343_v27 }
 0x117   :  { %402 = vmatmul.mubr.f32.gmra.mxu1 %v5359_v40  ;;  %559 = vmatprep.subr.mxu1 %v268_v41  ;;  %v188_v60 = vpop.f32.mrf.mxu0 }
 0x118   :  { %560 = vmatpush1.msra.mxu1 %v267_v42  ;;  %407 = vmatprep.mubr.f32.mxu1 %v5962_v24  ;;  %v5386_v0 = vadd.f32 %v5343_v27, %v188_v60 }
 0x119   :  { %561 = vmatprep.subr.mxu1 %v262_v44  ;;  %520 = vmatprep.mubr.f32.mxu0 %v5962_v24 }
 0x11a   :  { %562 = vmatpush1.msra.mxu1 %v261_v45  ;;  %521 = vmatmul.mubr.f32.gmra.mxu0 %v5365_v46  ;;  %5967 = vst [vmem:[#allocation9_spill] sm:$0xff] %v5386_v0 }
 0x11b   :  { %408 = vmatmul.mubr.f32.gmra.mxu1 %v5365_v46  ;;  %563 = vmatprep.subr.mxu1 %v256_v47 }
 0x11c   :  { %564 = vmatpush1.msra.mxu1 %v255_v49  ;;  %413 = vmatprep.mubr.f32.mxu1 %v5962_v24 }
 0x11d   :  { %565 = vmatprep.subr.mxu1 %v250_v50  ;;  %526 = vmatprep.mubr.f32.mxu0 %v5962_v24 }
 0x11e   :  { %566 = vmatpush1.msra.mxu1 %v249_v51  ;;  %527 = vmatmul.mubr.f32.gmra.mxu0 %v5372_v52 }
 0x11f   :  { %414 = vmatmul.mubr.f32.gmra.mxu1 %v5372_v52  ;;  %567 = vmatprep.subr.mxu1 %v244_v53 }
 0x120   :  { %568 = vmatpush1.msra.mxu1 %v243_v54  ;;  %419 = vmatprep.mubr.f32.mxu1 %v5962_v24 }
 0x121   :  { %569 = vmatprep.subr.mxu1 %v238_v56  ;;  %532 = vmatprep.mubr.f32.mxu0 %v5962_v24 }
 0x122   :  { %570 = vmatpush1.msra.mxu1 %v237_v57  ;;  %533 = vmatmul.mubr.f32.gmra.mxu0 %v5379_v58 }
 0x123   :  { %420 = vmatmul.mubr.f32.gmra.mxu1 %v5379_v58  ;;  %571 = vmatprep.subr.mxu1 %v232_v59 }
 0x124   :  { %572 = vmatpush1.msra.mxu1 %v231_v61  ;;  %425 = vmatprep.mubr.f32.mxu1 %v5962_v24 }
 0x125   :  { %573 = vmatprep.subr.mxu1 %v226_v62  ;;  %538 = vmatprep.mubr.f32.mxu0 %v5962_v24 }
 0x126   :  { %574 = vmatpush1.msra.mxu1 %v225_v63  ;;  %539 = vmatmul.mubr.f32.gmra.mxu0 %v5386_v0 }
 0x127   :  { %426 = vmatmul.mubr.f32.gmra.mxu1 %v5386_v0  ;;  %575 = vmatprep.subr.mxu1 %v220_v1 }
 0x128   :  { %576 = vmatpush1.msra.mxu1 %v219_v2  ;;  %431 = vmatprep.mubr.f32.mxu1 %v5962_v24 }
 0x129   :  { %577 = vmatprep.subr.mxu1 %v214_v3  ;;  %544 = vmatprep.mubr.f32.mxu0 %v5962_v24 }
 0x12a   :  { %578 = vmatpush1.msra.mxu1 %v213_v4  ;;  %545 = vmatmul.mubr.f32.gmra.mxu0 %v5393_v5 }
 0x12b   :  { %432 = vmatmul.mubr.f32.gmra.mxu1 %v5393_v5  ;;  %579 = vmatprep.subr.mxu1 %v208_v6 }
 0x12c   :  { %580 = vmatpush1.msra.mxu1 %v207_v7  ;;  %615 = vmatprep.mubr.f32.mxu1 %v5962_v24 }
 0x12d   :  { %581 = vmatprep.subr.mxu1 %v202_v8  ;;  %4788 = vmatprep.mubr.msk.f32.mxu0 %vm5281_vm0, %v5962_v24 }
 0x12e   :  { %582 = vmatpush1.msra.mxu1 %v201_v9  ;;  %v5959_v9 = vsub.s32 4, %v5421_v11 }
 0x12f   :  { %616 = vmatmul.mubr.f32.vlgmr.msra.gmra.mxu1 %v5346_v29  ;;  %4791 = vmatprep.subr.mxu1 %v5962_v24 }
 0x130   :  { %621 = vmatprep.mubr.f32.mxu1 %v5962_v24 }
 0x133   :  { %622 = vmatmul.mubr.f32.gmra.mxu1 %v5352_v34 }
 0x134   :  { %627 = vmatprep.mubr.f32.mxu1 %v5962_v24 }
 0x137   :  { %628 = vmatmul.mubr.f32.gmra.mxu1 %v5359_v40 }
 0x138   :  { %633 = vmatprep.mubr.f32.mxu1 %v5962_v24 }
 0x13b   :  { %634 = vmatmul.mubr.f32.gmra.mxu1 %v5365_v46 }
 0x13c   :  { %639 = vmatprep.mubr.f32.mxu1 %v5962_v24 }
 0x13f   :  { %640 = vmatmul.mubr.f32.gmra.mxu1 %v5372_v52 }
 0x140   :  { %645 = vmatprep.mubr.f32.mxu1 %v5962_v24 }
 0x143   :  { %646 = vmatmul.mubr.f32.gmra.mxu1 %v5379_v58 }
 0x144   :  { %651 = vmatprep.mubr.f32.mxu1 %v5962_v24 }
 0x147   :  { %652 = vmatmul.mubr.f32.gmra.mxu1 %v5386_v0 }
 0x148   :  { %657 = vmatprep.mubr.f32.mxu1 %v5962_v24 }
 0x14b   :  { %658 = vmatmul.mubr.f32.gmra.mxu1 %v5393_v5 }
 0x14c   :  { %4793 = vmatprep.mubr.msk.f32.mxu1 %vm5281_vm0, %v5962_v24 }
 0x1ce   :  { %v391_v17 = vpop.f32.mrf.mxu1  ;;  %v504_v18 = vpop.f32.mrf.mxu0 }
 0x1cf   :  { %v392_v19 = vadd.f32 %v391_v17, %v5431_v15  ;;  %v505_v20 = vadd.f32 %v504_v18, %v5436_v16 }
 0x1d0   :  { %v5440_v21 = vpop.f32.mrf.mxu1  ;;  %v5442_v22 = vpop.f32.mrf.mxu0 }
 0x1d1   :  { %v664_v23 = vmul.f32 0.15811388, %v392_v19  ;;  %4787 = vmatpush3.xpose.msra.mxu0 %v505_v20 }
 0x1d2   :  { %v397_v25 = vpop.f32.mrf.mxu1  ;;  %v510_v26 = vpop.f32.mrf.mxu0  ;;  %4796 = vmatprep.subr.mxu0 %v5962_v24 }
 0x1d3   :  { %v398_v27 = vadd.f32 %v397_v25, %v5431_v15  ;;  %v511_v28 = vadd.f32 %v510_v26, %v5436_v16  ;;  %v314_v26 = vrot.slane %v5427_v14, %v5959_v9 }
 0x1d4   :  { %v5447_v30 = vpop.f32.mrf.mxu1  ;;  %v5449_v31 = vpop.f32.mrf.mxu0  ;;  %4789 = vmatmul.mubr.f32.vlgmr.msra.gmra.mxu0 %v664_v23 }
 0x1d5   :  { %v665_v32 = vmul.f32 0.15811388, %v398_v27  ;;  %4792 = vmatpush3.xpose.msra.mxu1 %v511_v28  ;;  %4798 = vmatprep.mubr.msk.f32.mxu0 %vm5281_vm0, %v5962_v24 }
 0x1d6   :  { %v516_v33 = vpop.f32.mrf.mxu0  ;;  %4801 = vmatprep.subr.mxu1 %v5962_v24 }
 0x1d7   :  { %v403_v35 = vpop.f32.mrf.mxu1  ;;  %v517_v36 = vadd.f32 %v516_v33, %v5436_v16 }
 0x1d8   :  { %v404_v37 = vadd.f32 %v403_v35, %v5431_v15  ;;  %v5456_v38 = vpop.f32.mrf.mxu0  ;;  %4794 = vmatmul.mubr.f32.vlgmr.msra.gmra.mxu1 %v665_v32  ;;  %v317_v35 = vsub.s32 5, %v5421_v11 }
 0x1d9   :  { %v5458_v39 = vpop.f32.mrf.mxu1  ;;  %4797 = vmatpush3.xpose.msra.mxu0 %v517_v36  ;;  %4803 = vmatprep.mubr.msk.f32.mxu1 %vm5281_vm0, %v5962_v24 }
 0x1da   :  { %v666_v41 = vmul.f32 0.15811388, %v404_v37  ;;  %v522_v42 = vpop.f32.mrf.mxu0  ;;  %4806 = vmatprep.subr.mxu0 %v5962_v24 }
 0x1db   :  { %v409_v43 = vpop.f32.mrf.mxu1  ;;  %v523_v44 = vadd.f32 %v522_v42, %v5436_v16  ;;  %v5520_v42 = vrot.slane %v5427_v14, %v317_v35 }
 0x1dc   :  { %v410_v45 = vadd.f32 %v409_v43, %v5431_v15  ;;  %v5465_v47 = vpop.f32.mrf.mxu0  ;;  %4799 = vmatmul.mubr.f32.vlgmr.msra.gmra.mxu0 %v666_v41 }
 0x1dd   :  { %v5467_v48 = vpop.f32.mrf.mxu1  ;;  %4802 = vmatpush3.xpose.msra.mxu1 %v523_v44  ;;  %4808 = vmatprep.mubr.msk.f32.mxu0 %vm5281_vm0, %v5962_v24 }
 0x1de   :  { %v667_v49 = vmul.f32 0.15811388, %v410_v45  ;;  %v528_v50 = vpop.f32.mrf.mxu0  ;;  %4811 = vmatprep.subr.mxu1 %v5962_v24 }
 0x1df   :  { %v415_v51 = vpop.f32.mrf.mxu1  ;;  %v529_v53 = vadd.f32 %v528_v50, %v5436_v16 }
 0x1e0   :  { %v416_v54 = vadd.f32 %v415_v51, %v5431_v15  ;;  %v5474_v55 = vpop.f32.mrf.mxu0  ;;  %4804 = vmatmul.mubr.f32.vlgmr.msra.gmra.mxu1 %v667_v49 }
 0x1e1   :  { %v5476_v56 = vpop.f32.mrf.mxu1  ;;  %4807 = vmatpush3.xpose.msra.mxu0 %v529_v53  ;;  %4813 = vmatprep.mubr.msk.f32.mxu1 %vm5281_vm0, %v5962_v24 }
 0x1e2   :  { %v668_v57 = vmul.f32 0.15811388, %v416_v54  ;;  %v534_v59 = vpop.f32.mrf.mxu0  ;;  %4816 = vmatprep.subr.mxu0 %v5962_v24 }
 0x1e3   :  { %v421_v60 = vpop.f32.mrf.mxu1  ;;  %v535_v61 = vadd.f32 %v534_v59, %v5436_v16 }
 0x1e4   :  { %v422_v62 = vadd.f32 %v421_v60, %v5431_v15  ;;  %v5483_v63 = vpop.f32.mrf.mxu0  ;;  %4809 = vmatmul.mubr.f32.vlgmr.msra.gmra.mxu0 %v668_v57 }
 0x1e5   :  { %v5485_v1 = vpop.f32.mrf.mxu1  ;;  %4812 = vmatpush3.xpose.msra.mxu1 %v535_v61  ;;  %4818 = vmatprep.mubr.msk.f32.mxu0 %vm5281_vm0, %v5962_v24 }
 0x1e6   :  { %v669_v2 = vmul.f32 0.15811388, %v422_v62  ;;  %v540_v3 = vpop.f32.mrf.mxu0  ;;  %4821 = vmatprep.subr.mxu1 %v5962_v24 }
 0x1e7   :  { %v427_v4 = vpop.f32.mrf.mxu1  ;;  %v541_v6 = vadd.f32 %v540_v3, %v5436_v16 }
 0x1e8   :  { %v428_v7 = vadd.f32 %v427_v4, %v5431_v15  ;;  %v5492_v8 = vpop.f32.mrf.mxu0  ;;  %4814 = vmatmul.mubr.f32.vlgmr.msra.gmra.mxu1 %v669_v2 }
 0x1e9   :  { %v5495_v17 = vpop.f32.mrf.mxu1  ;;  %4817 = vmatpush3.xpose.msra.mxu0 %v541_v6  ;;  %4823 = vmatprep.mubr.msk.f32.mxu1 %vm5281_vm0, %v5962_v24 }
 0x1ea   :  { %v670_v18 = vmul.f32 0.15811388, %v428_v7  ;;  %v546_v19 = vpop.f32.mrf.mxu0  ;;  %4826 = vmatprep.subr.mxu0 %v5962_v24 }
 0x1eb   :  { %v433_v20 = vpop.f32.mrf.mxu1  ;;  %v547_v23 = vadd.f32 %v546_v19, %v5436_v16 }
 0x1ec   :  { %v434_v25 = vadd.f32 %v433_v20, %v5431_v15  ;;  %4819 = vmatmul.mubr.f32.vlgmr.msra.gmra.mxu0 %v670_v18 }
 0x1ed   :  { %v5505_v27 = vpop.f32.mrf.mxu1  ;;  %4822 = vmatpush3.xpose.msra.mxu1 %v547_v23  ;;  %4828 = vmatprep.mubr.msk.f32.mxu0 %vm5281_vm0, %v5962_v24  ;;  %v5549_v23 = vpop.f32.mrf.mxu0 }
 0x1ee   :  { %v671_v28 = vmul.f32 0.15811388, %v434_v25  ;;  %4831 = vmatprep.subr.mxu1 %v5962_v24 }
 0x1ef   :  { %v617_v32 = vpop.f32.mrf.mxu1 }
 0x1f0   :  { %v618_v33 = vadd.f32 %v617_v32, %v314_v26  ;;  %4824 = vmatmul.mubr.f32.vlgmr.msra.gmra.mxu1 %v671_v28 }
 0x1f1   :  { %v5510_v16 = vpop.f32.mrf.mxu1  ;;  %4833 = vmatprep.mubr.msk.f32.mxu1 %vm5281_vm0, %v5962_v24 }
 0x1f2   :  { %4827 = vmatpush3.msra.mxu0 %v618_v33 }
 0x1f3   :  { %v623_v15 = vpop.f32.mrf.mxu1  ;;  %4836 = vmatprep.subr.mxu0 %v5962_v24 }
 0x1f4   :  { %v624_v36 = vadd.f32 %v623_v15, %v314_v26 }
 0x1f5   :  { %v5516_v37 = vpop.f32.mrf.mxu1 }
 0x1f6   :  { %4832 = vmatpush3.msra.mxu1 %v624_v36 }
 0x1f7   :  { %v629_v41 = vpop.f32.mrf.mxu1  ;;  %4841 = vmatprep.subr.mxu1 %v5962_v24 }
 0x1f8   :  { %v5522_v43 = vadd.f32 %v629_v41, %v314_v26 }
 0x1f9   :  { %v631_v44 = vpop.f32.mrf.mxu1 }
 0x1fa   :  { %v5525_v45 = vadd.f32 %v631_v44, %v5520_v42 }
 0x1fb   :  { %v635_v49 = vpop.f32.mrf.mxu1 }
 0x1fc   :  { %v5527_v50 = vadd.f32 %v635_v49, %v314_v26 }
 0x1fd   :  { %v637_v51 = vpop.f32.mrf.mxu1 }
 0x1fe   :  { %v5530_v53 = vadd.f32 %v637_v51, %v5520_v42 }
 0x1ff   :  { %v641_v54 = vpop.f32.mrf.mxu1 }
 0x200   :  { %v5532_v57 = vadd.f32 %v641_v54, %v314_v26 }
 0x201   :  { %v643_v59 = vpop.f32.mrf.mxu1 }
 0x202   :  { %v5535_v60 = vadd.f32 %v643_v59, %v5520_v42 }
 0x203   :  { %v647_v61 = vpop.f32.mrf.mxu1 }
 0x204   :  { %v5537_v62 = vadd.f32 %v647_v61, %v314_v26 }
 0x205   :  { %v649_v2 = vpop.f32.mrf.mxu1 }
 0x206   :  { %v5540_v3 = vadd.f32 %v649_v2, %v5520_v42 }
 0x207   :  { %v653_v4 = vpop.f32.mrf.mxu1 }
 0x208   :  { %v5542_v6 = vadd.f32 %v653_v4, %v314_v26 }
 0x209   :  { %v655_v7 = vpop.f32.mrf.mxu1 }
 0x20a   :  { %v5545_v18 = vadd.f32 %v655_v7, %v5520_v42 }
 0x20b   :  { %v659_v19 = vpop.f32.mrf.mxu1 }
 0x20c   :  { %v5547_v20 = vadd.f32 %v659_v19, %v314_v26 }
 0x20d   :  { %v5552_v32 = vpop.f32.mrf.mxu1 }
 0x294   :  { %v738_v25 = vpop.f32.mrf.mxu0 }
 0x295   :  { %v1233_v28 = vsel %vm1232_vm1, %v738_v25, -inf }
 0x296   :  { %1234 = vmax.xlane.f32.xlu0 %v1233_v28  ;;  %v4790_v33 = vpop.f32.mrf.mxu0 }
 0x298   :  { %v808_v15 = vpop.f32.mrf.mxu1 }
 0x299   :  { %v1236_v35 = vsel %vm1232_vm1, %v808_v15, -inf }
 0x29a   :  { %v4795_v36 = vpop.f32.mrf.mxu1  ;;  %1237 = vmax.xlane.f32.xlu0 %v1236_v35 }
 0x29c   :  { %v878_v41 = vpop.f32.mrf.mxu0 }
 0x29d   :  { %v1239_v44 = vsel %vm1232_vm1, %v878_v41, -inf }
 0x29e   :  { %1240 = vmax.xlane.f32.xlu1 %v1239_v44  ;;  %v4800_v26 = vpop.f32.mrf.mxu0 }
 0x2a0   :  { %v948_v49 = vpop.f32.mrf.mxu1 }
 0x2a1   :  { %v1242_v51 = vsel %vm1232_vm1, %v948_v49, -inf }
 0x2a2   :  { %1243 = vmax.xlane.f32.xlu1 %v1242_v51  ;;  %v4805_v54 = vpop.f32.mrf.mxu1 }
 0x2a4   :  { %v1018_v59 = vpop.f32.mrf.mxu0 }
 0x2a5   :  { %v1245_v61 = vsel %vm1232_vm1, %v1018_v59, -inf }
 0x2a6   :  { %1246 = vmax.xlane.f32.xlu0 %v1245_v61  ;;  %v4810_v2 = vpop.f32.mrf.mxu0 }
 0x2a8   :  { %v1088_v4 = vpop.f32.mrf.mxu1 }
 0x2a9   :  { %v1248_v7 = vsel %vm1232_vm1, %v1088_v4, -inf }
 0x2aa   :  { %1249 = vmax.xlane.f32.xlu1 %v1248_v7  ;;  %v4815_v19 = vpop.f32.mrf.mxu1 }
 0x2ac   :  { %v1158_v28 = vpop.f32.mrf.mxu0 }
 0x2ad   :  { %v1251_v33 = vsel %vm1232_vm1, %v1158_v28, -inf }
 0x2ae   :  { %1252 = vmax.xlane.f32.xlu0 %v1251_v33  ;;  %v4820_v35 = vpop.f32.mrf.mxu0 }
 0x2b0   :  { %v1228_v36 = vpop.f32.mrf.mxu1 }
 0x2b1   :  { %v1254_v44 = vsel %vm1232_vm1, %v1228_v36, -inf }
 0x2b2   :  { %1255 = vmax.xlane.f32.xlu1 %v1254_v44  ;;  %v4825_v26 = vpop.f32.mrf.mxu1 }
 0x31f   :  { %v1235_v51 = vpop.xlane.xlu0 %1234 }
 0x320   :  { %v1257_v54 = vsub.f32 %v738_v25, %v1235_v51 }
 0x322   :  { %v1265_v9 = vmul.f32 1.442695, %v1257_v54 }
 0x323   :  { %v1238_v61 = vpop.xlane.xlu0 %1237 }
 0x324   :  { %5113 = vpow2.f32 %v1265_v9  ;;  %v1258_v2 = vsub.f32 %v808_v15, %v1238_v61 }
 0x326   :  { %v1267_v13 = vmul.f32 1.442695, %v1258_v2 }
 0x327   :  { %v1241_v10 = vpop.xlane.xlu1 %1240 }
 0x328   :  { %5115 = vpow2.f32 %v1267_v13  ;;  %v1259_v7 = vsub.f32 %v878_v41, %v1241_v10 }
 0x32a   :  { %v1269_v19 = vmul.f32 1.442695, %v1259_v7 }
 0x32b   :  { %v1244_v24 = vpop.xlane.xlu1 %1243 }
 0x32c   :  { %5117 = vpow2.f32 %v1269_v19  ;;  %v1260_v33 = vsub.f32 %v948_v49, %v1244_v24 }
 0x32e   :  { %v1271_v35 = vmul.f32 1.442695, %v1260_v33 }
 0x32f   :  { %v1247_v12 = vpop.xlane.xlu0 %1246 }
 0x330   :  { %5119 = vpow2.f32 %v1271_v35  ;;  %v1261_v0 = vsub.f32 %v1018_v59, %v1247_v12 }
 0x331   :  { %v5114_v44 = vpop.eup %5113 }
 0x332   :  { %v1273_v26 = vmul.f32 1.442695, %v1261_v0  ;;  %v1281_v25 = vsel %vm1232_vm1, %v5114_v44, 0.0 }
 0x333   :  { %v1250_v51 = vpop.xlane.xlu1 %1249  ;;  %1282 = vadd.xlane.f32.xlu0 %v1281_v25 }
 0x334   :  { %5121 = vpow2.f32 %v1273_v26  ;;  %v1262_v9 = vsub.f32 %v1088_v4, %v1250_v51 }
 0x335   :  { %v5116_v15 = vpop.eup %5115 }
 0x336   :  { %v1275_v54 = vmul.f32 1.442695, %v1262_v9  ;;  %v1284_v10 = vsel %vm1232_vm1, %v5116_v15, 0.0 }
 0x337   :  { %1285 = vadd.xlane.f32.xlu1 %v1284_v10  ;;  %v1253_v13 = vpop.xlane.xlu0 %1252 }
 0x338   :  { %5123 = vpow2.f32 %v1275_v54  ;;  %v1263_v24 = vsub.f32 %v1158_v28, %v1253_v13 }
 0x339   :  { %v5118_v41 = vpop.eup %5117 }
 0x33a   :  { %v1277_v49 = vmul.f32 1.442695, %v1263_v24  ;;  %v1287_v12 = vsel %vm1232_vm1, %v5118_v41, 0.0 }
 0x33b   :  { %v1256_v59 = vpop.xlane.xlu1 %1255  ;;  %1288 = vadd.xlane.f32.xlu0 %v1287_v12 }
 0x33c   :  { %5125 = vpow2.f32 %v1277_v49  ;;  %v1264_v0 = vsub.f32 %v1228_v36, %v1256_v59  ;;  %v5969_v59 = vmov 0.0  }
 0x33d   :  { %v5120_v61 = vpop.eup %5119 }
 0x33e   :  { %v1279_v2 = vmul.f32 1.442695, %v1264_v0  ;;  %v1290_v4 = vsel %vm1232_vm1, %v5120_v61, 0.0 }
 0x33f   :  { %1291 = vadd.xlane.f32.xlu1 %v1290_v4 }
 0x340   :  { %5127 = vpow2.f32 %v1279_v2 }
 0x341   :  { %v5122_v7 = vpop.eup %5121 }
 0x342   :  { %v1293_v19 = vsel %vm1232_vm1, %v5122_v7, 0.0 }
 0x343   :  { %1294 = vadd.xlane.f32.xlu0 %v1293_v19 }
 0x345   :  { %v5124_v33 = vpop.eup %5123 }
 0x346   :  { %v1296_v28 = vsel %vm1232_vm1, %v5124_v33, 0.0 }
 0x347   :  { %1297 = vadd.xlane.f32.xlu1 %v1296_v28  ;;  %v5595_v28 = vsub.s32 1, %v5421_v11 }
 0x349   :  { %v5567_v35 = vpop.eup %5125 }
 0x34a   :  { %v1299_v26 = vsel %vm1232_vm1, %v5567_v35, 0.0 }
 0x34b   :  { %1300 = vadd.xlane.f32.xlu0 %v1299_v26 }
 0x34d   :  { %v5571_v36 = vpop.eup %5127 }
 0x34e   :  { %v1302_v25 = vsel %vm1232_vm1, %v5571_v36, 0.0 }
 0x34f   :  { %1303 = vadd.xlane.f32.xlu1 %v1302_v25 }
 0x3bc   :  { %v1283_v51 = vpop.xlane.xlu0 %1282 }
 0x3bd   :  { %5129 = vrcp.f32 %v1283_v51 }
 0x3c0   :  { %v1286_v9 = vpop.xlane.xlu1 %1285 }
 0x3c1   :  { %5131 = vrcp.f32 %v1286_v9 }
 0x3c4   :  { %v1289_v54 = vpop.xlane.xlu0 %1288 }
 0x3c5   :  { %5133 = vrcp.f32 %v1289_v54 }
 0x3c8   :  { %v1292_v10 = vpop.xlane.xlu1 %1291 }
 0x3c9   :  { %5135 = vrcp.f32 %v1292_v10 }
 0x3ca   :  { %v5130_v13 = vpop.eup %5129 }
 0x3cb   :  { %v1313_v24 = vmul.f32 %v5130_v13, %v5114_v44 }
 0x3cc   :  { %v1295_v49 = vpop.xlane.xlu0 %1294 }
 0x3cd   :  { %5137 = vrcp.f32 %v1295_v49  ;;  %4829 = vmatmul.mubr.msk.f32.vlgmr.msra.gmra.mxu0 %vm1232_vm1, %v1313_v24 }
 0x3ce   :  { %v5132_v12 = vpop.eup %5131  ;;  %4837 = vmatpush3.msra.mxu0 %v5522_v43  ;;  %4838 = vmatprep.mubr.msk.f32.mxu0 %vm5281_vm0, %v5969_v59 }
 0x3cf   :  { %v1314_v0 = vmul.f32 %v5132_v12, %v5116_v15  ;;  %4846 = vmatprep.subr.mxu0 %v5969_v59 }
 0x3d0   :  { %v1298_v2 = vpop.xlane.xlu1 %1297 }
 0x3d1   :  { %5139 = vrcp.f32 %v1298_v2  ;;  %4834 = vmatmul.mubr.msk.f32.vlgmr.msra.gmra.mxu1 %vm1232_vm1, %v1314_v0  ;;  %v626_v0 = vadd.f32 %v5516_v37, %v5520_v42 }
 0x3d2   :  { %v5134_v4 = vpop.eup %5133  ;;  %4842 = vmatpush3.msra.mxu1 %v5527_v50  ;;  %4843 = vmatprep.mubr.msk.f32.mxu1 %vm5281_vm0, %v5969_v59 }
 0x3d3   :  { %v1315_v44 = vmul.f32 %v5134_v4, %v5118_v41  ;;  %4851 = vmatprep.subr.mxu1 %v5969_v59 }
 0x3d4   :  { %v1301_v43 = vpop.xlane.xlu0 %1300 }
 0x3d5   :  { %5141 = vrcp.f32 %v1301_v43  ;;  %4839 = vmatmul.mubr.msk.f32.vlgmr.msra.gmra.mxu0 %vm1232_vm1, %v1315_v44 }
 0x3d6   :  { %v5136_v15 = vpop.eup %5135  ;;  %4847 = vmatpush3.msra.mxu0 %v5532_v57  ;;  %4848 = vmatprep.mubr.msk.f32.mxu0 %vm5281_vm0, %v5969_v59 }
 0x3d7   :  { %v1316_v19 = vmul.f32 %v5136_v15, %v5120_v61  ;;  %4856 = vmatprep.subr.mxu0 %v5969_v59  ;;  %v309_v61 = vsub.s32 3, %v5421_v11 }
 0x3d8   :  { %v1304_v50 = vpop.xlane.xlu1 %1303 }
 0x3d9   :  { %5143 = vrcp.f32 %v1304_v50  ;;  %4844 = vmatmul.mubr.msk.f32.vlgmr.msra.gmra.mxu1 %vm1232_vm1, %v1316_v19 }
 0x3da   :  { %v5138_v41 = vpop.eup %5137  ;;  %4852 = vmatpush3.msra.mxu1 %v5537_v62  ;;  %4853 = vmatprep.mubr.msk.f32.mxu1 %vm5281_vm0, %v5969_v59  ;;  %v302_v62 = vrot.slane %v5427_v14, %v5595_v28 }
 0x3db   :  { %v1317_v57 = vmul.f32 %v5138_v41, %v5122_v7  ;;  %4861 = vmatprep.subr.mxu1 %v5969_v59  ;;  %v310_v7 = vrot.slane %v5427_v14, %v309_v61 }
 0x3dc   :  { %v406_v10 = vadd.f32 %v5458_v39, %v302_v62  ;;  %v412_v49 = vadd.f32 %v5467_v48, %v302_v62  ;;  %v436_v12 = vadd.f32 %v5505_v27, %v302_v62 }
 0x3dd   :  { %4849 = vmatmul.mubr.msk.f32.vlgmr.msra.gmra.mxu0 %vm1232_vm1, %v1317_v57 }
 0x3de   :  { %v5140_v26 = vpop.eup %5139  ;;  %4857 = vmatpush3.msra.mxu0 %v5542_v6  ;;  %4858 = vmatprep.mubr.msk.f32.mxu0 %vm5281_vm0, %v5969_v59  ;;  %v394_v6 = vadd.f32 %v5440_v21, %v302_v62  ;;  %v1907_v24 = vmul.f32 0.15811388, %v406_v10  ;;  %v1908_v39 = vmul.f32 0.15811388, %v412_v49  ;;  %v1912_v27 = vmul.f32 0.15811388, %v436_v12 }
 0x3df   :  { %v1318_v25 = vmul.f32 %v5140_v26, %v5124_v33  ;;  %4866 = vmatprep.subr.mxu0 %v5969_v59  ;;  %v507_v33 = vadd.f32 %v5442_v22, %v310_v7  ;;  %v519_v22 = vadd.f32 %v5456_v38, %v310_v7  ;;  %v531_v38 = vadd.f32 %v5474_v55, %v310_v7 }
 0x3e0   :  { %v1905_v14 = vmul.f32 0.15811388, %v394_v6  ;;  %v543_v55 = vadd.f32 %v5492_v8, %v310_v7  ;;  %v549_v8 = vadd.f32 %v5549_v23, %v310_v7 }
 0x3e1   :  { %4854 = vmatmul.mubr.msk.f32.vlgmr.msra.gmra.mxu1 %vm1232_vm1, %v1318_v25 }
 0x3e2   :  { %v5142_v51 = vpop.eup %5141  ;;  %4862 = vmatpush3.msra.mxu1 %v5547_v20  ;;  %4863 = vmatprep.mubr.msk.f32.mxu1 %vm5281_vm0, %v5969_v59  ;;  %v400_v20 = vadd.f32 %v5447_v30, %v302_v62  ;;  %v418_v30 = vadd.f32 %v5476_v56, %v302_v62  ;;  %v424_v56 = vadd.f32 %v5485_v1, %v302_v62 }
 0x3e3   :  { %v1319_v9 = vmul.f32 %v5142_v51, %v5567_v35  ;;  %4871 = vmatprep.subr.mxu1 %v5969_v59  ;;  %v513_v35 = vadd.f32 %v5449_v31, %v310_v7  ;;  %v525_v31 = vadd.f32 %v5465_v47, %v310_v7  ;;  %v537_v47 = vadd.f32 %v5483_v63, %v310_v7 }
 0x3e4   :  { %v1906_v13 = vmul.f32 0.15811388, %v400_v20  ;;  %v1909_v48 = vmul.f32 0.15811388, %v418_v30  ;;  %v1910_v1 = vmul.f32 0.15811388, %v424_v56  ;;  %v620_v63 = vadd.f32 %v5510_v16, %v5520_v42 }
 0x3e5   :  { %4859 = vmatmul.mubr.msk.f32.vlgmr.msra.gmra.mxu0 %vm1232_vm1, %v1319_v9 }
 0x3e6   :  { %v5144_v54 = vpop.eup %5143  ;;  %4867 = vmatpush3.xpose.msra.mxu0 %v507_v33  ;;  %4868 = vmatprep.mubr.msk.f32.mxu0 %vm5281_vm0, %v5969_v59 }
 0x3e7   :  { %4876 = vmatprep.subr.mxu0 %v5969_v59  ;;  %v1320_v21 = vmul.f32 %v5144_v54, %v5571_v36  ;;  %v430_v36 = vadd.f32 %v5495_v17, %v302_v62 }
 0x3e9   :  { %4864 = vmatmul.mubr.msk.f32.vlgmr.msra.gmra.mxu1 %vm1232_vm1, %v1320_v21  ;;  %4869 = vmatmul.mubr.f32.vlgmr.msra.gmra.mxu0 %v1905_v14  ;;  %v1911_v17 = vmul.f32 0.15811388, %v430_v36 }
 0x3ea   :  { %4872 = vmatpush3.xpose.msra.mxu1 %v513_v35  ;;  %4877 = vmatpush3.xpose.msra.mxu0 %v519_v22 }
 0x3eb   :  { %4873 = vmatprep.mubr.msk.f32.mxu1 %vm5281_vm0, %v5969_v59  ;;  %4878 = vmatprep.mubr.msk.f32.mxu0 %vm5281_vm0, %v5969_v59 }
 0x3ec   :  { %4881 = vmatprep.subr.mxu1 %v5969_v59  ;;  %4886 = vmatprep.subr.mxu0 %v5969_v59 }
 0x3ed   :  { %4874 = vmatmul.mubr.f32.vlgmr.msra.gmra.mxu1 %v1906_v13  ;;  %4879 = vmatmul.mubr.f32.vlgmr.msra.gmra.mxu0 %v1907_v24 }
 0x3ee   :  { %4882 = vmatpush3.xpose.msra.mxu1 %v525_v31  ;;  %4887 = vmatpush3.xpose.msra.mxu0 %v531_v38 }
 0x3ef   :  { %4883 = vmatprep.mubr.msk.f32.mxu1 %vm5281_vm0, %v5969_v59  ;;  %4888 = vmatprep.mubr.msk.f32.mxu0 %vm5281_vm0, %v5969_v59 }
 0x3f0   :  { %4891 = vmatprep.subr.mxu1 %v5969_v59  ;;  %4896 = vmatprep.subr.mxu0 %v5969_v59 }
 0x3f1   :  { %4884 = vmatmul.mubr.f32.vlgmr.msra.gmra.mxu1 %v1908_v39  ;;  %4889 = vmatmul.mubr.f32.vlgmr.msra.gmra.mxu0 %v1909_v48 }
 0x3f2   :  { %4892 = vmatpush3.xpose.msra.mxu1 %v537_v47  ;;  %4897 = vmatpush3.xpose.msra.mxu0 %v543_v55 }
 0x3f3   :  { %4893 = vmatprep.mubr.msk.f32.mxu1 %vm5281_vm0, %v5969_v59  ;;  %4898 = vmatprep.mubr.msk.f32.mxu0 %vm5281_vm0, %v5969_v59 }
 0x3f4   :  { %4901 = vmatprep.subr.mxu1 %v5969_v59  ;;  %4906 = vmatprep.subr.mxu0 %v5969_v59 }
 0x3f5   :  { %4894 = vmatmul.mubr.f32.vlgmr.msra.gmra.mxu1 %v1910_v1  ;;  %4899 = vmatmul.mubr.f32.vlgmr.msra.gmra.mxu0 %v1911_v17 }
 0x3f6   :  { %4902 = vmatpush3.xpose.msra.mxu1 %v549_v8  ;;  %4907 = vmatpush3.msra.mxu0 %v620_v63 }
 0x3f7   :  { %4903 = vmatprep.mubr.msk.f32.mxu1 %vm5281_vm0, %v5969_v59  ;;  %4911 = vmatprep.subr.mxu1 %v5969_v59 }
 0x3f8   :  { %4908 = vmatprep.mubr.msk.f32.mxu0 %vm5281_vm0, %v5969_v59  ;;  %4916 = vmatprep.subr.mxu0 %v5969_v59 }
 0x3f9   :  { %4904 = vmatmul.mubr.f32.vlgmr.msra.gmra.mxu1 %v1912_v27 }
 0x3fa   :  { %4912 = vmatpush3.msra.mxu1 %v626_v0  ;;  %4913 = vmatprep.mubr.msk.f32.mxu1 %vm5281_vm0, %v5969_v59 }
 0x3fb   :  { %4921 = vmatprep.subr.mxu1 %v5969_v59 }
 0x48d   :  { %v5668_v16 = vpop.f32.mrf.mxu0 }
 0x48f   :  { %v4830_v23 = vpop.f32.mrf.mxu0 }
 0x491   :  { %v5670_v2 = vpop.f32.mrf.mxu1 }
 0x493   :  { %v4835_v4 = vpop.f32.mrf.mxu1 }
 0x495   :  { %v5672_v44 = vpop.f32.mrf.mxu0 }
 0x497   :  { %v4840_v37 = vpop.f32.mrf.mxu0 }
 0x499   :  { %v5674_v43 = vpop.f32.mrf.mxu1 }
 0x49b   :  { %v4845_v15 = vpop.f32.mrf.mxu1 }
 0x49d   :  { %v5676_v19 = vpop.f32.mrf.mxu0 }
 0x49f   :  { %v4850_v50 = vpop.f32.mrf.mxu0 }
 0x4a1   :  { %v5678_v41 = vpop.f32.mrf.mxu1 }
 0x4a3   :  { %v4855_v57 = vpop.f32.mrf.mxu1 }
 0x4a5   :  { %v5680_v26 = vpop.f32.mrf.mxu0 }
 0x4a7   :  { %v4860_v62 = vpop.f32.mrf.mxu0 }
 0x4a9   :  { %v5682_v25 = vpop.f32.mrf.mxu1  ;;  %v1979_v7 = vpop.f32.mrf.mxu0 }
 0x4aa   :  { %v2473_v51 = vsel %vm1232_vm1, %v1979_v7, -inf }
 0x4ab   :  { %v4865_v6 = vpop.f32.mrf.mxu1  ;;  %2474 = vmax.xlane.f32.xlu0 %v2473_v51  ;;  %v4870_v9 = vpop.f32.mrf.mxu0 }
 0x4ad   :  { %v2049_v33 = vpop.f32.mrf.mxu1  ;;  %v2119_v54 = vpop.f32.mrf.mxu0 }
 0x4ae   :  { %v2476_v14 = vsel %vm1232_vm1, %v2049_v33, -inf  ;;  %v2479_v20 = vsel %vm1232_vm1, %v2119_v54, -inf }
 0x4af   :  { %2477 = vmax.xlane.f32.xlu1 %v2476_v14  ;;  %v4875_v10 = vpop.f32.mrf.mxu1  ;;  %2480 = vmax.xlane.f32.xlu0 %v2479_v20  ;;  %v4880_v21 = vpop.f32.mrf.mxu0 }
 0x4b1   :  { %v2189_v35 = vpop.f32.mrf.mxu1  ;;  %v2259_v22 = vpop.f32.mrf.mxu0 }
 0x4b2   :  { %v2482_v13 = vsel %vm1232_vm1, %v2189_v35, -inf  ;;  %v2485_v24 = vsel %vm1232_vm1, %v2259_v22, -inf }
 0x4b3   :  { %2483 = vmax.xlane.f32.xlu1 %v2482_v13  ;;  %v4885_v49 = vpop.f32.mrf.mxu1  ;;  %2486 = vmax.xlane.f32.xlu0 %v2485_v24  ;;  %v4890_v30 = vpop.f32.mrf.mxu0 }
 0x4b5   :  { %v2329_v31 = vpop.f32.mrf.mxu1  ;;  %v2399_v38 = vpop.f32.mrf.mxu0 }
 0x4b6   :  { %v2488_v39 = vsel %vm1232_vm1, %v2329_v31, -inf  ;;  %v2491_v48 = vsel %vm1232_vm1, %v2399_v38, -inf }
 0x4b7   :  { %2489 = vmax.xlane.f32.xlu1 %v2488_v39  ;;  %v4895_v56 = vpop.f32.mrf.mxu1  ;;  %2492 = vmax.xlane.f32.xlu0 %v2491_v48  ;;  %v4900_v36 = vpop.f32.mrf.mxu0 }
 0x4b9   :  { %v2469_v47 = vpop.f32.mrf.mxu1 }
 0x4ba   :  { %v2494_v55 = vsel %vm1232_vm1, %v2469_v47, -inf }
 0x4bb   :  { %2495 = vmax.xlane.f32.xlu1 %v2494_v55  ;;  %v4905_v1 = vpop.f32.mrf.mxu1 }
 0x534   :  { %v2475_v17 = vpop.xlane.xlu0 %2474 }
 0x535   :  { %v2497_v12 = vsub.f32 %v1979_v7, %v2475_v17 }
 0x537   :  { %v2505_v63 = vmul.f32 1.442695, %v2497_v12 }
 0x538   :  { %v2478_v8 = vpop.xlane.xlu1 %2477  ;;  %v2481_v27 = vpop.xlane.xlu0 %2480 }
 0x539   :  { %5145 = vpow2.f32 %v2505_v63  ;;  %v2498_v0 = vsub.f32 %v2049_v33, %v2478_v8  ;;  %v2499_v23 = vsub.f32 %v2119_v54, %v2481_v27 }
 0x53b   :  { %v2507_v4 = vmul.f32 1.442695, %v2498_v0  ;;  %v2509_v37 = vmul.f32 1.442695, %v2499_v23 }
 0x53c   :  { %v2484_v15 = vpop.xlane.xlu1 %2483  ;;  %v2487_v50 = vpop.xlane.xlu0 %2486 }
 0x53d   :  { %5147 = vpow2.f32 %v2507_v4  ;;  %v2500_v57 = vsub.f32 %v2189_v35, %v2484_v15  ;;  %v2501_v62 = vsub.f32 %v2259_v22, %v2487_v50 }
 0x53e   :  { %5149 = vpow2.f32 %v2509_v37 }
 0x53f   :  { %v2511_v51 = vmul.f32 1.442695, %v2500_v57  ;;  %v2513_v6 = vmul.f32 1.442695, %v2501_v62 }
 0x540   :  { %v2490_v9 = vpop.xlane.xlu1 %2489  ;;  %v2493_v14 = vpop.xlane.xlu0 %2492 }
 0x541   :  { %5151 = vpow2.f32 %v2511_v51  ;;  %v2502_v7 = vsub.f32 %v2329_v31, %v2490_v9  ;;  %v2503_v20 = vsub.f32 %v2399_v38, %v2493_v14 }
 0x542   :  { %5153 = vpow2.f32 %v2513_v6 }
 0x543   :  { %v2515_v10 = vmul.f32 1.442695, %v2502_v7  ;;  %v2517_v21 = vmul.f32 1.442695, %v2503_v20 }
 0x544   :  { %v2496_v33 = vpop.xlane.xlu1 %2495 }
 0x545   :  { %5155 = vpow2.f32 %v2515_v10  ;;  %v2504_v54 = vsub.f32 %v2469_v47, %v2496_v33  ;;  %v662_v33 = vadd.f32 %v5552_v32, %v5520_v42  ;;  %v3159_v32 = vld [vmem:[#allocation2 + $0x7a8] sm:$0xff] }
 0x546   :  { %v5146_v13 = vpop.eup %5145  ;;  %5157 = vpow2.f32 %v2517_v21 }
 0x547   :  { %v2519_v24 = vmul.f32 1.442695, %v2504_v54  ;;  %v2521_v35 = vsel %vm1232_vm1, %v5146_v13, 0.0 }
 0x548   :  { %2522 = vadd.xlane.f32.xlu0 %v2521_v35  ;;  %v3158_v35 = vld [vmem:[#allocation2 + $0x720] sm:$0xff] }
 0x549   :  { %5159 = vpow2.f32 %v2519_v24  ;;  %v3174_v24 = vld [vmem:[#allocation2 + $0x728] sm:$0xff] }
 0x54a   :  { %v5148_v22 = vpop.eup %5147 }
 0x54b   :  { %v5150_v49 = vpop.eup %5149  ;;  %v2524_v30 = vsel %vm1232_vm1, %v5148_v22, 0.0 }
 0x54c   :  { %2525 = vadd.xlane.f32.xlu1 %v2524_v30  ;;  %v2527_v31 = vsel %vm1232_vm1, %v5150_v49, 0.0  ;;  %v3172_v30 = vld [vmem:[#allocation2 + $0x618] sm:$0xff] }
 0x54d   :  { %2528 = vadd.xlane.f32.xlu0 %v2527_v31  ;;  %v3156_v31 = vld [vmem:[#allocation2 + $0x610] sm:$0xff] }
 0x54e   :  { %v5152_v38 = vpop.eup %5151 }
 0x54f   :  { %v5154_v39 = vpop.eup %5153  ;;  %v2530_v48 = vsel %vm1232_vm1, %v5152_v38, 0.0 }
 0x550   :  { %2531 = vadd.xlane.f32.xlu1 %v2530_v48  ;;  %v2533_v56 = vsel %vm1232_vm1, %v5154_v39, 0.0  ;;  %v3154_v48 = vld [vmem:[#allocation2 + $0x500] sm:$0xff] }
 0x551   :  { %2534 = vadd.xlane.f32.xlu0 %v2533_v56  ;;  %v3169_v56 = vld [vmem:[#allocation2 + $0x480] sm:$0xff] }
 0x552   :  { %v5156_v36 = vpop.eup %5155 }
 0x553   :  { %v5158_v47 = vpop.eup %5157  ;;  %v2536_v55 = vsel %vm1232_vm1, %v5156_v36, 0.0 }
 0x554   :  { %2537 = vadd.xlane.f32.xlu1 %v2536_v55  ;;  %v2539_v1 = vsel %vm1232_vm1, %v5158_v47, 0.0  ;;  %v3152_v55 = vld [vmem:[#allocation2 + $0x3f0] sm:$0xff] }
 0x555   :  { %2540 = vadd.xlane.f32.xlu0 %v2539_v1  ;;  %v3167_v1 = vld [vmem:[#allocation2 + $0x370] sm:$0xff] }
 0x556   :  { %v5699_v17 = vpop.eup %5159 }
 0x557   :  { %v2542_v12 = vsel %vm1232_vm1, %v5699_v17, 0.0 }
 0x558   :  { %2543 = vadd.xlane.f32.xlu1 %v2542_v12  ;;  %v3166_v12 = vld [vmem:[#allocation2 + $0x2e8] sm:$0xff] }
 0x5d1   :  { %v2523_v63 = vpop.xlane.xlu0 %2522 }
 0x5d2   :  { %5161 = vrcp.f32 %v2523_v63  ;;  %v3150_v63 = vld [vmem:[#allocation2 + $0x2e0] sm:$0xff] }
 0x5d5   :  { %v2526_v8 = vpop.xlane.xlu1 %2525 }
 0x5d6   :  { %5163 = vrcp.f32 %v2526_v8  ;;  %v2529_v27 = vpop.xlane.xlu0 %2528  ;;  %v3165_v8 = vld [vmem:[#allocation2 + $0x260] sm:$0xff] }
 0x5d7   :  { %5165 = vrcp.f32 %v2529_v27  ;;  %v3149_v27 = vld [vmem:[#allocation2 + $0x258] sm:$0xff] }
 0x5d9   :  { %v2532_v0 = vpop.xlane.xlu1 %2531 }
 0x5da   :  { %5167 = vrcp.f32 %v2532_v0  ;;  %v2535_v23 = vpop.xlane.xlu0 %2534  ;;  %v3164_v0 = vld [vmem:[#allocation2 + $0x1d8] sm:$0xff] }
 0x5db   :  { %5169 = vrcp.f32 %v2535_v23  ;;  %v3148_v23 = vld [vmem:[#allocation2 + $0x1d0] sm:$0xff] }
 0x5dd   :  { %v2538_v4 = vpop.xlane.xlu1 %2537 }
 0x5de   :  { %5171 = vrcp.f32 %v2538_v4  ;;  %v2541_v37 = vpop.xlane.xlu0 %2540  ;;  %v3163_v4 = vld [vmem:[#allocation2 + $0x150] sm:$0xff] }
 0x5df   :  { %v5162_v15 = vpop.eup %5161  ;;  %5173 = vrcp.f32 %v2541_v37  ;;  %v3147_v37 = vld [vmem:[#allocation2 + $0x148] sm:$0xff] }
 0x5e0   :  { %v2553_v50 = vmul.f32 %v5162_v15, %v5146_v13  ;;  %v3160_v13 = vld [vmem:[#allocation2 + $0x830] sm:$0xff]  ;;  %v3146_v15 = vld [vmem:[#allocation2 + $0xc0] sm:$0xff] }
 0x5e1   :  { %v2544_v57 = vpop.xlane.xlu1 %2543 }
 0x5e2   :  { %5175 = vrcp.f32 %v2544_v57  ;;  %4909 = vmatmul.mubr.msk.f32.vlgmr.msra.gmra.mxu0 %vm1232_vm1, %v2553_v50  ;;  %v3145_v50 = vld [vmem:[#allocation2 + $0x38] sm:$0xff]  ;;  %v3162_v57 = vld [vmem:[#allocation2 + $0xc8] sm:$0xff] }
 0x5e3   :  { %v5164_v62 = vpop.eup %5163  ;;  %4917 = vmatpush3.msra.mxu0 %v5525_v45  ;;  %4918 = vmatprep.mubr.msk.f32.mxu0 %vm5281_vm0, %v5969_v59 }
 0x5e4   :  { %v5166_v51 = vpop.eup %5165  ;;  %4926 = vmatprep.subr.mxu0 %v5969_v59  ;;  %v2554_v6 = vmul.f32 %v5164_v62, %v5148_v22  ;;  %v3173_v22 = vld [vmem:[#allocation2 + $0x6a0] sm:$0xff] }
 0x5e5   :  { %v2555_v9 = vmul.f32 %v5166_v51, %v5150_v49  ;;  %v3157_v49 = vld [vmem:[#allocation2 + $0x698] sm:$0xff]  ;;  %v3161_v62 = vld [vmem:[#allocation2 + $0x40] sm:$0xff] }
 0x5e6   :  { %4914 = vmatmul.mubr.msk.f32.vlgmr.msra.gmra.mxu1 %vm1232_vm1, %v2554_v6 }
 0x5e7   :  { %v5168_v14 = vpop.eup %5167  ;;  %4919 = vmatmul.mubr.msk.f32.vlgmr.msra.gmra.mxu0 %vm1232_vm1, %v2555_v9  ;;  %4922 = vmatpush3.msra.mxu1 %v5530_v53  ;;  %v3176_v53 = vld [vmem:[#allocation2 + $0x838] sm:$0xff] }
 0x5e8   :  { %v5170_v7 = vpop.eup %5169  ;;  %4927 = vmatpush3.msra.mxu0 %v5535_v60  ;;  %4923 = vmatprep.mubr.msk.f32.mxu1 %vm5281_vm0, %v5969_v59  ;;  %v2556_v45 = vmul.f32 %v5168_v14, %v5152_v38  ;;  %v3171_v38 = vld [vmem:[#allocation2 + $0x590] sm:$0xff] }
 0x5e9   :  { %4928 = vmatprep.mubr.msk.f32.mxu0 %vm5281_vm0, %v5969_v59  ;;  %4931 = vmatprep.subr.mxu1 %v5969_v59  ;;  %v2557_v20 = vmul.f32 %v5170_v7, %v5154_v39  ;;  %v3155_v39 = vld [vmem:[#allocation2 + $0x588] sm:$0xff] }
 0x5ea   :  { %4936 = vmatprep.subr.mxu0 %v5969_v59  ;;  %4924 = vmatmul.mubr.msk.f32.vlgmr.msra.gmra.mxu1 %vm1232_vm1, %v2556_v45 }
 0x5eb   :  { %v5172_v10 = vpop.eup %5171  ;;  %4929 = vmatmul.mubr.msk.f32.vlgmr.msra.gmra.mxu0 %vm1232_vm1, %v2557_v20  ;;  %4932 = vmatpush3.msra.mxu1 %v5540_v3 }
 0x5ec   :  { %v5174_v60 = vpop.eup %5173  ;;  %4937 = vmatpush3.msra.mxu0 %v5545_v18  ;;  %4933 = vmatprep.mubr.msk.f32.mxu1 %vm5281_vm0, %v5969_v59  ;;  %v2558_v21 = vmul.f32 %v5172_v10, %v5156_v36  ;;  %v3175_v18 = vld [vmem:[#allocation2 + $0x7b0] sm:$0xff]  ;;  %v3153_v36 = vld [vmem:[#allocation2 + $0x478] sm:$0xff] }
 0x5ed   :  { %4938 = vmatprep.mubr.msk.f32.mxu0 %vm5281_vm0, %v5969_v59  ;;  %4941 = vmatprep.subr.mxu1 %v5969_v59  ;;  %v2559_v54 = vmul.f32 %v5174_v60, %v5158_v47  ;;  %v3168_v47 = vld [vmem:[#allocation2 + $0x3f8] sm:$0xff] }
 0x5ee   :  { %4934 = vmatmul.mubr.msk.f32.vlgmr.msra.gmra.mxu1 %vm1232_vm1, %v2558_v21  ;;  %4946 = vmatprep.subr.mxu0 %v3176_v53 }
 0x5ef   :  { %v5176_v3 = vpop.eup %5175  ;;  %4939 = vmatmul.mubr.msk.f32.vlgmr.msra.gmra.mxu0 %vm1232_vm1, %v2559_v54  ;;  %4942 = vmatpush3.msra.mxu1 %v662_v33 }
 0x5f0   :  { %4943 = vmatprep.mubr.msk.f32.mxu1 %vm5281_vm0, %v5969_v59  ;;  %4990 = vmatprep.subr.mxu1 %v3160_v13  ;;  %v2560_v42 = vmul.f32 %v5176_v3, %v5699_v17  ;;  %v3151_v17 = vld [vmem:[#allocation2 + $0x368] sm:$0xff]  ;;  %v4509_v3 = vld [vmem:[#allocation6 + $0x7] ss:$0 sm:$0xff] }
 0x5f1   :  { %4947 = vmatpush3.msra.mxu0 %v3176_v53 }
 0x5f2   :  { %4944 = vmatmul.mubr.msk.f32.vlgmr.msra.gmra.mxu1 %vm1232_vm1, %v2560_v42  ;;  %4948 = vmatprep.subr.mxu0 %v3175_v18 }
 0x5f3   :  { %4991 = vmatpush3.msra.mxu1 %v3160_v13  ;;  %5022 = vmatprep.mubr.f32.mxu1 %v5668_v16  ;;  %v3170_v16 = vld [vmem:[#allocation2 + $0x508] sm:$0xff] }
 0x5f4   :  { %4992 = vmatprep.subr.mxu1 %v3159_v32  ;;  %4949 = vmatpush3.msra.mxu0 %v3175_v18 }
 0x5f5   :  { %4993 = vmatpush3.msra.mxu1 %v3159_v32  ;;  %4950 = vmatprep.subr.mxu0 %v3174_v24 }
 0x5f6   :  { %4994 = vmatprep.subr.mxu1 %v3158_v35  ;;  %4951 = vmatpush3.msra.mxu0 %v3174_v24 }
 0x5f7   :  { %4995 = vmatpush3.msra.mxu1 %v3158_v35  ;;  %4952 = vmatprep.subr.mxu0 %v3173_v22 }
 0x5f8   :  { %4996 = vmatprep.subr.mxu1 %v3157_v49  ;;  %4953 = vmatpush3.msra.mxu0 %v3173_v22 }
 0x5f9   :  { %4997 = vmatpush3.msra.mxu1 %v3157_v49  ;;  %4954 = vmatprep.subr.mxu0 %v3172_v30 }
 0x5fa   :  { %4998 = vmatprep.subr.mxu1 %v3156_v31  ;;  %4955 = vmatpush3.msra.mxu0 %v3172_v30 }
 0x5fb   :  { %4999 = vmatpush3.msra.mxu1 %v3156_v31  ;;  %4956 = vmatprep.subr.mxu0 %v3171_v38 }
 0x5fc   :  { %5000 = vmatprep.subr.mxu1 %v3155_v39  ;;  %4957 = vmatpush3.msra.mxu0 %v3171_v38 }
 0x5fd   :  { %5001 = vmatpush3.msra.mxu1 %v3155_v39  ;;  %4958 = vmatprep.subr.mxu0 %v3170_v16 }
 0x5fe   :  { %5002 = vmatprep.subr.mxu1 %v3154_v48  ;;  %4959 = vmatpush3.msra.mxu0 %v3170_v16 }
 0x5ff   :  { %5003 = vmatpush3.msra.mxu1 %v3154_v48  ;;  %4960 = vmatprep.subr.mxu0 %v3169_v56 }
 0x600   :  { %5004 = vmatprep.subr.mxu1 %v3153_v36  ;;  %4961 = vmatpush3.msra.mxu0 %v3169_v56 }
 0x601   :  { %5005 = vmatpush3.msra.mxu1 %v3153_v36  ;;  %4962 = vmatprep.subr.mxu0 %v3168_v47 }
 0x602   :  { %5006 = vmatprep.subr.mxu1 %v3152_v55  ;;  %4963 = vmatpush3.msra.mxu0 %v3168_v47 }
 0x603   :  { %5007 = vmatpush3.msra.mxu1 %v3152_v55  ;;  %4964 = vmatprep.subr.mxu0 %v3167_v1 }
 0x604   :  { %5008 = vmatprep.subr.mxu1 %v3151_v17  ;;  %4965 = vmatpush3.msra.mxu0 %v3167_v1 }
 0x605   :  { %5009 = vmatpush3.msra.mxu1 %v3151_v17  ;;  %4966 = vmatprep.subr.mxu0 %v3166_v12 }
 0x606   :  { %5010 = vmatprep.subr.mxu1 %v3150_v63  ;;  %4967 = vmatpush3.msra.mxu0 %v3166_v12 }
 0x607   :  { %5011 = vmatpush3.msra.mxu1 %v3150_v63  ;;  %4968 = vmatprep.subr.mxu0 %v3165_v8 }
 0x608   :  { %5012 = vmatprep.subr.mxu1 %v3149_v27  ;;  %4969 = vmatpush3.msra.mxu0 %v3165_v8 }
 0x609   :  { %5013 = vmatpush3.msra.mxu1 %v3149_v27  ;;  %4970 = vmatprep.subr.mxu0 %v3164_v0 }
 0x60a   :  { %5014 = vmatprep.subr.mxu1 %v3148_v23  ;;  %4971 = vmatpush3.msra.mxu0 %v3164_v0 }
 0x60b   :  { %5015 = vmatpush3.msra.mxu1 %v3148_v23  ;;  %4972 = vmatprep.subr.mxu0 %v3163_v4 }
 0x60c   :  { %5016 = vmatprep.subr.mxu1 %v3147_v37  ;;  %4973 = vmatpush3.msra.mxu0 %v3163_v4 }
 0x60d   :  { %5017 = vmatpush3.msra.mxu1 %v3147_v37  ;;  %4974 = vmatprep.subr.mxu0 %v3162_v57 }
 0x60e   :  { %5018 = vmatprep.subr.mxu1 %v3146_v15  ;;  %4975 = vmatpush3.msra.mxu0 %v3162_v57 }
 0x60f   :  { %5019 = vmatpush3.msra.mxu1 %v3146_v15  ;;  %4976 = vmatprep.subr.mxu0 %v3161_v62 }
 0x610   :  { %5020 = vmatprep.subr.mxu1 %v3145_v50  ;;  %4977 = vmatpush3.msra.mxu0 %v3161_v62 }
 0x611   :  { %5021 = vmatpush3.msra.mxu1 %v3145_v50 }
 0x612   :  { %5023 = vmatmul.mubr.f32.vlgmr.msra.gmra.mxu1 %v5670_v2 }
 0x613   :  { %5025 = vmatprep.mubr.f32.mxu1 %v5672_v44 }
 0x616   :  { %5026 = vmatmul.mubr.f32.gmra.mxu1 %v5674_v43 }
 0x617   :  { %5028 = vmatprep.mubr.f32.mxu1 %v5676_v19 }
 0x61a   :  { %5029 = vmatmul.mubr.f32.gmra.mxu1 %v5678_v41 }
 0x61b   :  { %5031 = vmatprep.mubr.f32.mxu1 %v5680_v26 }
 0x61e   :  { %5032 = vmatmul.mubr.f32.gmra.mxu1 %v5682_v25 }
 0x6a2   :  { %v2630_v51 = vpop.f32.mrf.mxu0 }
 0x6a3   :  { %4978 = vmatprep.mubr.f32.mxu0 %v2630_v51  ;;  %v5970_v51 = vld [vmem:[#allocation9_spill] sm:$0xff] }
 0x6a4   :  { %v4910_v2 = vpop.f32.mrf.mxu0 }
 0x6a5   :  { %v3567_v2 = vld [vmem:[#allocation2 + $0x848] sm:$0xff] }
 0x6a6   :  { %v2703_v44 = vpop.f32.mrf.mxu1  ;;  %3580 = vmatprep.subr.mxu0 %v3567_v2  ;;  %v3550_v2 = vld [vmem:[#allocation2 + $0x400] sm:$0xff] }
 0x6a7   :  { %v2776_v6 = vpop.f32.mrf.mxu0  ;;  %4979 = vmatmul.mubr.f32.vlgmr.msra.gmra.mxu0 %v2703_v44  ;;  %v3566_v44 = vld [vmem:[#allocation2 + $0x840] sm:$0xff] }
 0x6a8   :  { %v4915_v43 = vpop.f32.mrf.mxu1  ;;  %4981 = vmatprep.mubr.f32.mxu0 %v2776_v6  ;;  %v3565_v6 = vld [vmem:[#allocation2 + $0x7c0] sm:$0xff]  ;;  %3581 = vmatpush1.msra.mxu0 %v3566_v44 }
 0x6a9   :  { %v4920_v19 = vpop.f32.mrf.mxu0  ;;  %v3563_v43 = vld [vmem:[#allocation2 + $0x738] sm:$0xff]  ;;  %3582 = vmatprep.subr.mxu0 %v3565_v6  ;;  %v3549_v44 = vld [vmem:[#allocation2 + $0x380] sm:$0xff] }
 0x6aa   :  { %v2849_v41 = vpop.f32.mrf.mxu1  ;;  %v3562_v19 = vld [vmem:[#allocation2 + $0x730] sm:$0xff]  ;;  %v3548_v6 = vld [vmem:[#allocation2 + $0x378] sm:$0xff] }
 0x6ab   :  { %v2922_v9 = vpop.f32.mrf.mxu0  ;;  %4982 = vmatmul.mubr.f32.gmra.mxu0 %v2849_v41 }
 0x6ac   :  { %v4925_v26 = vpop.f32.mrf.mxu1  ;;  %4984 = vmatprep.mubr.f32.mxu0 %v2922_v9 }
 0x6ad   :  { %v4930_v25 = vpop.f32.mrf.mxu0 }
 0x6ae   :  { %v2995_v14 = vpop.f32.mrf.mxu1 }
 0x6af   :  { %v3068_v7 = vpop.f32.mrf.mxu0  ;;  %4985 = vmatmul.mubr.f32.gmra.mxu0 %v2995_v14 }
 0x6b0   :  { %v4935_v45 = vpop.f32.mrf.mxu1  ;;  %4987 = vmatprep.mubr.f32.mxu0 %v3068_v7 }
 0x6b1   :  { %v4940_v20 = vpop.f32.mrf.mxu0 }
 0x6b2   :  { %v3141_v10 = vpop.f32.mrf.mxu1 }
 0x6b3   :  { %4988 = vmatmul.mubr.f32.gmra.mxu0 %v3141_v10 }
 0x6b4   :  { %v4945_v53 = vpop.f32.mrf.mxu1  ;;  %3644 = vmatprep.mubr.f32.mxu0 %v5969_v59 }
 0x6d2   :  { %v5024_v60 = vpop.f32.mrf.mxu1 }
 0x6d4   :  { %v3348_v21 = vpop.f32.mrf.mxu1 }
 0x6d6   :  { %v5027_v33 = vpop.f32.mrf.mxu1 }
 0x6d8   :  { %v3358_v54 = vpop.f32.mrf.mxu1 }
 0x6da   :  { %v5030_v42 = vpop.f32.mrf.mxu1 }
 0x6dc   :  { %v3368_v38 = vpop.f32.mrf.mxu1 }
 0x6de   :  { %v5033_v17 = vpop.f32.mrf.mxu1 }
 0x767   :  { %v4980_v13 = vpop.f32.mrf.mxu0 }
 0x768   :  { %v3354_v18 = vadd.f32 %v5024_v60, %v4980_v13 }
 0x769   :  { %v3243_v32 = vpop.f32.mrf.mxu0 }
 0x76a   :  { %v3395_v24 = vadd.f32 %v4509_v3, %v3354_v18  ;;  %v3349_v35 = vadd.f32 %v3348_v21, %v3243_v32 }
 0x76b   :  { %v4983_v22 = vpop.f32.mrf.mxu0 }
 0x76c   :  { %v3394_v49 = vadd.f32 %v4509_v3, %v3349_v35  ;;  %v3364_v30 = vadd.f32 %v5027_v33, %v4983_v22  ;;  %v3403_v31 = vadd.f32 %v3395_v24, %v5352_v34 }
 0x76d   :  { %v3253_v39 = vpop.f32.mrf.mxu0 }
 0x76e   :  { %v3397_v16 = vadd.f32 %v4509_v3, %v3364_v30  ;;  %v3359_v48 = vadd.f32 %v3358_v54, %v3253_v39  ;;  %3414 = vadd.xlane.f32.xlu1 %v3403_v31  ;;  %v3402_v56 = vadd.f32 %v3394_v49, %v5346_v29  ;;  %v3378_v29 = vpop.f32.mrf.mxu1 }
 0x76f   :  { %v4986_v36 = vpop.f32.mrf.mxu0 }
 0x770   :  { %v3396_v47 = vadd.f32 %v4509_v3, %v3359_v48  ;;  %v3374_v55 = vadd.f32 %v5030_v42, %v4986_v36  ;;  %3412 = vadd.xlane.f32.xlu0 %v3402_v56  ;;  %v3405_v1 = vadd.f32 %v3397_v16, %v5365_v46 }
 0x771   :  { %v3263_v12 = vpop.f32.mrf.mxu0 }
 0x772   :  { %v3399_v63 = vadd.f32 %v4509_v3, %v3374_v55  ;;  %v3369_v8 = vadd.f32 %v3368_v38, %v3263_v12  ;;  %3418 = vadd.xlane.f32.xlu1 %v3405_v1  ;;  %v3404_v34 = vadd.f32 %v3396_v47, %v5359_v40 }
 0x773   :  { %v4989_v27 = vpop.f32.mrf.mxu0 }
 0x774   :  { %v3398_v0 = vadd.f32 %v4509_v3, %v3369_v8  ;;  %v3384_v23 = vadd.f32 %v5033_v17, %v4989_v27  ;;  %3416 = vadd.xlane.f32.xlu0 %v3404_v34  ;;  %v3407_v4 = vadd.f32 %v3399_v63, %v5379_v58  ;;  %v3564_v58 = vld [vmem:[#allocation2 + $0x7b8] sm:$0xff] }
 0x775   :  { %v3273_v37 = vpop.f32.mrf.mxu0  ;;  %3583 = vmatpush1.msra.mxu0 %v3564_v58  ;;  %v3547_v58 = vld [vmem:[#allocation2 + $0x2f8] sm:$0xff] }
 0x776   :  { %v3401_v15 = vadd.f32 %v4509_v3, %v3384_v23  ;;  %v3379_v50 = vadd.f32 %v3378_v29, %v3273_v37  ;;  %3422 = vadd.xlane.f32.xlu1 %v3407_v4  ;;  %v3406_v46 = vadd.f32 %v3398_v0, %v5372_v52  ;;  %3584 = vmatprep.subr.mxu0 %v3563_v43  ;;  %v5971_v52 = vlaneseq  ;;  %v3561_v0 = vld [vmem:[#allocation2 + $0x6b0] sm:$0xff]  ;;  %v3559_v29 = vld [vmem:[#allocation2 + $0x628] sm:$0xff]  ;;  %v3558_v37 = vld [vmem:[#allocation2 + $0x620] sm:$0xff] }
 0x777   :  { %3585 = vmatpush1.msra.mxu0 %v3562_v19  ;;  %v3546_v43 = vld [vmem:[#allocation2 + $0x2f0] sm:$0xff] }
 0x778   :  { %v3400_v57 = vadd.f32 %v4509_v3, %v3379_v50  ;;  %3420 = vadd.xlane.f32.xlu0 %v3406_v46  ;;  %v3409_v62 = vadd.f32 %v3401_v15, %v5393_v5  ;;  %v57_v41 = vand.u32 127, %v5971_v52  ;;  %3586 = vmatprep.subr.mxu0 %v3561_v0  ;;  %v3557_v15 = vld [vmem:[#allocation2 + $0x5a0] sm:$0xff]  ;;  %v3556_v50 = vld [vmem:[#allocation2 + $0x598] sm:$0xff]  ;;  %v3545_v19 = vld [vmem:[#allocation2 + $0x270] sm:$0xff] }
 0x779   :  { %v3544_v52 = vld [vmem:[#allocation2 + $0x268] sm:$0xff] }
 0x77a   :  { %3426 = vadd.xlane.f32.xlu1 %v3409_v62  ;;  %v3408_v40 = vadd.f32 %v3400_v57, %v5970_v51  ;;  %vm58_vm2 = vcmp.lt.s32.totalorder %v57_v41, 80  ;;  %v3554_v57 = vld [vmem:[#allocation2 + $0x510] sm:$0xff]  ;;  %v3552_v51 = vld [vmem:[#allocation2 + $0x488] sm:$0xff] }
 0x77b   :  { %v5754_v26 = vsel %vm58_vm2, 1.0, %v5969_v59  ;;  %v3543_v41 = vld [vmem:[#allocation2 + $0x1e8] sm:$0xff] }
 0x77c   :  { %3424 = vadd.xlane.f32.xlu0 %v3408_v40 }
 0x7f7   :  { %v3415_v5 = vpop.xlane.xlu1 %3414 }
 0x7f8   :  { %v3429_v9 = vmul.f32 0.0125, %v3415_v5  ;;  %v3542_v5 = vld [vmem:[#allocation2 + $0x1e0] sm:$0xff] }
 0x7f9   :  { %v3413_v25 = vpop.xlane.xlu0 %3412 }
 0x7fa   :  { %v3437_v14 = vsub.f32 %v3403_v31, %v3429_v9  ;;  %v3428_v7 = vmul.f32 0.0125, %v3413_v25  ;;  %v3541_v9 = vld [vmem:[#allocation2 + $0x160] sm:$0xff]  ;;  %v3540_v25 = vld [vmem:[#allocation2 + $0x158] sm:$0xff] }
 0x7fb   :  { %v3419_v45 = vpop.xlane.xlu1 %3418 }
 0x7fc   :  { %v3436_v20 = vsub.f32 %v3402_v56, %v3428_v7  ;;  %v3431_v10 = vmul.f32 0.0125, %v3419_v45  ;;  %v5757_v53 = vmul.f32 %v5754_v26, %v3437_v14  ;;  %v3539_v14 = vld [vmem:[#allocation2 + $0xd8] sm:$0xff]  ;;  %v3538_v7 = vld [vmem:[#allocation2 + $0xd0] sm:$0xff] }
 0x7fd   :  { %v3417_v60 = vpop.xlane.xlu0 %3416  ;;  %v3537_v45 = vld [vmem:[#allocation2 + $0x50] sm:$0xff] }
 0x7fe   :  { %v3439_v21 = vsub.f32 %v3405_v1, %v3431_v10  ;;  %v3430_v33 = vmul.f32 0.0125, %v3417_v60  ;;  %v3453_v54 = vmul.f32 %v5757_v53, %v5757_v53  ;;  %v5762_v13 = vmul.f32 %v5754_v26, %v3436_v20  ;;  %v3536_v20 = vld [vmem:[#allocation2 + $0x48] sm:$0xff]  ;;  %v3740_v10 = vld [vmem:[#allocation4 + $0xf8] sm:$0xff] }
 0x7ff   :  { %v3423_v3 = vpop.xlane.xlu1 %3422  ;;  %v3724_v60 = vld [vmem:[#allocation4 + $0x78] sm:$0xff]  ;;  %4652 = vmatprep.subr.mxu1 %v3740_v10  ;;  %v4510_v10 = vld [vmem:[#allocation6 + $0x8] ss:$0 sm:$0xff] }
 0x800   :  { %v3438_v18 = vsub.f32 %v3404_v34, %v3430_v33  ;;  %v3433_v42 = vmul.f32 0.0125, %v3423_v3  ;;  %3462 = vadd.xlane.f32.xlu1 %v3453_v54  ;;  %v3452_v32 = vmul.f32 %v5762_v13, %v5762_v13  ;;  %v5767_v24 = vmul.f32 %v5754_v26, %v3439_v21  ;;  %v3739_v21 = vld [vmem:[#allocation4 + $0xf0] sm:$0xff]  ;;  %4653 = vmatpush3.msra.mxu1 %v3724_v60  ;;  %v3738_v54 = vld [vmem:[#allocation4 + $0xe8] sm:$0xff] }
 0x801   :  { %v3421_v35 = vpop.xlane.xlu0 %3420  ;;  %v3723_v33 = vld [vmem:[#allocation4 + $0x70] sm:$0xff]  ;;  %4654 = vmatprep.subr.mxu1 %v3739_v21  ;;  %v3722_v3 = vld [vmem:[#allocation4 + $0x68] sm:$0xff] }
 0x802   :  { %v3441_v22 = vsub.f32 %v3407_v4, %v3433_v42  ;;  %v3432_v49 = vmul.f32 0.0125, %v3421_v35  ;;  %3460 = vadd.xlane.f32.xlu0 %v3452_v32  ;;  %v3455_v30 = vmul.f32 %v5767_v24, %v5767_v24  ;;  %v5772_v31 = vmul.f32 %v5754_v26, %v3438_v18  ;;  %v3560_v4 = vld [vmem:[#allocation2 + $0x6a8] sm:$0xff]  ;;  %4655 = vmatpush3.msra.mxu1 %v3723_v33  ;;  %v3737_v18 = vld [vmem:[#allocation4 + $0xe0] sm:$0xff]  ;;  %v3736_v32 = vld [vmem:[#allocation4 + $0xd8] sm:$0xff] }
 0x803   :  { %v3427_v38 = vpop.xlane.xlu1 %3426  ;;  %3587 = vmatpush1.msra.mxu0 %v3560_v4  ;;  %4656 = vmatprep.subr.mxu1 %v3738_v54  ;;  %v3721_v42 = vld [vmem:[#allocation4 + $0x60] sm:$0xff]  ;;  %v3720_v35 = vld [vmem:[#allocation4 + $0x58] sm:$0xff]  ;;  %v4511_v54 = vld [vmem:[#allocation6 + $0x9] ss:$0 sm:$0xff] }
 0x804   :  { %v3440_v39 = vsub.f32 %v3406_v46, %v3432_v49  ;;  %v3435_v16 = vmul.f32 0.0125, %v3427_v38  ;;  %3466 = vadd.xlane.f32.xlu1 %v3455_v30  ;;  %v3454_v48 = vmul.f32 %v5772_v31, %v5772_v31  ;;  %v5777_v56 = vmul.f32 %v5754_v26, %v3441_v22  ;;  %3588 = vmatprep.subr.mxu0 %v3559_v29  ;;  %v3555_v46 = vld [vmem:[#allocation2 + $0x518] sm:$0xff]  ;;  %v3735_v22 = vld [vmem:[#allocation4 + $0xd0] sm:$0xff]  ;;  %v3734_v30 = vld [vmem:[#allocation4 + $0xc8] sm:$0xff] }
 0x805   :  { %v3425_v36 = vpop.xlane.xlu0 %3424  ;;  %3589 = vmatpush1.msra.mxu0 %v3558_v37  ;;  %4657 = vmatpush3.msra.mxu1 %v3722_v3  ;;  %v3719_v49 = vld [vmem:[#allocation4 + $0x50] sm:$0xff]  ;;  %v3718_v38 = vld [vmem:[#allocation4 + $0x48] sm:$0xff] }
 0x806   :  { %v3443_v47 = vsub.f32 %v3409_v62, %v3435_v16  ;;  %v3434_v55 = vmul.f32 0.0125, %v3425_v36  ;;  %3464 = vadd.xlane.f32.xlu0 %v3454_v48  ;;  %v3457_v1 = vmul.f32 %v5777_v56, %v5777_v56  ;;  %v5782_v17 = vmul.f32 %v5754_v26, %v3440_v39  ;;  %3590 = vmatprep.subr.mxu0 %v3557_v15  ;;  %v3553_v62 = vld [vmem:[#allocation2 + $0x490] sm:$0xff]  ;;  %v3733_v39 = vld [vmem:[#allocation4 + $0xc0] sm:$0xff]  ;;  %v3732_v48 = vld [vmem:[#allocation4 + $0xb8] sm:$0xff] }
 0x807   :  { %3591 = vmatpush1.msra.mxu0 %v3556_v50  ;;  %4658 = vmatprep.subr.mxu1 %v3737_v18  ;;  %v3717_v16 = vld [vmem:[#allocation4 + $0x40] sm:$0xff]  ;;  %v3716_v36 = vld [vmem:[#allocation4 + $0x38] sm:$0xff] }
 0x808   :  { %v3442_v12 = vsub.f32 %v3408_v40, %v3434_v55  ;;  %3470 = vadd.xlane.f32.xlu1 %v3457_v1  ;;  %v3456_v63 = vmul.f32 %v5782_v17, %v5782_v17  ;;  %v5787_v8 = vmul.f32 %v5754_v26, %v3443_v47  ;;  %3592 = vmatprep.subr.mxu0 %v3555_v46  ;;  %v3551_v40 = vld [vmem:[#allocation2 + $0x408] sm:$0xff]  ;;  %v3731_v47 = vld [vmem:[#allocation4 + $0xb0] sm:$0xff] }
 0x809   :  { %3593 = vmatpush1.msra.mxu0 %v3554_v57  ;;  %4659 = vmatpush3.msra.mxu1 %v3721_v42  ;;  %v3715_v55 = vld [vmem:[#allocation4 + $0x30] sm:$0xff]  ;;  %v3730_v1 = vld [vmem:[#allocation4 + $0xa8] sm:$0xff] }
 0x80a   :  { %3468 = vadd.xlane.f32.xlu0 %v3456_v63  ;;  %v3459_v34 = vmul.f32 %v5787_v8, %v5787_v8  ;;  %v5792_v27 = vmul.f32 %v5754_v26, %v3442_v12  ;;  %3594 = vmatprep.subr.mxu0 %v3553_v62  ;;  %v3714_v12 = vld [vmem:[#allocation4 + $0x28] sm:$0xff]  ;;  %v3729_v63 = vld [vmem:[#allocation4 + $0xa0] sm:$0xff] }
 0x80b   :  { %3595 = vmatpush1.msra.mxu0 %v3552_v51  ;;  %4660 = vmatprep.subr.mxu1 %v3736_v32 }
 0x80c   :  { %3474 = vadd.xlane.f32.xlu1 %v3459_v34  ;;  %v3458_v23 = vmul.f32 %v5792_v27, %v5792_v27  ;;  %3596 = vmatprep.subr.mxu0 %v3551_v40  ;;  %v3713_v34 = vld [vmem:[#allocation4 + $0x20] sm:$0xff] }
 0x80d   :  { %3597 = vmatpush1.msra.mxu0 %v3550_v2  ;;  %4661 = vmatpush3.msra.mxu1 %v3720_v35 }
 0x80e   :  { %3472 = vadd.xlane.f32.xlu0 %v3458_v23  ;;  %3598 = vmatprep.subr.mxu0 %v3549_v44 }
 0x80f   :  { %3599 = vmatpush1.msra.mxu0 %v3548_v6  ;;  %4662 = vmatprep.subr.mxu1 %v3735_v22 }
 0x810   :  { %3600 = vmatprep.subr.mxu0 %v3547_v58  ;;  %4663 = vmatpush3.msra.mxu1 %v3719_v49 }
 0x811   :  { %3601 = vmatpush1.msra.mxu0 %v3546_v43  ;;  %4664 = vmatprep.subr.mxu1 %v3734_v30 }
 0x812   :  { %3602 = vmatprep.subr.mxu0 %v3545_v19  ;;  %4665 = vmatpush3.msra.mxu1 %v3718_v38 }
 0x813   :  { %3603 = vmatpush1.msra.mxu0 %v3544_v52  ;;  %4666 = vmatprep.subr.mxu1 %v3733_v39 }
 0x814   :  { %3604 = vmatprep.subr.mxu0 %v3543_v41  ;;  %4667 = vmatpush3.msra.mxu1 %v3717_v16 }
 0x815   :  { %3605 = vmatpush1.msra.mxu0 %v3542_v5  ;;  %4668 = vmatprep.subr.mxu1 %v3732_v48 }
 0x816   :  { %3606 = vmatprep.subr.mxu0 %v3541_v9  ;;  %4669 = vmatpush3.msra.mxu1 %v3716_v36 }
 0x817   :  { %3607 = vmatpush1.msra.mxu0 %v3540_v25  ;;  %4670 = vmatprep.subr.mxu1 %v3731_v47 }
 0x818   :  { %3608 = vmatprep.subr.mxu0 %v3539_v14  ;;  %4671 = vmatpush3.msra.mxu1 %v3715_v55 }
 0x819   :  { %3609 = vmatpush1.msra.mxu0 %v3538_v7  ;;  %4672 = vmatprep.subr.mxu1 %v3730_v1 }
 0x81a   :  { %3610 = vmatprep.subr.mxu0 %v3537_v45  ;;  %4673 = vmatpush3.msra.mxu1 %v3714_v12 }
 0x81b   :  { %3611 = vmatpush1.msra.mxu0 %v3536_v20  ;;  %4674 = vmatprep.subr.mxu1 %v3729_v63 }
 0x81c   :  { %5034 = vmatprep.subr.mxu0 %v5969_v59  ;;  %4675 = vmatpush3.msra.mxu1 %v3713_v34 }
 0x889   :  { %v3463_v0 = vpop.xlane.xlu1 %3462 }
 0x88a   :  { %v3477_v23 = vmul.f32 0.0125, %v3463_v0  ;;  %v3728_v0 = vld [vmem:[#allocation4 + $0x98] sm:$0xff] }
 0x88b   :  { %v3461_v4 = vpop.xlane.xlu0 %3460  ;;  %4676 = vmatprep.subr.mxu1 %v3728_v0 }
 0x88c   :  { %v3485_v29 = vadd.f32 1e-05, %v3477_v23  ;;  %v3476_v37 = vmul.f32 0.0125, %v3461_v4  ;;  %v3727_v23 = vld [vmem:[#allocation4 + $0x90] sm:$0xff] }
 0x88d   :  { %v3467_v15 = vpop.xlane.xlu1 %3466  ;;  %v3711_v4 = vld [vmem:[#allocation4 + $0x10] sm:$0xff] }
 0x88e   :  { %5177 = vrsqrt.f32 %v3485_v29  ;;  %v3484_v50 = vadd.f32 1e-05, %v3476_v37  ;;  %v3479_v46 = vmul.f32 0.0125, %v3467_v15  ;;  %v3726_v29 = vld [vmem:[#allocation4 + $0x88] sm:$0xff]  ;;  %v3725_v15 = vld [vmem:[#allocation4 + $0x80] sm:$0xff] }
 0x88f   :  { %v3465_v57 = vpop.xlane.xlu0 %3464  ;;  %v3710_v37 = vld [vmem:[#allocation4 + $0x8] sm:$0xff] }
 0x890   :  { %5179 = vrsqrt.f32 %v3484_v50  ;;  %v3478_v62 = vmul.f32 0.0125, %v3465_v57  ;;  %v3487_v51 = vadd.f32 1e-05, %v3479_v46  ;;  %v3709_v50 = vld [vmem:[#allocation4] sm:$0xff] }
 0x891   :  { %v3471_v2 = vpop.xlane.xlu1 %3470  ;;  %v3568_v46 = vld [vmem:[#allocation6 + $0xa] sm:$0x3]  ;;  %v5972_v57 = vld [vmem:[#allocation10_spill] sm:$0xff] }
 0x892   :  { %v3486_v40 = vadd.f32 1e-05, %v3478_v62  ;;  %v3481_v58 = vmul.f32 0.0125, %v3471_v2  ;;  %v3573_v62 = vrot.slane %v3568_v46, %v5972_v57 }
 0x893   :  { %v3469_v44 = vpop.xlane.xlu0 %3468 }
 0x894   :  { %5181 = vrsqrt.f32 %v3486_v40  ;;  %v3480_v6 = vmul.f32 0.0125, %v3469_v44  ;;  %v3489_v52 = vadd.f32 1e-05, %v3481_v58 }
 0x895   :  { %5183 = vrsqrt.f32 %v3487_v51  ;;  %v3475_v41 = vpop.xlane.xlu1 %3474  ;;  %v3577_v51 = vrot.slane %v3568_v46, %v5595_v28 }
 0x896   :  { %v3488_v43 = vadd.f32 1e-05, %v3480_v6  ;;  %v3483_v14 = vmul.f32 0.0125, %v3475_v41 }
 0x897   :  { %v3473_v19 = vpop.xlane.xlu0 %3472 }
 0x898   :  { %5185 = vrsqrt.f32 %v3488_v43  ;;  %v3482_v5 = vmul.f32 0.0125, %v3473_v19  ;;  %v3491_v33 = vadd.f32 1e-05, %v3483_v14 }
 0x899   :  { %5187 = vrsqrt.f32 %v3489_v52 }
 0x89a   :  { %v3490_v45 = vadd.f32 1e-05, %v3482_v5 }
 0x89b   :  { %v5178_v9 = vpop.eup %5177 }
 0x89c   :  { %v3501_v20 = vmul.f32 %v5178_v9, %v5757_v53  ;;  %5189 = vrsqrt.f32 %v3490_v45 }
 0x89d   :  { %v5180_v25 = vpop.eup %5179  ;;  %5191 = vrsqrt.f32 %v3491_v33 }
 0x89e   :  { %v3500_v7 = vmul.f32 %v5180_v25, %v5762_v13  ;;  %v3515_v18 = vmul.f32 %v4510_v10, %v3501_v20 }
 0x8a0   :  { %v3514_v60 = vmul.f32 %v4510_v10, %v3500_v7  ;;  %v5804_v13 = vadd.f32 %v4511_v54, %v3515_v18 }
 0x8a1   :  { %v5182_v21 = vpop.eup %5181 }
 0x8a2   :  { %v5799_v3 = vadd.f32 %v4511_v54, %v3514_v60  ;;  %v3502_v42 = vmul.f32 %v5182_v21, %v5772_v31  ;;  %v5184_v32 = vpop.eup %5183 }
 0x8a3   :  { %v3503_v35 = vmul.f32 %v5184_v32, %v5767_v24 }
 0x8a4   :  { %3645 = vmatmul.mubr.f32.vlgmr.msra.gmra.mxu0 %v5799_v3  ;;  %v3516_v53 = vmul.f32 %v4510_v10, %v3502_v42 }
 0x8a5   :  { %3650 = vmatprep.mubr.f32.mxu0 %v5969_v59  ;;  %v5186_v22 = vpop.eup %5185  ;;  %v3517_v30 = vmul.f32 %v4510_v10, %v3503_v35 }
 0x8a6   :  { %v5809_v49 = vadd.f32 %v4511_v54, %v3516_v53  ;;  %v3504_v31 = vmul.f32 %v5186_v22, %v5782_v17  ;;  %v5188_v38 = vpop.eup %5187 }
 0x8a7   :  { %v5814_v39 = vadd.f32 %v4511_v54, %v3517_v30  ;;  %v3505_v24 = vmul.f32 %v5188_v38, %v5777_v56 }
 0x8a8   :  { %3651 = vmatmul.mubr.f32.gmra.mxu0 %v5804_v13  ;;  %v3518_v16 = vmul.f32 %v4510_v10, %v3504_v31 }
 0x8a9   :  { %3656 = vmatprep.mubr.f32.mxu0 %v5969_v59  ;;  %v5190_v48 = vpop.eup %5189  ;;  %v3519_v47 = vmul.f32 %v4510_v10, %v3505_v24 }
 0x8aa   :  { %v5819_v36 = vadd.f32 %v4511_v54, %v3518_v16  ;;  %v3506_v17 = vmul.f32 %v5190_v48, %v5792_v27  ;;  %v5192_v55 = vpop.eup %5191 }
 0x8ab   :  { %v5824_v1 = vadd.f32 %v4511_v54, %v3519_v47  ;;  %v3507_v56 = vmul.f32 %v5192_v55, %v5787_v8  ;;  %v3712_v8 = vld [vmem:[#allocation4 + $0x18] sm:$0xff] }
 0x8ac   :  { %3657 = vmatmul.mubr.f32.gmra.mxu0 %v5809_v49  ;;  %v3520_v12 = vmul.f32 %v4510_v10, %v3506_v17  ;;  %4677 = vmatpush3.msra.mxu1 %v3712_v8 }
 0x8ad   :  { %3662 = vmatprep.mubr.f32.mxu0 %v5969_v59  ;;  %v3521_v34 = vmul.f32 %v4510_v10, %v3507_v56  ;;  %4678 = vmatprep.subr.mxu1 %v3727_v23 }
 0x8ae   :  { %v5829_v63 = vadd.f32 %v4511_v54, %v3520_v12  ;;  %4679 = vmatpush3.msra.mxu1 %v3711_v4 }
 0x8af   :  { %v5833_v27 = vadd.f32 %v4511_v54, %v3521_v34  ;;  %4680 = vmatprep.subr.mxu1 %v3726_v29 }
 0x8b0   :  { %3663 = vmatmul.mubr.f32.gmra.mxu0 %v5814_v39  ;;  %4681 = vmatpush3.msra.mxu1 %v3710_v37 }
 0x8b1   :  { %3668 = vmatprep.mubr.f32.mxu0 %v5969_v59  ;;  %4682 = vmatprep.subr.mxu1 %v3725_v15 }
 0x8b2   :  { %4683 = vmatpush3.msra.mxu1 %v3709_v50 }
 0x8b4   :  { %3669 = vmatmul.mubr.f32.gmra.mxu0 %v5819_v36 }
 0x8b5   :  { %3674 = vmatprep.mubr.f32.mxu0 %v5969_v59 }
 0x8b8   :  { %3675 = vmatmul.mubr.f32.gmra.mxu0 %v5824_v1 }
 0x8b9   :  { %3680 = vmatprep.mubr.f32.mxu0 %v5969_v59 }
 0x8bc   :  { %3681 = vmatmul.mubr.f32.gmra.mxu0 %v5829_v63 }
 0x8bd   :  { %3686 = vmatprep.mubr.f32.mxu0 %v5969_v59 }
 0x8c0   :  { %3687 = vmatmul.mubr.f32.gmra.mxu0 %v5833_v27 }
 0x8c1   :  { %5066 = vmatprep.mubr.msk.f32.mxu0 %vm5281_vm0, %v5969_v59 }
 0x964   :  { %v3646_v40 = vpop.f32.mrf.mxu0 }
 0x965   :  { %v3647_v2 = vadd.f32 %v3646_v40, %v3573_v62 }
 0x966   :  { %v3648_v44 = vpop.f32.mrf.mxu0 }
 0x967   :  { %v3649_v6 = vadd.f32 %v3648_v44, %v3577_v51  ;;  %v3693_v19 = vmax.f32 %v3647_v2, 0.0  ;;  %v4512_v2 = vld [vmem:[#allocation6 + $0xc] ss:$0 sm:$0xff] }
 0x968   :  { %v3652_v58 = vpop.f32.mrf.mxu0 }
 0x969   :  { %v3694_v43 = vmax.f32 %v3649_v6, 0.0  ;;  %v3653_v52 = vadd.f32 %v3652_v58, %v3573_v62 }
 0x96a   :  { %v3654_v41 = vpop.f32.mrf.mxu0 }
 0x96b   :  { %v3655_v5 = vadd.f32 %v3654_v41, %v3577_v51  ;;  %3812 = vmatprep.mubr.f32.mxu1 %v3694_v43  ;;  %v3695_v14 = vmax.f32 %v3653_v52, 0.0 }
 0x96c   :  { %v3658_v9 = vpop.f32.mrf.mxu0  ;;  %3813 = vmatmul.mubr.f32.vlgmr.msra.gmra.mxu1 %v3693_v19 }
 0x96d   :  { %v3696_v25 = vmax.f32 %v3655_v5, 0.0  ;;  %v3659_v7 = vadd.f32 %v3658_v9, %v3573_v62 }
 0x96e   :  { %v3660_v45 = vpop.f32.mrf.mxu0 }
 0x96f   :  { %v3661_v20 = vadd.f32 %v3660_v45, %v3577_v51  ;;  %3817 = vmatprep.mubr.f32.mxu1 %v3696_v25  ;;  %v3697_v21 = vmax.f32 %v3659_v7, 0.0 }
 0x970   :  { %v3664_v10 = vpop.f32.mrf.mxu0  ;;  %3818 = vmatmul.mubr.f32.gmra.mxu1 %v3695_v14 }
 0x971   :  { %v3698_v60 = vmax.f32 %v3661_v20, 0.0  ;;  %v3665_v33 = vadd.f32 %v3664_v10, %v3573_v62 }
 0x972   :  { %v3666_v54 = vpop.f32.mrf.mxu0 }
 0x973   :  { %v3667_v18 = vadd.f32 %v3666_v54, %v3577_v51  ;;  %3822 = vmatprep.mubr.f32.mxu1 %v3698_v60  ;;  %v3699_v53 = vmax.f32 %v3665_v33, 0.0 }
 0x974   :  { %v3670_v42 = vpop.f32.mrf.mxu0  ;;  %3823 = vmatmul.mubr.f32.gmra.mxu1 %v3697_v21 }
 0x975   :  { %v3700_v32 = vmax.f32 %v3667_v18, 0.0  ;;  %v3671_v35 = vadd.f32 %v3670_v42, %v3573_v62 }
 0x976   :  { %v3672_v22 = vpop.f32.mrf.mxu0 }
 0x977   :  { %v3673_v30 = vadd.f32 %v3672_v22, %v3577_v51  ;;  %3827 = vmatprep.mubr.f32.mxu1 %v3700_v32  ;;  %v3701_v16 = vmax.f32 %v3671_v35, 0.0 }
 0x978   :  { %v3676_v31 = vpop.f32.mrf.mxu0  ;;  %3828 = vmatmul.mubr.f32.gmra.mxu1 %v3699_v53 }
 0x979   :  { %v3702_v38 = vmax.f32 %v3673_v30, 0.0  ;;  %v3677_v24 = vadd.f32 %v3676_v31, %v3573_v62 }
 0x97a   :  { %v3678_v48 = vpop.f32.mrf.mxu0 }
 0x97b   :  { %v3679_v47 = vadd.f32 %v3678_v48, %v3577_v51  ;;  %3832 = vmatprep.mubr.f32.mxu1 %v3702_v38  ;;  %v3703_v12 = vmax.f32 %v3677_v24, 0.0 }
 0x97c   :  { %v3682_v17 = vpop.f32.mrf.mxu0  ;;  %3833 = vmatmul.mubr.f32.gmra.mxu1 %v3701_v16 }
 0x97d   :  { %v3704_v55 = vmax.f32 %v3679_v47, 0.0  ;;  %v3683_v56 = vadd.f32 %v3682_v17, %v3573_v62 }
 0x97e   :  { %v3684_v34 = vpop.f32.mrf.mxu0 }
 0x97f   :  { %v3685_v0 = vadd.f32 %v3684_v34, %v3577_v51  ;;  %3837 = vmatprep.mubr.f32.mxu1 %v3704_v55  ;;  %v3705_v4 = vmax.f32 %v3683_v56, 0.0 }
 0x980   :  { %v3688_v8 = vpop.f32.mrf.mxu0  ;;  %3838 = vmatmul.mubr.f32.gmra.mxu1 %v3703_v12 }
 0x981   :  { %v3706_v23 = vmax.f32 %v3685_v0, 0.0  ;;  %v3689_v29 = vadd.f32 %v3688_v8, %v3573_v62 }
 0x982   :  { %v3690_v37 = vpop.f32.mrf.mxu0 }
 0x983   :  { %v3691_v15 = vadd.f32 %v3690_v37, %v3577_v51  ;;  %3842 = vmatprep.mubr.f32.mxu1 %v3706_v23  ;;  %v3707_v46 = vmax.f32 %v3689_v29, 0.0 }
 0x984   :  { %3843 = vmatmul.mubr.f32.gmra.mxu1 %v3705_v4 }
 0x985   :  { %v3708_v50 = vmax.f32 %v3691_v15, 0.0 }
 0x987   :  { %3847 = vmatprep.mubr.f32.mxu1 %v3708_v50 }
 0x988   :  { %3848 = vmatmul.mubr.f32.gmra.mxu1 %v3707_v46 }
 0x989   :  { %4332 = vmatprep.mubr.f32.mxu1 %v5969_v59 }
 0xa2c   :  { %v4684_v40 = vpop.f32.mrf.mxu1 }
 0xa2e   :  { %v4685_v44 = vpop.f32.mrf.mxu1 }
 0xa2f   :  { %v4686_v6 = vadd.f32 %v4685_v44, %v4684_v40 }
 0xa30   :  { %v4687_v58 = vpop.f32.mrf.mxu1 }
 0xa31   :  { %v3815_v43 = vadd.f32 %v4686_v6, %v4512_v2 }
 0xa32   :  { %v4688_v19 = vpop.f32.mrf.mxu1 }
 0xa33   :  { %v4689_v52 = vadd.f32 %v4688_v19, %v4687_v58  ;;  %v3853_v62 = vadd.f32 %v3815_v43, %v5799_v3 }
 0xa34   :  { %v4690_v41 = vpop.f32.mrf.mxu1 }
 0xa35   :  { %v3820_v51 = vadd.f32 %v4689_v52, %v4512_v2  ;;  %3863 = vadd.xlane.f32.xlu0 %v3853_v62 }
 0xa36   :  { %v4691_v5 = vpop.f32.mrf.mxu1 }
 0xa37   :  { %v4692_v9 = vadd.f32 %v4691_v5, %v4690_v41  ;;  %v3854_v25 = vadd.f32 %v3820_v51, %v5804_v13 }
 0xa38   :  { %v4693_v14 = vpop.f32.mrf.mxu1 }
 0xa39   :  { %v3825_v7 = vadd.f32 %v4692_v9, %v4512_v2  ;;  %3865 = vadd.xlane.f32.xlu1 %v3854_v25 }
 0xa3a   :  { %v4694_v45 = vpop.f32.mrf.mxu1 }
 0xa3b   :  { %v4695_v20 = vadd.f32 %v4694_v45, %v4693_v14  ;;  %v3855_v10 = vadd.f32 %v3825_v7, %v5809_v49 }
 0xa3c   :  { %v4696_v60 = vpop.f32.mrf.mxu1 }
 0xa3d   :  { %v3830_v21 = vadd.f32 %v4695_v20, %v4512_v2  ;;  %3867 = vadd.xlane.f32.xlu0 %v3855_v10 }
 0xa3e   :  { %v4697_v33 = vpop.f32.mrf.mxu1 }
 0xa3f   :  { %v4698_v54 = vadd.f32 %v4697_v33, %v4696_v60  ;;  %v3856_v3 = vadd.f32 %v3830_v21, %v5814_v39 }
 0xa40   :  { %v4699_v18 = vpop.f32.mrf.mxu1 }
 0xa41   :  { %v3835_v42 = vadd.f32 %v4698_v54, %v4512_v2  ;;  %3869 = vadd.xlane.f32.xlu1 %v3856_v3 }
 0xa42   :  { %v4700_v32 = vpop.f32.mrf.mxu1 }
 0xa43   :  { %v4701_v53 = vadd.f32 %v4700_v32, %v4699_v18  ;;  %v3857_v13 = vadd.f32 %v3835_v42, %v5819_v36  ;;  %v4058_v18 = vld [vmem:[#allocation2 + $0x7c8] sm:$0xff]  ;;  %v4057_v42 = vld [vmem:[#allocation2 + $0x740] sm:$0xff]  ;;  %v4056_v32 = vld [vmem:[#allocation2 + $0x6b8] sm:$0xff] }
 0xa44   :  { %v4702_v35 = vpop.f32.mrf.mxu1 }
 0xa45   :  { %v3840_v22 = vadd.f32 %v4701_v53, %v4512_v2  ;;  %3871 = vadd.xlane.f32.xlu0 %v3857_v13  ;;  %v4054_v53 = vld [vmem:[#allocation2 + $0x5a8] sm:$0xff] }
 0xa46   :  { %v4703_v30 = vpop.f32.mrf.mxu1 }
 0xa47   :  { %v4704_v31 = vadd.f32 %v4703_v30, %v4702_v35  ;;  %v3858_v49 = vadd.f32 %v3840_v22, %v5824_v1  ;;  %v4052_v35 = vld [vmem:[#allocation2 + $0x498] sm:$0xff]  ;;  %v4051_v22 = vld [vmem:[#allocation2 + $0x410] sm:$0xff]  ;;  %v4050_v30 = vld [vmem:[#allocation2 + $0x388] sm:$0xff] }
 0xa48   :  { %v4705_v38 = vpop.f32.mrf.mxu1 }
 0xa49   :  { %v3845_v16 = vadd.f32 %v4704_v31, %v4512_v2  ;;  %3873 = vadd.xlane.f32.xlu1 %v3858_v49  ;;  %v4049_v31 = vld [vmem:[#allocation2 + $0x300] sm:$0xff] }
 0xa4a   :  { %v4706_v24 = vpop.f32.mrf.mxu1 }
 0xa4b   :  { %v4707_v48 = vadd.f32 %v4706_v24, %v4705_v38  ;;  %v3859_v39 = vadd.f32 %v3845_v16, %v5829_v63  ;;  %v4047_v38 = vld [vmem:[#allocation2 + $0x1f0] sm:$0xff]  ;;  %v4046_v16 = vld [vmem:[#allocation2 + $0x168] sm:$0xff]  ;;  %v4045_v24 = vld [vmem:[#allocation2 + $0xe0] sm:$0xff] }
 0xa4d   :  { %v3850_v47 = vadd.f32 %v4707_v48, %v4512_v2  ;;  %3875 = vadd.xlane.f32.xlu0 %v3859_v39  ;;  %v4044_v48 = vld [vmem:[#allocation2 + $0x58] sm:$0xff] }
 0xa4f   :  { %v3860_v17 = vadd.f32 %v3850_v47, %v5833_v27  ;;  %v4236_v47 = vld [vmem:[#allocation2 + $0x858] sm:$0xff] }
 0xa51   :  { %3877 = vadd.xlane.f32.xlu1 %v3860_v17 }
 0xabe   :  { %v3864_v36 = vpop.xlane.xlu0 %3863 }
 0xabf   :  { %v3879_v55 = vmul.f32 0.0125, %v3864_v36  ;;  %v4232_v36 = vld [vmem:[#allocation2 + $0x7d8] sm:$0xff] }
 0xac1   :  { %v3887_v12 = vsub.f32 %v3853_v62, %v3879_v55  ;;  %v4231_v55 = vld [vmem:[#allocation2 + $0x7d0] sm:$0xff] }
 0xac2   :  { %v3866_v56 = vpop.xlane.xlu1 %3865 }
 0xac3   :  { %v3880_v34 = vmul.f32 0.0125, %v3866_v56  ;;  %v5850_v0 = vmul.f32 %v5754_v26, %v3887_v12  ;;  %v4227_v12 = vld [vmem:[#allocation2 + $0x750] sm:$0xff]  ;;  %v4226_v56 = vld [vmem:[#allocation2 + $0x748] sm:$0xff] }
 0xac5   :  { %v3888_v1 = vsub.f32 %v3854_v25, %v3880_v34  ;;  %v3903_v8 = vmul.f32 %v5850_v0, %v5850_v0  ;;  %v4222_v34 = vld [vmem:[#allocation2 + $0x6c8] sm:$0xff] }
 0xac6   :  { %v3868_v23 = vpop.xlane.xlu0 %3867 }
 0xac7   :  { %v3881_v4 = vmul.f32 0.0125, %v3868_v23  ;;  %3911 = vadd.xlane.f32.xlu0 %v3903_v8  ;;  %v5855_v63 = vmul.f32 %v5754_v26, %v3888_v1  ;;  %v4221_v1 = vld [vmem:[#allocation2 + $0x6c0] sm:$0xff]  ;;  %v4216_v23 = vld [vmem:[#allocation2 + $0x638] sm:$0xff] }
 0xac8   :  { %v4217_v8 = vld [vmem:[#allocation2 + $0x640] sm:$0xff] }
 0xac9   :  { %v3889_v27 = vsub.f32 %v3855_v10, %v3881_v4  ;;  %v3904_v29 = vmul.f32 %v5855_v63, %v5855_v63  ;;  %v4212_v4 = vld [vmem:[#allocation2 + $0x5b8] sm:$0xff] }
 0xaca   :  { %v3870_v37 = vpop.xlane.xlu1 %3869 }
 0xacb   :  { %v3882_v15 = vmul.f32 0.0125, %v3870_v37  ;;  %3913 = vadd.xlane.f32.xlu1 %v3904_v29  ;;  %v5860_v50 = vmul.f32 %v5754_v26, %v3889_v27  ;;  %v4211_v27 = vld [vmem:[#allocation2 + $0x5b0] sm:$0xff]  ;;  %v4206_v37 = vld [vmem:[#allocation2 + $0x528] sm:$0xff] }
 0xacc   :  { %v4207_v29 = vld [vmem:[#allocation2 + $0x530] sm:$0xff] }
 0xacd   :  { %v3890_v46 = vsub.f32 %v3856_v3, %v3882_v15  ;;  %v3905_v40 = vmul.f32 %v5860_v50, %v5860_v50  ;;  %v4059_v3 = vld [vmem:[#allocation2 + $0x850] sm:$0xff]  ;;  %v4202_v15 = vld [vmem:[#allocation2 + $0x4a8] sm:$0xff] }
 0xace   :  { %v3872_v2 = vpop.xlane.xlu0 %3871  ;;  %5035 = vmatpush3.msra.mxu0 %v4059_v3 }
 0xacf   :  { %v3883_v44 = vmul.f32 0.0125, %v3872_v2  ;;  %3915 = vadd.xlane.f32.xlu0 %v3905_v40  ;;  %v5865_v6 = vmul.f32 %v5754_v26, %v3890_v46  ;;  %5036 = vmatprep.subr.mxu0 %v5969_v59  ;;  %v4201_v46 = vld [vmem:[#allocation2 + $0x4a0] sm:$0xff]  ;;  %v4196_v2 = vld [vmem:[#allocation2 + $0x418] sm:$0xff] }
 0xad0   :  { %5037 = vmatpush3.msra.mxu0 %v4058_v18  ;;  %v4197_v40 = vld [vmem:[#allocation2 + $0x420] sm:$0xff] }
 0xad1   :  { %v3891_v58 = vsub.f32 %v3857_v13, %v3883_v44  ;;  %v3906_v43 = vmul.f32 %v5865_v6, %v5865_v6  ;;  %5038 = vmatprep.subr.mxu0 %v5969_v59  ;;  %v4053_v13 = vld [vmem:[#allocation2 + $0x520] sm:$0xff]  ;;  %v4192_v44 = vld [vmem:[#allocation2 + $0x398] sm:$0xff] }
 0xad2   :  { %v3874_v19 = vpop.xlane.xlu1 %3873  ;;  %5039 = vmatpush3.msra.mxu0 %v4057_v42 }
 0xad3   :  { %v3884_v52 = vmul.f32 0.0125, %v3874_v19  ;;  %3917 = vadd.xlane.f32.xlu1 %v3906_v43  ;;  %v5870_v62 = vmul.f32 %v5754_v26, %v3891_v58  ;;  %5040 = vmatprep.subr.mxu0 %v5969_v59  ;;  %v4191_v58 = vld [vmem:[#allocation2 + $0x390] sm:$0xff]  ;;  %v4186_v19 = vld [vmem:[#allocation2 + $0x308] sm:$0xff] }
 0xad4   :  { %5041 = vmatpush3.msra.mxu0 %v4056_v32  ;;  %v4187_v43 = vld [vmem:[#allocation2 + $0x310] sm:$0xff] }
 0xad5   :  { %v3892_v41 = vsub.f32 %v3858_v49, %v3884_v52  ;;  %v3907_v51 = vmul.f32 %v5870_v62, %v5870_v62  ;;  %5042 = vmatprep.subr.mxu0 %v5969_v59  ;;  %v4048_v49 = vld [vmem:[#allocation2 + $0x278] sm:$0xff]  ;;  %v4182_v52 = vld [vmem:[#allocation2 + $0x288] sm:$0xff] }
 0xad6   :  { %v3876_v5 = vpop.xlane.xlu0 %3875 }
 0xad7   :  { %v3885_v9 = vmul.f32 0.0125, %v3876_v5  ;;  %3919 = vadd.xlane.f32.xlu0 %v3907_v51  ;;  %v5875_v25 = vmul.f32 %v5754_v26, %v3892_v41  ;;  %v4181_v41 = vld [vmem:[#allocation2 + $0x280] sm:$0xff]  ;;  %v4176_v5 = vld [vmem:[#allocation2 + $0x1f8] sm:$0xff] }
 0xad8   :  { %v4177_v51 = vld [vmem:[#allocation2 + $0x200] sm:$0xff] }
 0xad9   :  { %v3893_v14 = vsub.f32 %v3859_v39, %v3885_v9  ;;  %v3908_v7 = vmul.f32 %v5875_v25, %v5875_v25  ;;  %v4237_v39 = vld [vmem:[#allocation2 + $0x860] sm:$0xff]  ;;  %v4172_v9 = vld [vmem:[#allocation2 + $0x178] sm:$0xff] }
 0xada   :  { %v3878_v45 = vpop.xlane.xlu1 %3877  ;;  %4268 = vmatprep.subr.mxu1 %v4237_v39 }
 0xadb   :  { %v3886_v20 = vmul.f32 0.0125, %v3878_v45  ;;  %3921 = vadd.xlane.f32.xlu1 %v3908_v7  ;;  %v5880_v10 = vmul.f32 %v5754_v26, %v3893_v14  ;;  %4269 = vmatpush1.msra.mxu1 %v4236_v47  ;;  %v4171_v14 = vld [vmem:[#allocation2 + $0x170] sm:$0xff]  ;;  %v4513_v47 = vld [vmem:[#allocation6 + $0xd] ss:$0 sm:$0xff] }
 0xadc   :  { %4270 = vmatprep.subr.mxu1 %v4232_v36 }
 0xadd   :  { %v3894_v60 = vsub.f32 %v3860_v17, %v3886_v20  ;;  %v3909_v21 = vmul.f32 %v5880_v10, %v5880_v10  ;;  %v4239_v17 = vld [vmem:[#allocation2 + $0x870] sm:$0xff]  ;;  %4271 = vmatpush1.msra.mxu1 %v4231_v55 }
 0xade   :  { %4272 = vmatprep.subr.mxu1 %v4227_v12 }
 0xadf   :  { %3923 = vadd.xlane.f32.xlu0 %v3909_v21  ;;  %v5885_v33 = vmul.f32 %v5754_v26, %v3894_v60  ;;  %v4055_v26 = vld [vmem:[#allocation2 + $0x630] sm:$0xff]  ;;  %4273 = vmatpush1.msra.mxu1 %v4226_v56 }
 0xae0   :  { %5043 = vmatpush3.msra.mxu0 %v4055_v26  ;;  %4274 = vmatprep.subr.mxu1 %v4222_v34 }
 0xae1   :  { %v3910_v54 = vmul.f32 %v5885_v33, %v5885_v33  ;;  %5044 = vmatprep.subr.mxu0 %v5969_v59  ;;  %4275 = vmatpush1.msra.mxu1 %v4221_v1 }
 0xae2   :  { %5045 = vmatpush3.msra.mxu0 %v4054_v53  ;;  %4276 = vmatprep.subr.mxu1 %v4217_v8  ;;  %v4514_v8 = vld [vmem:[#allocation6 + $0xe] ss:$0 sm:$0xff] }
 0xae3   :  { %3925 = vadd.xlane.f32.xlu1 %v3910_v54  ;;  %5046 = vmatprep.subr.mxu0 %v5969_v59 }
 0xae4   :  { %5047 = vmatpush3.msra.mxu0 %v4053_v13  ;;  %4277 = vmatpush1.msra.mxu1 %v4216_v23 }
 0xae5   :  { %5048 = vmatprep.subr.mxu0 %v5969_v59  ;;  %4278 = vmatprep.subr.mxu1 %v4212_v4 }
 0xae6   :  { %5049 = vmatpush3.msra.mxu0 %v4052_v35  ;;  %4279 = vmatpush1.msra.mxu1 %v4211_v27 }
 0xae7   :  { %5050 = vmatprep.subr.mxu0 %v5969_v59  ;;  %4280 = vmatprep.subr.mxu1 %v4207_v29 }
 0xae8   :  { %5051 = vmatpush3.msra.mxu0 %v4051_v22  ;;  %4281 = vmatpush1.msra.mxu1 %v4206_v37 }
 0xae9   :  { %5052 = vmatprep.subr.mxu0 %v5969_v59  ;;  %4282 = vmatprep.subr.mxu1 %v4202_v15 }
 0xaea   :  { %5053 = vmatpush3.msra.mxu0 %v4050_v30  ;;  %4283 = vmatpush1.msra.mxu1 %v4201_v46 }
 0xaeb   :  { %5054 = vmatprep.subr.mxu0 %v5969_v59  ;;  %4284 = vmatprep.subr.mxu1 %v4197_v40 }
 0xaec   :  { %5055 = vmatpush3.msra.mxu0 %v4049_v31  ;;  %4285 = vmatpush1.msra.mxu1 %v4196_v2 }
 0xaed   :  { %5056 = vmatprep.subr.mxu0 %v5969_v59  ;;  %4286 = vmatprep.subr.mxu1 %v4192_v44 }
 0xaee   :  { %5057 = vmatpush3.msra.mxu0 %v4048_v49  ;;  %4287 = vmatpush1.msra.mxu1 %v4191_v58 }
 0xaef   :  { %5058 = vmatprep.subr.mxu0 %v5969_v59  ;;  %4288 = vmatprep.subr.mxu1 %v4187_v43 }
 0xaf0   :  { %5059 = vmatpush3.msra.mxu0 %v4047_v38  ;;  %4289 = vmatpush1.msra.mxu1 %v4186_v19 }
 0xaf1   :  { %5060 = vmatprep.subr.mxu0 %v5969_v59  ;;  %4290 = vmatprep.subr.mxu1 %v4182_v52 }
 0xaf2   :  { %5061 = vmatpush3.msra.mxu0 %v4046_v16  ;;  %4291 = vmatpush1.msra.mxu1 %v4181_v41 }
 0xaf3   :  { %5062 = vmatprep.subr.mxu0 %v5969_v59  ;;  %4292 = vmatprep.subr.mxu1 %v4177_v51 }
 0xaf4   :  { %5063 = vmatpush3.msra.mxu0 %v4045_v24  ;;  %4293 = vmatpush1.msra.mxu1 %v4176_v5 }
 0xaf5   :  { %5064 = vmatprep.subr.mxu0 %v5969_v59  ;;  %4294 = vmatprep.subr.mxu1 %v4172_v9 }
 0xaf6   :  { %5065 = vmatpush3.msra.mxu0 %v4044_v48  ;;  %4295 = vmatpush1.msra.mxu1 %v4171_v14 }
 0xaf7   :  { %4339 = vmatprep.subr.mxu0 %v4239_v17 }
 0xb50   :  { %v3912_v7 = vpop.xlane.xlu0 %3911 }
 0xb51   :  { %v3927_v45 = vmul.f32 0.0125, %v3912_v7 }
 0xb53   :  { %v3935_v20 = vadd.f32 1e-05, %v3927_v45 }
 0xb54   :  { %v3914_v60 = vpop.xlane.xlu1 %3913 }
 0xb55   :  { %v3928_v21 = vmul.f32 0.0125, %v3914_v60  ;;  %5193 = vrsqrt.f32 %v3935_v20 }
 0xb57   :  { %v3936_v54 = vadd.f32 1e-05, %v3928_v21 }
 0xb58   :  { %v3916_v3 = vpop.xlane.xlu0 %3915 }
 0xb59   :  { %5195 = vrsqrt.f32 %v3936_v54  ;;  %v3929_v18 = vmul.f32 0.0125, %v3916_v3 }
 0xb5b   :  { %v3937_v42 = vadd.f32 1e-05, %v3929_v18 }
 0xb5c   :  { %v3918_v32 = vpop.xlane.xlu1 %3917 }
 0xb5d   :  { %5197 = vrsqrt.f32 %v3937_v42  ;;  %v3930_v26 = vmul.f32 0.0125, %v3918_v32 }
 0xb5f   :  { %v3938_v53 = vadd.f32 1e-05, %v3930_v26 }
 0xb60   :  { %v3920_v13 = vpop.xlane.xlu0 %3919 }
 0xb61   :  { %5199 = vrsqrt.f32 %v3938_v53  ;;  %v3931_v35 = vmul.f32 0.0125, %v3920_v13 }
 0xb62   :  { %v5194_v31 = vpop.eup %5193 }
 0xb63   :  { %v3939_v22 = vadd.f32 1e-05, %v3931_v35  ;;  %v3951_v48 = vmul.f32 %v5194_v31, %v5850_v0 }
 0xb64   :  { %v3922_v30 = vpop.xlane.xlu1 %3921 }
 0xb65   :  { %5201 = vrsqrt.f32 %v3939_v22  ;;  %v3932_v49 = vmul.f32 0.0125, %v3922_v30  ;;  %v3965_v34 = vmul.f32 %v4513_v47, %v3951_v48 }
 0xb66   :  { %v5196_v38 = vpop.eup %5195 }
 0xb67   :  { %v3952_v16 = vmul.f32 %v5196_v38, %v5855_v63  ;;  %v3940_v24 = vadd.f32 1e-05, %v3932_v49  ;;  %v3979_v37 = vadd.f32 %v4514_v8, %v3965_v34 }
 0xb68   :  { %v3924_v39 = vpop.xlane.xlu0 %3923 }
 0xb69   :  { %5203 = vrsqrt.f32 %v3940_v24  ;;  %v3933_v17 = vmul.f32 0.0125, %v3924_v39  ;;  %v3966_v55 = vmul.f32 %v4513_v47, %v3952_v16  ;;  %v3987_v43 = vrot.slane %v3979_v37, 4 }
 0xb6a   :  { %v5198_v36 = vpop.eup %5197 }
 0xb6b   :  { %v3953_v12 = vmul.f32 %v5198_v36, %v5860_v50  ;;  %v3941_v56 = vadd.f32 1e-05, %v3933_v17  ;;  %v3980_v27 = vadd.f32 %v4514_v8, %v3966_v55 }
 0xb6c   :  { %v3926_v1 = vpop.xlane.xlu1 %3925 }
 0xb6d   :  { %v3967_v23 = vmul.f32 %v4513_v47, %v3953_v12  ;;  %5205 = vrsqrt.f32 %v3941_v56  ;;  %v3934_v63 = vmul.f32 0.0125, %v3926_v1  ;;  %v3993_v2 = vrot.slane %v3980_v27, 4 }
 0xb6e   :  { %v5200_v4 = vpop.eup %5199 }
 0xb6f   :  { %v3981_v29 = vadd.f32 %v4514_v8, %v3967_v23  ;;  %v3954_v0 = vmul.f32 %v5200_v4, %v5865_v6  ;;  %v3942_v15 = vadd.f32 1e-05, %v3934_v63  ;;  %v3994_v51 = vadd.f32 %v3993_v2, %v3980_v27 }
 0xb70   :  { %v3988_v6 = vadd.f32 %v3987_v43, %v3979_v37 }
 0xb71   :  { %v3968_v46 = vmul.f32 %v4513_v47, %v3954_v0  ;;  %5207 = vrsqrt.f32 %v3942_v15  ;;  %v3999_v44 = vrot.slane %v3981_v29, 4  ;;  %v3995_v21 = vrot.slane %v3994_v51, 2 }
 0xb72   :  { %v5202_v40 = vpop.eup %5201 }
 0xb73   :  { %v3982_v50 = vadd.f32 %v4514_v8, %v3968_v46  ;;  %v3955_v58 = vmul.f32 %v5202_v40, %v5870_v62  ;;  %v4000_v5 = vadd.f32 %v3999_v44, %v3981_v29  ;;  %v3989_v62 = vrot.slane %v3988_v6, 2 }
 0xb74   :  { %v3996_v13 = vadd.f32 %v3995_v21, %v3994_v51 }
 0xb75   :  { %v4005_v19 = vrot.slane %v3982_v50, 4  ;;  %v3969_v52 = vmul.f32 %v4513_v47, %v3955_v58  ;;  %v4001_v54 = vrot.slane %v4000_v5, 2  ;;  %v3990_v49 = vadd.f32 %v3989_v62, %v3988_v6  ;;  %v4234_v62 = vld [vmem:[#allocation2 + $0x7e8] sm:$0xff] }
 0xb76   :  { %v5204_v41 = vpop.eup %5203  ;;  %v3997_v17 = vrot.slane %v3996_v13, 1 }
 0xb77   :  { %v3983_v9 = vadd.f32 %v4514_v8, %v3969_v52  ;;  %v3956_v14 = vmul.f32 %v5204_v41, %v5875_v25  ;;  %v4006_v7 = vadd.f32 %v4005_v19, %v3982_v50  ;;  %v4002_v30 = vadd.f32 %v4001_v54, %v4000_v5 }
 0xb78   :  { %v3991_v56 = vrot.slane %v3990_v49, 1  ;;  %v3998_v27 = vadd.f32 %v3997_v17, %v3996_v13  ;;  %v4223_v13 = vld [vmem:[#allocation2 + $0x6d0] sm:$0xff]  ;;  %v4193_v17 = vld [vmem:[#allocation2 + $0x3a0] sm:$0xff] }
 0xb79   :  { %v4011_v45 = vrot.slane %v3983_v9, 4  ;;  %v3970_v20 = vmul.f32 %v4513_v47, %v3956_v14  ;;  %v4007_v42 = vrot.slane %v4006_v7, 2  ;;  %v4003_v36 = vrot.slane %v4002_v30, 1 }
 0xb7a   :  { %v5206_v60 = vpop.eup %5205  ;;  %v4037_v50 = vmul.f32 0.125, %v3998_v27  ;;  %v4166_v27 = vld [vmem:[#allocation2 + $0xe8] sm:$0xff] }
 0xb7b   :  { %v3984_v3 = vadd.f32 %v4514_v8, %v3970_v20  ;;  %v3957_v18 = vmul.f32 %v5206_v60, %v5880_v10  ;;  %v4012_v32 = vadd.f32 %v4011_v45, %v3983_v9  ;;  %v4008_v16 = vadd.f32 %v4007_v42, %v4006_v7  ;;  %v4233_v42 = vld [vmem:[#allocation2 + $0x7e0] sm:$0xff] }
 0xb7c   :  { %v4004_v0 = vadd.f32 %v4003_v36, %v4002_v30  ;;  %v4214_v30 = vld [vmem:[#allocation2 + $0x5c8] sm:$0xff]  ;;  %v4188_v36 = vld [vmem:[#allocation2 + $0x318] sm:$0xff] }
 0xb7d   :  { %v3971_v26 = vmul.f32 %v4513_v47, %v3957_v18  ;;  %v4017_v53 = vrot.slane %v3984_v3, 4  ;;  %v4013_v35 = vrot.slane %v4012_v32, 2  ;;  %v4009_v1 = vrot.slane %v4008_v16, 1 }
 0xb7e   :  { %v5208_v22 = vpop.eup %5207  ;;  %v4038_v43 = vmul.f32 0.125, %v4004_v0  ;;  %v4168_v0 = vld [vmem:[#allocation2 + $0xf8] sm:$0xff] }
 0xb7f   :  { %v3985_v25 = vadd.f32 %v4514_v8, %v3971_v26  ;;  %v4018_v31 = vadd.f32 %v4017_v53, %v3984_v3  ;;  %v3958_v38 = vmul.f32 %v5208_v22, %v5885_v33  ;;  %v4014_v24 = vadd.f32 %v4013_v35, %v4012_v32  ;;  %v4238_v3 = vld [vmem:[#allocation2 + $0x868] sm:$0xff]  ;;  %v4229_v32 = vld [vmem:[#allocation2 + $0x760] sm:$0xff]  ;;  %v4228_v26 = vld [vmem:[#allocation2 + $0x758] sm:$0xff] }
 0xb80   :  { %v3992_v33 = vadd.f32 %v3991_v56, %v3990_v49  ;;  %v4010_v15 = vadd.f32 %v4009_v1, %v4008_v16  ;;  %v4224_v53 = vld [vmem:[#allocation2 + $0x6d8] sm:$0xff]  ;;  %v4219_v35 = vld [vmem:[#allocation2 + $0x650] sm:$0xff]  ;;  %v4218_v22 = vld [vmem:[#allocation2 + $0x648] sm:$0xff] }
 0xb81   :  { %v4019_v48 = vrot.slane %v4018_v31, 2  ;;  %v4023_v39 = vrot.slane %v3985_v25, 4  ;;  %v3972_v10 = vmul.f32 %v4513_v47, %v3958_v38  ;;  %v4015_v23 = vrot.slane %v4014_v24, 1  ;;  %v4208_v49 = vld [vmem:[#allocation2 + $0x538] sm:$0xff]  ;;  %v4203_v16 = vld [vmem:[#allocation2 + $0x4b0] sm:$0xff]  ;;  %v4174_v1 = vld [vmem:[#allocation2 + $0x188] sm:$0xff] }
 0xb82   :  { %v4036_v19 = vmul.f32 0.125, %v3992_v33  ;;  %v4039_v52 = vmul.f32 0.125, %v4010_v15  ;;  %v4204_v38 = vld [vmem:[#allocation2 + $0x4b8] sm:$0xff]  ;;  %v4179_v56 = vld [vmem:[#allocation2 + $0x210] sm:$0xff] }
 0xb83   :  { %v4020_v55 = vadd.f32 %v4019_v48, %v4018_v31  ;;  %v4024_v12 = vadd.f32 %v4023_v39, %v3985_v25  ;;  %v3986_v34 = vadd.f32 %v4514_v8, %v3972_v10  ;;  %v4016_v40 = vadd.f32 %v4015_v23, %v4014_v24  ;;  %v4213_v25 = vld [vmem:[#allocation2 + $0x5c0] sm:$0xff]  ;;  %v4199_v24 = vld [vmem:[#allocation2 + $0x430] sm:$0xff]  ;;  %v4198_v48 = vld [vmem:[#allocation2 + $0x428] sm:$0xff] }
 0xb84   :  { %v4076_v9 = vsel %vm4075_vm3, %v4037_v50, %v4036_v19  ;;  %v4209_v31 = vld [vmem:[#allocation2 + $0x540] sm:$0xff]  ;;  %v4194_v39 = vld [vmem:[#allocation2 + $0x3a8] sm:$0xff]  ;;  %v4167_v23 = vld [vmem:[#allocation2 + $0xf0] sm:$0xff] }
 0xb85   :  { %v4025_v4 = vrot.slane %v4024_v12, 2  ;;  %v4021_v63 = vrot.slane %v4020_v55, 1  ;;  %v4029_v29 = vrot.slane %v3986_v34, 4  ;;  %v4040_v41 = vmul.f32 0.125, %v4016_v40  ;;  %v4189_v10 = vld [vmem:[#allocation2 + $0x320] sm:$0xff]  ;;  %4296 = vmatprep.subr.mxu1 %v4167_v23  ;;  %v4164_v33 = vld [vmem:[#allocation2 + $0x78] sm:$0xff] }
 0xb86   :  { %v4078_v6 = vsel %vm4077_vm4, %v4038_v43, %v4076_v9  ;;  %4297 = vmatpush1.msra.mxu1 %v4166_v27  ;;  %v4163_v15 = vld [vmem:[#allocation2 + $0x70] sm:$0xff]  ;;  %v4240_v50 = vld [vmem:[#allocation2 + $0x878] sm:$0xff]  ;;  %v4230_v43 = vld [vmem:[#allocation2 + $0x768] sm:$0xff] }
 0xb87   :  { %v4026_v37 = vadd.f32 %v4025_v4, %v4024_v12  ;;  %v4030_v46 = vadd.f32 %v4029_v29, %v3986_v34  ;;  %v4022_v44 = vadd.f32 %v4021_v63, %v4020_v55  ;;  %v4080_v45 = vsel %vm4079_vm5, %v4039_v52, %v4078_v6  ;;  %v4184_v55 = vld [vmem:[#allocation2 + $0x298] sm:$0xff]  ;;  %v4183_v12 = vld [vmem:[#allocation2 + $0x290] sm:$0xff]  ;;  %v4178_v34 = vld [vmem:[#allocation2 + $0x208] sm:$0xff] }
 0xb88   :  { %v4082_v20 = vsel %vm4081_vm6, %v4040_v41, %v4080_v45  ;;  %v4173_v4 = vld [vmem:[#allocation2 + $0x180] sm:$0xff]  ;;  %v4162_v29 = vld [vmem:[#allocation2 + $0x68] sm:$0xff]  ;;  %v4220_v19 = vld [vmem:[#allocation2 + $0x658] sm:$0xff] }
 0xb89   :  { %v4027_v2 = vrot.slane %v4026_v37, 1  ;;  %v4031_v47 = vrot.slane %v4030_v46, 2  ;;  %v4041_v5 = vmul.f32 0.125, %v4022_v44  ;;  %v4169_v63 = vld [vmem:[#allocation2 + $0x100] sm:$0xff]  ;;  %4298 = vmatprep.subr.mxu1 %v4162_v29  ;;  %v4215_v52 = vld [vmem:[#allocation2 + $0x5d0] sm:$0xff]  ;;  %v4210_v41 = vld [vmem:[#allocation2 + $0x548] sm:$0xff] }
 0xb8a   :  { %v4195_v9 = vld [vmem:[#allocation2 + $0x3b0] sm:$0xff]  ;;  %v4185_v6 = vld [vmem:[#allocation2 + $0x2a0] sm:$0xff] }
 0xb8b   :  { %v4028_v58 = vadd.f32 %v4027_v2, %v4026_v37  ;;  %v4032_v8 = vadd.f32 %v4031_v47, %v4030_v46  ;;  %v4084_v21 = vsel %vm4083_vm7, %v4041_v5, %v4082_v20  ;;  %v4161_v37 = vld [vmem:[#allocation2 + $0x60] sm:$0xff]  ;;  %v4515_v46 = vld [vmem:[#allocation6 + $0xf] ss:$0 sm:$0xff]  ;;  %v4200_v5 = vld [vmem:[#allocation2 + $0x438] sm:$0xff] }
 0xb8c   :  { %4299 = vmatpush1.msra.mxu1 %v4161_v37  ;;  %v4175_v45 = vld [vmem:[#allocation2 + $0x190] sm:$0xff]  ;;  %v4170_v20 = vld [vmem:[#allocation2 + $0x108] sm:$0xff] }
 0xb8d   :  { %v4033_v51 = vrot.slane %v4032_v8, 1  ;;  %v4042_v14 = vmul.f32 0.125, %v4028_v58  ;;  %5069 = vmatprep.subr.mxu1 %v5969_v59  ;;  %v4235_v58 = vld [vmem:[#allocation2 + $0x7f0] sm:$0xff] }
 0xb8f   :  { %v4034_v7 = vadd.f32 %v4033_v51, %v4032_v8  ;;  %v4086_v54 = vsel %vm4085_vm8, %v4042_v14, %v4084_v21  ;;  %v4225_v8 = vld [vmem:[#allocation2 + $0x6e0] sm:$0xff]  ;;  %v4190_v14 = vld [vmem:[#allocation2 + $0x328] sm:$0xff]  ;;  %v4241_v21 = vld [vmem:[#allocation6 + $0x10] sm:$0x1f] }
 0xb90   :  { %v4205_v51 = vld [vmem:[#allocation2 + $0x4c0] sm:$0xff] }
 0xb91   :  { %v4043_v60 = vmul.f32 0.125, %v4034_v7  ;;  %v4180_v7 = vld [vmem:[#allocation2 + $0x218] sm:$0xff] }
 0xb93   :  { %v4088_v18 = vsel %vm4087_vm9, %v4043_v60, %v4086_v54  ;;  %v4165_v60 = vld [vmem:[#allocation2 + $0x80] sm:$0xff]  ;;  %v4246_v54 = vrot.slane %v4241_v21, %v5972_v57 }
 0xb94   :  { %5067 = vmatmul.mubr.f32.vlgmr.msra.gmra.mxu0 %v4088_v18 }
 0xb95   :  { %4340 = vmatpush1.msra.mxu0 %v4238_v3  ;;  %4403 = vmatprep.mubr.f32.mxu0 %v5969_v59  ;;  %v5973_v3 = vsub.s32 2, %v5421_v11 }
 0xb96   :  { %4341 = vmatprep.subr.mxu0 %v4234_v62  ;;  %v4250_v62 = vrot.slane %v4241_v21, %v5595_v28  ;;  %v5974_v28 = vsub.s32 4, %v5421_v11 }
 0xb97   :  { %4342 = vmatpush1.msra.mxu0 %v4233_v42  ;;  %v4254_v18 = vrot.slane %v4241_v21, %v5973_v3  ;;  %v4258_v42 = vrot.slane %v4241_v21, %v309_v61 }
 0xb98   :  { %4343 = vmatprep.subr.mxu0 %v4229_v32  ;;  %v4262_v61 = vrot.slane %v4241_v21, %v5974_v28 }
 0xb99   :  { %4344 = vmatpush1.msra.mxu0 %v4228_v26 }
 0xb9a   :  { %4345 = vmatprep.subr.mxu0 %v4224_v53 }
 0xb9b   :  { %4346 = vmatpush1.msra.mxu0 %v4223_v13 }
 0xb9c   :  { %4347 = vmatprep.subr.mxu0 %v4219_v35 }
 0xb9d   :  { %4348 = vmatpush1.msra.mxu0 %v4218_v22 }
 0xb9e   :  { %4349 = vmatprep.subr.mxu0 %v4214_v30 }
 0xb9f   :  { %4350 = vmatpush1.msra.mxu0 %v4213_v25 }
 0xba0   :  { %4351 = vmatprep.subr.mxu0 %v4209_v31 }
 0xba1   :  { %4352 = vmatpush1.msra.mxu0 %v4208_v49 }
 0xba2   :  { %4353 = vmatprep.subr.mxu0 %v4204_v38 }
 0xba3   :  { %4354 = vmatpush1.msra.mxu0 %v4203_v16 }
 0xba4   :  { %4355 = vmatprep.subr.mxu0 %v4199_v24 }
 0xba5   :  { %4356 = vmatpush1.msra.mxu0 %v4198_v48 }
 0xba6   :  { %4357 = vmatprep.subr.mxu0 %v4194_v39 }
 0xba7   :  { %4358 = vmatpush1.msra.mxu0 %v4193_v17 }
 0xba8   :  { %4359 = vmatprep.subr.mxu0 %v4189_v10 }
 0xba9   :  { %4360 = vmatpush1.msra.mxu0 %v4188_v36 }
 0xbaa   :  { %4361 = vmatprep.subr.mxu0 %v4184_v55 }
 0xbab   :  { %4362 = vmatpush1.msra.mxu0 %v4183_v12 }
 0xbac   :  { %4363 = vmatprep.subr.mxu0 %v4179_v56 }
 0xbad   :  { %4364 = vmatpush1.msra.mxu0 %v4178_v34 }
 0xbae   :  { %4365 = vmatprep.subr.mxu0 %v4174_v1 }
 0xbaf   :  { %4366 = vmatpush1.msra.mxu0 %v4173_v4 }
 0xbb0   :  { %4367 = vmatprep.subr.mxu0 %v4169_v63 }
 0xbb1   :  { %4368 = vmatpush1.msra.mxu0 %v4168_v0 }
 0xbb2   :  { %4369 = vmatprep.subr.mxu0 %v4164_v33 }
 0xbb3   :  { %4370 = vmatpush1.msra.mxu0 %v4163_v15 }
 0xc54   :  { %v4156_v40 = vpop.f32.mrf.mxu0 }
 0xc55   :  { %v4157_v2 = vadd.f32 %v4515_v46, %v4156_v40 }
 0xc56   :  { %v5068_v44 = vpop.f32.mrf.mxu0 }
 0xc57   :  { %v4160_v47 = vmax.f32 %v4157_v2, 0.0 }
 0xc59   :  { %4333 = vmatmul.mubr.f32.vlgmr.msra.gmra.mxu1 %v4160_v47  ;;  %4404 = vmatmul.mubr.f32.vlgmr.msra.gmra.mxu0 %v4160_v47 }
 0xc5a   :  { %5070 = vmatpush3.msra.mxu1 %v4240_v50  ;;  %5101 = vmatprep.mubr.msk.f32.mxu1 %vm5281_vm0, %v5969_v59 }
 0xc5b   :  { %5071 = vmatprep.subr.mxu1 %v5969_v59 }
 0xc5c   :  { %5072 = vmatpush3.msra.mxu1 %v4235_v58 }
 0xc5d   :  { %5073 = vmatprep.subr.mxu1 %v5969_v59 }
 0xc5e   :  { %5074 = vmatpush3.msra.mxu1 %v4230_v43 }
 0xc5f   :  { %5075 = vmatprep.subr.mxu1 %v5969_v59 }
 0xc60   :  { %5076 = vmatpush3.msra.mxu1 %v4225_v8 }
 0xc61   :  { %5077 = vmatprep.subr.mxu1 %v5969_v59 }
 0xc62   :  { %5078 = vmatpush3.msra.mxu1 %v4220_v19 }
 0xc63   :  { %5079 = vmatprep.subr.mxu1 %v5969_v59 }
 0xc64   :  { %5080 = vmatpush3.msra.mxu1 %v4215_v52 }
 0xc65   :  { %5081 = vmatprep.subr.mxu1 %v5969_v59 }
 0xc66   :  { %5082 = vmatpush3.msra.mxu1 %v4210_v41 }
 0xc67   :  { %5083 = vmatprep.subr.mxu1 %v5969_v59 }
 0xc68   :  { %5084 = vmatpush3.msra.mxu1 %v4205_v51 }
 0xc69   :  { %5085 = vmatprep.subr.mxu1 %v5969_v59 }
 0xc6a   :  { %5086 = vmatpush3.msra.mxu1 %v4200_v5 }
 0xc6b   :  { %5087 = vmatprep.subr.mxu1 %v5969_v59 }
 0xc6c   :  { %5088 = vmatpush3.msra.mxu1 %v4195_v9 }
 0xc6d   :  { %5089 = vmatprep.subr.mxu1 %v5969_v59 }
 0xc6e   :  { %5090 = vmatpush3.msra.mxu1 %v4190_v14 }
 0xc6f   :  { %5091 = vmatprep.subr.mxu1 %v5969_v59 }
 0xc70   :  { %5092 = vmatpush3.msra.mxu1 %v4185_v6 }
 0xc71   :  { %5093 = vmatprep.subr.mxu1 %v5969_v59 }
 0xc72   :  { %5094 = vmatpush3.msra.mxu1 %v4180_v7 }
 0xc73   :  { %5095 = vmatprep.subr.mxu1 %v5969_v59 }
 0xc74   :  { %5096 = vmatpush3.msra.mxu1 %v4175_v45 }
 0xc75   :  { %5097 = vmatprep.subr.mxu1 %v5969_v59 }
 0xc76   :  { %5098 = vmatpush3.msra.mxu1 %v4170_v20 }
 0xc77   :  { %5099 = vmatprep.subr.mxu1 %v5969_v59 }
 0xc78   :  { %5100 = vmatpush3.msra.mxu1 %v4165_v60 }
 0xc79   :  { %5102 = vmatmul.mubr.f32.vlgmr.msra.gmra.mxu1 %v4160_v47 }
 0xd19   :  { %v4334_v32 = vpop.f32.mrf.mxu1  ;;  %v4405_v26 = vpop.f32.mrf.mxu0 }
 0xd1a   :  { %v4335_v53 = vadd.f32 %v4334_v32, %v4246_v54  ;;  %v4406_v13 = vadd.f32 %v4405_v26, %v4254_v18 }
 0xd1b   :  { %v4336_v35 = vpop.f32.mrf.mxu1  ;;  %v4407_v22 = vpop.f32.mrf.mxu0 }
 0xd1c   :  { %4480 = vst [vmem:[%s5958_s4] sm:$0xff] %v4335_v53  ;;  %4482 = vst [vmem:[%s5958_s4 + $0x10] sm:$0xff] %v4406_v13  ;;  %v4337_v59 = vadd.f32 %v4336_v35, %v4250_v62  ;;  %v4408_v57 = vadd.f32 %v4407_v22, %v4258_v42 }
 0xd1e   :  { %4481 = vst [vmem:[%s5958_s4 + $0x8] sm:$0xff] %v4337_v59  ;;  %4483 = vst [vmem:[%s5958_s4 + $0x18] sm:$0xff] %v4408_v57 }
 0xd39   :  { %v4476_v30 = vpop.f32.mrf.mxu1 }
 0xd3a   :  { %v4477_v25 = vadd.f32 %v4476_v30, %v4262_v61 }
 0xd3b   :  { %v5103_v31 = vpop.f32.mrf.mxu1 }
 0xd3c   :  { %4484 = vst [vmem:[%s5958_s4 + $0x20] sm:$0xff] %v4477_v25 }
 0xd3d   :  { %4489 = vsyncpa [#allocation3], 1 }
 0xd3e   :  { %4490 = vsyncpa [#allocation5], 1 }

</bundles_post_ra>
